<compile_context>
chip_gen: v6e
topology: v6e:2x2x1
jax: 0.10.0
libtpu: 0.0.40
codegen_flags: <defaults>
</compile_context>

<pallas_src>
import functools
import math

import jax
import jax.numpy as jnp
from jax import lax
from jax.experimental import pallas as pl
from jax.experimental.pallas import tpu as pltpu

EPS = 1e-5  # torch.nn.LayerNorm default eps


# ---------------------------------------------------------------------------
# Fused Pallas kernel
# ---------------------------------------------------------------------------
def _make_encode_kernel(depth, C_in, H, W, base_row, flat_len):
    HW = H * W
    Wo = W // 2
    C_total = C_in * (depth + 1)
    inv_W = 1.0 / float(W)
    inv_Wo = 1.0 / float(Wo)
    n_fixed = 14
    n_in = n_fixed + 5 * depth + 5

    def kernel(*refs):
        (x_ref, nz_ref, w1t_ref, b1_ref, a1_ref, w2t_ref, b2_ref,
         m0_ref, m2_ref, ssum_ref, sbc_ref, dsel_ref, ssd_ref, sbd_ref) = refs[:n_fixed]
        dense_refs = refs[n_fixed:n_fixed + 5 * depth]
        wd_ref, bd_ref, gd_ref, bed_ref, ad_ref = refs[n_fixed + 5 * depth:n_in]
        o_ref = refs[n_in]
        skip_ref = refs[n_in + 1]        # (C_total, flat_len) skip tensor (padded)
        col_ref = refs[n_in + 2]         # (6*C_in*depth, HW) im2col staging

        f32 = jnp.float32

        # Zero the skip scratch: the causal / frequency padding regions must be 0.
        skip_ref[...] = jnp.zeros((C_total, flat_len), f32)

        # ---- FeatureWiseAffine: x + Linear(PReLU(Linear(noise))) -------------
        h = jnp.dot(w1t_ref[...], nz_ref[0], preferred_element_type=f32) + b1_ref[...]
        h = jnp.where(h >= 0.0, h, a1_ref[...] * h)                     # PReLU
        aff = jnp.dot(w2t_ref[...], h, preferred_element_type=f32) + b2_ref[...]
        x0 = x_ref[0] + aff                                             # (C_in, HW)
        skip_ref[pl.ds(0, C_in), pl.ds(base_row * W, HW)] = x0

        m0 = m0_ref[...]                 # zero where w == 0      (left pad col)
        m2 = m2_ref[...]                 # zero where w == W - 1  (right pad col)

        def read_tap(c0, nc, row_off, kw):
            # shifted lane window == (time tap row_off, freq tap kw-1); masked
            # columns reproduce the zero frequency padding.
            start = (base_row + row_off) * W + (kw - 1)
            s = skip_ref[pl.ds(c0, nc), pl.ds(start, HW)]
            if kw == 0:
                s = s * m0
            elif kw == 2:
                s = s * m2
            return s

        def ln_prelu(y, ssum, sbc, inv_n, g, be, alpha):
            # LayerNorm over W-segments of the lane-dense slab, via MXU matmuls.
            mu = jnp.dot(y, ssum, preferred_element_type=f32) * inv_n
            yc = y - jnp.dot(mu, sbc, preferred_element_type=f32)
            var = jnp.dot(yc * yc, ssum, preferred_element_type=f32) * inv_n
            rstd = jnp.dot(lax.rsqrt(var + EPS), sbc, preferred_element_type=f32)
            y = yc * rstd * g + be
            return jnp.where(y >= 0.0, y, alpha * y)                    # PReLU

        # ---- DenseBlock: depth causal dilated conv layers --------------------
        for i in range(depth):
            dil = 2 ** i
            Ci = C_in * (i + 1)
            w_ref, b_ref, g_ref, be_ref, a_ref = dense_refs[5 * i:5 * i + 5]
            t = 0
            for kt in range(2):
                row_off = (kt - 1) * dil               # kt=0 -> -dil, kt=1 -> 0
                for kw in range(3):
                    col_ref[pl.ds(t * Ci, Ci), :] = read_tap(0, Ci, row_off, kw)
                    t += 1
            im2col = col_ref[pl.ds(0, 6 * Ci), :]                     # (6*Ci, HW)
            y = jnp.dot(w_ref[...], im2col, preferred_element_type=f32) + b_ref[...]
            y = ln_prelu(y, ssum_ref[...], sbc_ref[...], inv_W,
                         g_ref[...], be_ref[...], a_ref[...])
            skip_ref[pl.ds((i + 1) * C_in, C_in), pl.ds(base_row * W, HW)] = y

        # ---- downsample: Conv2d(1x3, stride (1,2), pad (0,1)) + LN + PReLU ---
        c0 = depth * C_in
        for kw in range(3):
            col_ref[pl.ds(kw * C_in, C_in), :] = read_tap(c0, C_in, 0, kw)
        dcol = col_ref[pl.ds(0, 3 * C_in), :]                         # (3*C_in, HW)
        yf = jnp.dot(wd_ref[...], dcol, preferred_element_type=f32)   # (C_out, HW)
        ys = jnp.dot(yf, dsel_ref[...], preferred_element_type=f32) + bd_ref[...]
        ys = ln_prelu(ys, ssd_ref[...], sbd_ref[...], inv_Wo,
                      gd_ref[...], bed_ref[...], ad_ref[...])
        o_ref[0] = ys                                                 # (C_out, H*Wo)

    return kernel


# ---------------------------------------------------------------------------
# Wrapper: parameter re-layout + single pallas_call
# ---------------------------------------------------------------------------
def encode_layer_forward(x, noise_level, params, depth):
    B, C_in, H, W = x.shape
    assert W % 2 == 0, "frame_length must be even for stride-2 downsample"
    HW = H * W
    Wo = W // 2
    HWo = H * Wo
    NC = noise_level.shape[1]
    NE = params["noise"]["w1"].shape[1]
    C_out = params["down"]["w_oihw"].shape[0]
    max_dil = 2 ** (depth - 1)
    C_total = C_in * (depth + 1)

    # First real data row of the skip scratch: >= max_dil + 1 (causal pad +
    # one guard row), rounded up so base_row*W is 128-lane aligned when possible.
    step = 128 // math.gcd(128, W)
    base_row = ((max_dil + 1 + step - 1) // step) * step
    flat_len = (base_row + H + 1) * W

    f32 = jnp.float32
    pn = params["noise"]

    x3 = x.reshape(B, C_in, HW)
    nz3 = noise_level.reshape(B, NC, 1)

    # Constants (boundary masks, LayerNorm segment matrices, stride-2 selector).
    w_idx = jnp.arange(HW, dtype=jnp.int32) % W
    mask0 = (w_idx != 0).astype(f32).reshape(1, HW)
    mask2 = (w_idx != (W - 1)).astype(f32).reshape(1, HW)
    eyeH = jnp.eye(H, dtype=f32)
    ssum = jnp.repeat(eyeH, W, axis=0)                  # (HW, H)
    sbc = ssum.T                                        # (H, HW)
    sel = (jnp.arange(W)[:, None] == 2 * jnp.arange(Wo)[None, :]).astype(f32)
    dsel = jnp.kron(eyeH, sel)                          # (HW, HWo)
    ssum_d = jnp.repeat(eyeH, Wo, axis=0)               # (HWo, H)
    sbc_d = ssum_d.T                                    # (H, HWo)

    fixed = [
        x3, nz3,
        pn["w1"].T, pn["b1"].reshape(NE, 1), pn["a1"].reshape(NE, 1),
        pn["w2"].T, pn["b2"].reshape(C_in, 1),
        mask0, mask2, ssum, sbc, dsel, ssum_d, sbc_d,
    ]

    dense_args = []
    for i in range(depth):
        dp = params["dense"][i]
        Ci = C_in * (i + 1)
        # torch skip ordering is [out_{i-1}, ..., out_0, x]; the kernel keeps a
        # fixed [x, out_0, ..., out_{i-1}] layout -> reverse the channel blocks
        # of the weight, then flatten taps to (C_out, 6*Ci) im2col order.
        w_fix = dp["w_oihw"].reshape(C_in, i + 1, C_in, 2, 3)[:, ::-1]
        w_fix = w_fix.reshape(C_in, Ci, 2, 3)
        w_flat = jnp.transpose(w_fix, (0, 2, 3, 1)).reshape(C_in, 6 * Ci)
        dense_args += [
            w_flat,
            dp["b"].reshape(C_in, 1),
            jnp.tile(dp["g"].reshape(1, W), (1, H)),
            jnp.tile(dp["be"].reshape(1, W), (1, H)),
            dp["a"].reshape(C_in, 1),
        ]

    dd = params["down"]
    wd_flat = jnp.transpose(dd["w_oihw"], (0, 2, 3, 1)).reshape(C_out, 3 * C_in)
    down_args = [
        wd_flat,
        dd["b"].reshape(C_out, 1),
        jnp.tile(dd["g"].reshape(1, Wo), (1, H)),
        jnp.tile(dd["be"].reshape(1, Wo), (1, H)),
        dd["a"].reshape(C_out, 1),
    ]

    inputs = fixed + dense_args + down_args

    def full_spec(shape):
        nd = len(shape)
        return pl.BlockSpec(shape, lambda b, _nd=nd: (0,) * _nd)

    in_specs = [pl.BlockSpec((1, C_in, HW), lambda b: (b, 0, 0)),
                pl.BlockSpec((1, NC, 1), lambda b: (b, 0, 0))]
    in_specs += [full_spec(a.shape) for a in inputs[2:]]

    kern = _make_encode_kernel(depth, C_in, H, W, base_row, flat_len)

    out = pl.pallas_call(
        kern,
        out_shape=jax.ShapeDtypeStruct((B, C_out, HWo), f32),
        grid=(B,),
        in_specs=in_specs,
        out_specs=pl.BlockSpec((1, C_out, HWo), lambda b: (b, 0, 0)),
        scratch_shapes=[
            pltpu.VMEM((C_total, flat_len), f32),          # skip tensor (padded)
            pltpu.VMEM((6 * C_in * depth, HW), f32),       # im2col staging
        ],
        compiler_params=pltpu.CompilerParams(dimension_semantics=("parallel",)),
    )(*inputs)
    return out.reshape(B, C_out, H, Wo)


# ---------------------------------------------------------------------------
# Deterministic parameter init (torch layout) + pure-JAX reference
# ---------------------------------------------------------------------------
def init_params(key, C_in, W, C_out, NC, depth):
    keys = jax.random.split(key, 4 * depth + 16)
    ki = iter(range(len(keys)))
    ne = NC * 4
    params = {
        "noise": dict(
            w1=0.3 * jax.random.normal(keys[next(ki)], (NC, ne), jnp.float32),
            b1=0.1 * jax.random.normal(keys[next(ki)], (1, ne), jnp.float32),
            a1=jnp.full((1, ne), 0.25, jnp.float32),
            w2=0.3 * jax.random.normal(keys[next(ki)], (ne, C_in), jnp.float32),
            b2=0.1 * jax.random.normal(keys[next(ki)], (1, C_in), jnp.float32),
        )
    }
    dense = []
    for i in range(depth):
        cin_i = C_in * (i + 1)
        w_oihw = 0.2 * jax.random.normal(keys[next(ki)], (C_in, cin_i, 2, 3),
                                         jnp.float32)
        dense.append(dict(
            w_oihw=w_oihw,
            b=0.1 * jax.random.normal(keys[next(ki)], (C_in,), jnp.float32),
            g=1.0 + 0.1 * jax.random.normal(keys[next(ki)], (W,), jnp.float32),
            be=0.1 * jax.random.normal(keys[next(ki)], (W,), jnp.float32),
            a=jnp.full((C_in,), 0.25, jnp.float32),
        ))
    params["dense"] = dense
    w_oihw = 0.2 * jax.random.normal(keys[next(ki)], (C_out, C_in, 1, 3),
                                     jnp.float32)
    params["down"] = dict(
        w_oihw=w_oihw,
        b=0.1 * jax.random.normal(keys[next(ki)], (C_out,), jnp.float32),
        g=1.0 + 0.1 * jax.random.normal(keys[next(ki)], (W // 2,), jnp.float32),
        be=0.1 * jax.random.normal(keys[next(ki)], (W // 2,), jnp.float32),
        a=jnp.full((C_out,), 0.25, jnp.float32),
    )
    return params


def _ref_ln_prelu(y, g, be, a):
    mu = y.mean(-1, keepdims=True)
    var = ((y - mu) ** 2).mean(-1, keepdims=True)
    y = (y - mu) / jnp.sqrt(var + EPS) * g.reshape(1, 1, 1, -1) + be.reshape(1, 1, 1, -1)
    return jnp.where(y >= 0.0, y, a.reshape(1, -1, 1, 1) * y)


def reference_forward(x, nz, params, depth):
    p = params["noise"]
    h = nz @ p["w1"] + p["b1"]
    h = jnp.where(h >= 0.0, h, p["a1"] * h)
    y = h @ p["w2"] + p["b2"]
    x = x + y[:, :, None, None]
    skip = x
    out = x
    for i in range(depth):
        d = 2 ** i
        dp = params["dense"][i]
        xp = jnp.pad(skip, ((0, 0), (0, 0), (d, 0), (1, 1)))
        out = lax.conv_general_dilated(
            xp, dp["w_oihw"], (1, 1), "VALID", rhs_dilation=(d, 1),
            dimension_numbers=("NCHW", "OIHW", "NCHW"),
            precision=lax.Precision.HIGHEST) + dp["b"].reshape(1, -1, 1, 1)
        out = _ref_ln_prelu(out, dp["g"], dp["be"], dp["a"])
        skip = jnp.concatenate([out, skip], axis=1)
    dp = params["down"]
    xp = jnp.pad(out, ((0, 0), (0, 0), (0, 0), (1, 1)))
    y = lax.conv_general_dilated(
        xp, dp["w_oihw"], (1, 2), "VALID",
        dimension_numbers=("NCHW", "OIHW", "NCHW"),
        precision=lax.Precision.HIGHEST) + dp["b"].reshape(1, -1, 1, 1)
    return _ref_ln_prelu(y, dp["g"], dp["be"], dp["a"])


# ---------------------------------------------------------------------------
if __name__ == "__main__":
    B, C_IN, H, W = 2, 4, 8, 16          # batch, n_in_channels, frames, frame_length
    C_OUT, NC, DEPTH = 8, 4, 5           # n_out_channels, noise_level_channels, depth

    key = jax.random.PRNGKey(0)
    kx, kn, kp = jax.random.split(key, 3)
    x = jax.random.normal(kx, (B, C_IN, H, W), jnp.float32)
    noise_level = jax.random.normal(kn, (B, NC), jnp.float32)
    params = init_params(kp, C_IN, W, C_OUT, NC, DEPTH)

    fwd = jax.jit(functools.partial(encode_layer_forward, depth=DEPTH))
    y = fwd(x, noise_level, params)
    y = jax.block_until_ready(y)

    assert y.shape == (B, C_OUT, H, W // 2), y.shape
    assert bool(jnp.all(jnp.isfinite(y)))

    y_ref = reference_forward(x, noise_level, params, DEPTH)
    if not jnp.allclose(y, y_ref, atol=1e-2, rtol=1e-2):
        raise AssertionError(
            f"mismatch vs reference, max_err={float(jnp.max(jnp.abs(y - y_ref)))}")

    print("KERNEL_OK")
</pallas_src>

<mosaic_0001>
module attributes {stable_mosaic.version = 11 : i64} {
  func.func @kernel(%arg0: i32, %arg1: memref<1x4x128xf32, #tpu.memory_space<vmem>>, %arg2: memref<1x4x1xf32, #tpu.memory_space<vmem>>, %arg3: memref<16x4xf32, #tpu.memory_space<vmem>>, %arg4: memref<16x1xf32, #tpu.memory_space<vmem>>, %arg5: memref<16x1xf32, #tpu.memory_space<vmem>>, %arg6: memref<4x16xf32, #tpu.memory_space<vmem>>, %arg7: memref<4x1xf32, #tpu.memory_space<vmem>>, %arg8: memref<1x128xf32, #tpu.memory_space<vmem>>, %arg9: memref<1x128xf32, #tpu.memory_space<vmem>>, %arg10: memref<128x8xf32, #tpu.memory_space<vmem>>, %arg11: memref<8x128xf32, #tpu.memory_space<vmem>>, %arg12: memref<128x64xf32, #tpu.memory_space<vmem>>, %arg13: memref<64x8xf32, #tpu.memory_space<vmem>>, %arg14: memref<8x64xf32, #tpu.memory_space<vmem>>, %arg15: memref<4x24xf32, #tpu.memory_space<vmem>>, %arg16: memref<4x1xf32, #tpu.memory_space<vmem>>, %arg17: memref<1x128xf32, #tpu.memory_space<vmem>>, %arg18: memref<1x128xf32, #tpu.memory_space<vmem>>, %arg19: memref<4x1xf32, #tpu.memory_space<vmem>>, %arg20: memref<4x48xf32, #tpu.memory_space<vmem>>, %arg21: memref<4x1xf32, #tpu.memory_space<vmem>>, %arg22: memref<1x128xf32, #tpu.memory_space<vmem>>, %arg23: memref<1x128xf32, #tpu.memory_space<vmem>>, %arg24: memref<4x1xf32, #tpu.memory_space<vmem>>, %arg25: memref<4x72xf32, #tpu.memory_space<vmem>>, %arg26: memref<4x1xf32, #tpu.memory_space<vmem>>, %arg27: memref<1x128xf32, #tpu.memory_space<vmem>>, %arg28: memref<1x128xf32, #tpu.memory_space<vmem>>, %arg29: memref<4x1xf32, #tpu.memory_space<vmem>>, %arg30: memref<4x96xf32, #tpu.memory_space<vmem>>, %arg31: memref<4x1xf32, #tpu.memory_space<vmem>>, %arg32: memref<1x128xf32, #tpu.memory_space<vmem>>, %arg33: memref<1x128xf32, #tpu.memory_space<vmem>>, %arg34: memref<4x1xf32, #tpu.memory_space<vmem>>, %arg35: memref<4x120xf32, #tpu.memory_space<vmem>>, %arg36: memref<4x1xf32, #tpu.memory_space<vmem>>, %arg37: memref<1x128xf32, #tpu.memory_space<vmem>>, %arg38: memref<1x128xf32, #tpu.memory_space<vmem>>, %arg39: memref<4x1xf32, #tpu.memory_space<vmem>>, %arg40: memref<8x12xf32, #tpu.memory_space<vmem>>, %arg41: memref<8x1xf32, #tpu.memory_space<vmem>>, %arg42: memref<1x64xf32, #tpu.memory_space<vmem>>, %arg43: memref<1x64xf32, #tpu.memory_space<vmem>>, %arg44: memref<8x1xf32, #tpu.memory_space<vmem>>, %arg45: memref<1x8x64xf32, #tpu.memory_space<vmem>>, %arg46: memref<24x528xf32, #tpu.memory_space<vmem>>, %arg47: memref<120x128xf32, #tpu.memory_space<vmem>>) attributes {dimension_semantics = [#tpu.dimension_semantics<parallel>], iteration_bounds = array<i64: 2>, scalar_prefetch = 0 : i64, scratch_operands = 2 : i64, tpu.core_type = #tpu.core_type<tc>, window_params = [{transform_indices = @transform_0, window_bounds = array<i64: 1, 4, 128>}, {transform_indices = @transform_1, window_bounds = array<i64: 1, 4, 1>}, {pipeline_mode = #tpu.pipeline_mode<synchronous>, transform_indices = @transform_2, window_bounds = array<i64: 16, 4>}, {pipeline_mode = #tpu.pipeline_mode<synchronous>, transform_indices = @transform_3, window_bounds = array<i64: 16, 1>}, {pipeline_mode = #tpu.pipeline_mode<synchronous>, transform_indices = @transform_4, window_bounds = array<i64: 16, 1>}, {pipeline_mode = #tpu.pipeline_mode<synchronous>, transform_indices = @transform_5, window_bounds = array<i64: 4, 16>}, {pipeline_mode = #tpu.pipeline_mode<synchronous>, transform_indices = @transform_6, window_bounds = array<i64: 4, 1>}, {pipeline_mode = #tpu.pipeline_mode<synchronous>, transform_indices = @transform_7, window_bounds = array<i64: 1, 128>}, {pipeline_mode = #tpu.pipeline_mode<synchronous>, transform_indices = @transform_8, window_bounds = array<i64: 1, 128>}, {pipeline_mode = #tpu.pipeline_mode<synchronous>, transform_indices = @transform_9, window_bounds = array<i64: 128, 8>}, {pipeline_mode = #tpu.pipeline_mode<synchronous>, transform_indices = @transform_10, window_bounds = array<i64: 8, 128>}, {pipeline_mode = #tpu.pipeline_mode<synchronous>, transform_indices = @transform_11, window_bounds = array<i64: 128, 64>}, {pipeline_mode = #tpu.pipeline_mode<synchronous>, transform_indices = @transform_12, window_bounds = array<i64: 64, 8>}, {pipeline_mode = #tpu.pipeline_mode<synchronous>, transform_indices = @transform_13, window_bounds = array<i64: 8, 64>}, {pipeline_mode = #tpu.pipeline_mode<synchronous>, transform_indices = @transform_14, window_bounds = array<i64: 4, 24>}, {pipeline_mode = #tpu.pipeline_mode<synchronous>, transform_indices = @transform_15, window_bounds = array<i64: 4, 1>}, {pipeline_mode = #tpu.pipeline_mode<synchronous>, transform_indices = @transform_16, window_bounds = array<i64: 1, 128>}, {pipeline_mode = #tpu.pipeline_mode<synchronous>, transform_indices = @transform_17, window_bounds = array<i64: 1, 128>}, {pipeline_mode = #tpu.pipeline_mode<synchronous>, transform_indices = @transform_18, window_bounds = array<i64: 4, 1>}, {pipeline_mode = #tpu.pipeline_mode<synchronous>, transform_indices = @transform_19, window_bounds = array<i64: 4, 48>}, {pipeline_mode = #tpu.pipeline_mode<synchronous>, transform_indices = @transform_20, window_bounds = array<i64: 4, 1>}, {pipeline_mode = #tpu.pipeline_mode<synchronous>, transform_indices = @transform_21, window_bounds = array<i64: 1, 128>}, {pipeline_mode = #tpu.pipeline_mode<synchronous>, transform_indices = @transform_22, window_bounds = array<i64: 1, 128>}, {pipeline_mode = #tpu.pipeline_mode<synchronous>, transform_indices = @transform_23, window_bounds = array<i64: 4, 1>}, {pipeline_mode = #tpu.pipeline_mode<synchronous>, transform_indices = @transform_24, window_bounds = array<i64: 4, 72>}, {pipeline_mode = #tpu.pipeline_mode<synchronous>, transform_indices = @transform_25, window_bounds = array<i64: 4, 1>}, {pipeline_mode = #tpu.pipeline_mode<synchronous>, transform_indices = @transform_26, window_bounds = array<i64: 1, 128>}, {pipeline_mode = #tpu.pipeline_mode<synchronous>, transform_indices = @transform_27, window_bounds = array<i64: 1, 128>}, {pipeline_mode = #tpu.pipeline_mode<synchronous>, transform_indices = @transform_28, window_bounds = array<i64: 4, 1>}, {pipeline_mode = #tpu.pipeline_mode<synchronous>, transform_indices = @transform_29, window_bounds = array<i64: 4, 96>}, {pipeline_mode = #tpu.pipeline_mode<synchronous>, transform_indices = @transform_30, window_bounds = array<i64: 4, 1>}, {pipeline_mode = #tpu.pipeline_mode<synchronous>, transform_indices = @transform_31, window_bounds = array<i64: 1, 128>}, {pipeline_mode = #tpu.pipeline_mode<synchronous>, transform_indices = @transform_32, window_bounds = array<i64: 1, 128>}, {pipeline_mode = #tpu.pipeline_mode<synchronous>, transform_indices = @transform_33, window_bounds = array<i64: 4, 1>}, {pipeline_mode = #tpu.pipeline_mode<synchronous>, transform_indices = @transform_34, window_bounds = array<i64: 4, 120>}, {pipeline_mode = #tpu.pipeline_mode<synchronous>, transform_indices = @transform_35, window_bounds = array<i64: 4, 1>}, {pipeline_mode = #tpu.pipeline_mode<synchronous>, transform_indices = @transform_36, window_bounds = array<i64: 1, 128>}, {pipeline_mode = #tpu.pipeline_mode<synchronous>, transform_indices = @transform_37, window_bounds = array<i64: 1, 128>}, {pipeline_mode = #tpu.pipeline_mode<synchronous>, transform_indices = @transform_38, window_bounds = array<i64: 4, 1>}, {pipeline_mode = #tpu.pipeline_mode<synchronous>, transform_indices = @transform_39, window_bounds = array<i64: 8, 12>}, {pipeline_mode = #tpu.pipeline_mode<synchronous>, transform_indices = @transform_40, window_bounds = array<i64: 8, 1>}, {pipeline_mode = #tpu.pipeline_mode<synchronous>, transform_indices = @transform_41, window_bounds = array<i64: 1, 64>}, {pipeline_mode = #tpu.pipeline_mode<synchronous>, transform_indices = @transform_42, window_bounds = array<i64: 1, 64>}, {pipeline_mode = #tpu.pipeline_mode<synchronous>, transform_indices = @transform_43, window_bounds = array<i64: 8, 1>}, {transform_indices = @transform_44, window_bounds = array<i64: 1, 8, 64>}]} {
    %cst = arith.constant 0.000000e+00 : f32
    %0 = vector.broadcast %cst : f32 to vector<24x528xf32>
    %c0 = arith.constant 0 : index
    %c0_0 = arith.constant 0 : index
    %1 = vector.load %arg46[%c0, %c0_0] : memref<24x528xf32, #tpu.memory_space<vmem>>, vector<24x528xf32>
    tpu.vector_store %arg46[%c0, %c0_0], %0 {strides = array<i32>} : memref<24x528xf32, #tpu.memory_space<vmem>>, vector<24x528xf32>,
    %c0_1 = arith.constant 0 : index
    %c0_2 = arith.constant 0 : index
    %2 = vector.load %arg3[%c0_1, %c0_2] : memref<16x4xf32, #tpu.memory_space<vmem>>, vector<16x4xf32>
    %c0_3 = arith.constant 0 : index
    %c0_4 = arith.constant 0 : index
    %c0_5 = arith.constant 0 : index
    %3 = vector.load %arg2[%c0_3, %c0_4, %c0_5] : memref<1x4x1xf32, #tpu.memory_space<vmem>>, vector<1x4x1xf32>
    %4 = vector.shape_cast %3 : vector<1x4x1xf32> to vector<4x1xf32>
    %cst_6 = arith.constant dense<0.000000e+00> : vector<16x1xf32>
    %5 = tpu.matmul %2, %4, %cst_6 {dimension_numbers = #tpu.dot_dimension_numbers<[1], [0], [0], [1], [0, 0, 1, 1], [], []>} : vector<16x4xf32>, vector<4x1xf32>, vector<16x1xf32> -> vector<16x1xf32>
    %c0_7 = arith.constant 0 : index
    %c0_8 = arith.constant 0 : index
    %6 = vector.load %arg4[%c0_7, %c0_8] : memref<16x1xf32, #tpu.memory_space<vmem>>, vector<16x1xf32>
    %7 = arith.addf %5, %6 : vector<16x1xf32>
    %cst_9 = arith.constant 0.000000e+00 : f32
    %8 = vector.broadcast %cst_9 : f32 to vector<16x1xf32>
    %9 = arith.cmpf oge, %7, %8 : vector<16x1xf32>
    %c0_10 = arith.constant 0 : index
    %c0_11 = arith.constant 0 : index
    %10 = vector.load %arg5[%c0_10, %c0_11] : memref<16x1xf32, #tpu.memory_space<vmem>>, vector<16x1xf32>
    %11 = arith.mulf %10, %7 : vector<16x1xf32>
    %12 = arith.select %9, %7, %11 : vector<16x1xi1>, vector<16x1xf32>
    %c0_12 = arith.constant 0 : index
    %c0_13 = arith.constant 0 : index
    %13 = vector.load %arg6[%c0_12, %c0_13] : memref<4x16xf32, #tpu.memory_space<vmem>>, vector<4x16xf32>
    %cst_14 = arith.constant dense<0.000000e+00> : vector<4x1xf32>
    %14 = tpu.matmul %13, %12, %cst_14 {dimension_numbers = #tpu.dot_dimension_numbers<[1], [0], [0], [1], [0, 0, 1, 1], [], []>} : vector<4x16xf32>, vector<16x1xf32>, vector<4x1xf32> -> vector<4x1xf32>
    %c0_15 = arith.constant 0 : index
    %c0_16 = arith.constant 0 : index
    %15 = vector.load %arg7[%c0_15, %c0_16] : memref<4x1xf32, #tpu.memory_space<vmem>>, vector<4x1xf32>
    %16 = arith.addf %14, %15 : vector<4x1xf32>
    %c0_17 = arith.constant 0 : index
    %c0_18 = arith.constant 0 : index
    %c0_19 = arith.constant 0 : index
    %17 = vector.load %arg1[%c0_17, %c0_18, %c0_19] : memref<1x4x128xf32, #tpu.memory_space<vmem>>, vector<1x4x128xf32>
    %18 = vector.shape_cast %17 : vector<1x4x128xf32> to vector<4x128xf32>
    %19 = vector.broadcast %16 : vector<4x1xf32> to vector<4x128xf32>
    %20 = arith.addf %18, %19 : vector<4x128xf32>
    %c0_20 = arith.constant 0 : index
    %c384 = arith.constant 384 : index
    %21 = vector.load %arg46[%c0_20, %c384] : memref<24x528xf32, #tpu.memory_space<vmem>>, vector<4x128xf32>
    tpu.vector_store %arg46[%c0_20, %c384], %20 {strides = array<i32>} : memref<24x528xf32, #tpu.memory_space<vmem>>, vector<4x128xf32>,
    %c0_21 = arith.constant 0 : index
    %c0_22 = arith.constant 0 : index
    %22 = vector.load %arg8[%c0_21, %c0_22] : memref<1x128xf32, #tpu.memory_space<vmem>>, vector<1x128xf32>
    %c0_23 = arith.constant 0 : index
    %c0_24 = arith.constant 0 : index
    %23 = vector.load %arg9[%c0_23, %c0_24] : memref<1x128xf32, #tpu.memory_space<vmem>>, vector<1x128xf32>
    %c0_25 = arith.constant 0 : index
    %c367 = arith.constant 367 : index
    %24 = vector.load %arg46[%c0_25, %c367] : memref<24x528xf32, #tpu.memory_space<vmem>>, vector<4x128xf32>
    %25 = vector.broadcast %22 : vector<1x128xf32> to vector<4x128xf32>
    %26 = arith.mulf %24, %25 : vector<4x128xf32>
    %c0_26 = arith.constant 0 : index
    %c0_27 = arith.constant 0 : index
    %27 = vector.load %arg47[%c0_26, %c0_27] : memref<120x128xf32, #tpu.memory_space<vmem>>, vector<4x128xf32>
    tpu.vector_store %arg47[%c0_26, %c0_27], %26 {strides = array<i32>} : memref<120x128xf32, #tpu.memory_space<vmem>>, vector<4x128xf32>,
    %c0_28 = arith.constant 0 : index
    %c368 = arith.constant 368 : index
    %28 = vector.load %arg46[%c0_28, %c368] : memref<24x528xf32, #tpu.memory_space<vmem>>, vector<4x128xf32>
    %c4 = arith.constant 4 : index
    %c0_29 = arith.constant 0 : index
    %29 = vector.load %arg47[%c4, %c0_29] : memref<120x128xf32, #tpu.memory_space<vmem>>, vector<4x128xf32>
    tpu.vector_store %arg47[%c4, %c0_29], %28 {strides = array<i32>} : memref<120x128xf32, #tpu.memory_space<vmem>>, vector<4x128xf32>,
    %c0_30 = arith.constant 0 : index
    %c369 = arith.constant 369 : index
    %30 = vector.load %arg46[%c0_30, %c369] : memref<24x528xf32, #tpu.memory_space<vmem>>, vector<4x128xf32>
    %31 = vector.broadcast %23 : vector<1x128xf32> to vector<4x128xf32>
    %32 = arith.mulf %30, %31 : vector<4x128xf32>
    %c8 = arith.constant 8 : index
    %c0_31 = arith.constant 0 : index
    %33 = vector.load %arg47[%c8, %c0_31] : memref<120x128xf32, #tpu.memory_space<vmem>>, vector<4x128xf32>
    tpu.vector_store %arg47[%c8, %c0_31], %32 {strides = array<i32>} : memref<120x128xf32, #tpu.memory_space<vmem>>, vector<4x128xf32>,
    %c0_32 = arith.constant 0 : index
    %c383 = arith.constant 383 : index
    %34 = vector.load %arg46[%c0_32, %c383] : memref<24x528xf32, #tpu.memory_space<vmem>>, vector<4x128xf32>
    %35 = vector.broadcast %22 : vector<1x128xf32> to vector<4x128xf32>
    %36 = arith.mulf %34, %35 : vector<4x128xf32>
    %c12 = arith.constant 12 : index
    %c0_33 = arith.constant 0 : index
    %37 = vector.load %arg47[%c12, %c0_33] : memref<120x128xf32, #tpu.memory_space<vmem>>, vector<4x128xf32>
    tpu.vector_store %arg47[%c12, %c0_33], %36 {strides = array<i32>} : memref<120x128xf32, #tpu.memory_space<vmem>>, vector<4x128xf32>,
    %c0_34 = arith.constant 0 : index
    %c384_35 = arith.constant 384 : index
    %38 = vector.load %arg46[%c0_34, %c384_35] : memref<24x528xf32, #tpu.memory_space<vmem>>, vector<4x128xf32>
    %c16 = arith.constant 16 : index
    %c0_36 = arith.constant 0 : index
    %39 = vector.load %arg47[%c16, %c0_36] : memref<120x128xf32, #tpu.memory_space<vmem>>, vector<4x128xf32>
    tpu.vector_store %arg47[%c16, %c0_36], %38 {strides = array<i32>} : memref<120x128xf32, #tpu.memory_space<vmem>>, vector<4x128xf32>,
    %c0_37 = arith.constant 0 : index
    %c385 = arith.constant 385 : index
    %40 = vector.load %arg46[%c0_37, %c385] : memref<24x528xf32, #tpu.memory_space<vmem>>, vector<4x128xf32>
    %41 = vector.broadcast %23 : vector<1x128xf32> to vector<4x128xf32>
    %42 = arith.mulf %40, %41 : vector<4x128xf32>
    %c20 = arith.constant 20 : index
    %c0_38 = arith.constant 0 : index
    %43 = vector.load %arg47[%c20, %c0_38] : memref<120x128xf32, #tpu.memory_space<vmem>>, vector<4x128xf32>
    tpu.vector_store %arg47[%c20, %c0_38], %42 {strides = array<i32>} : memref<120x128xf32, #tpu.memory_space<vmem>>, vector<4x128xf32>,
    %c0_39 = arith.constant 0 : index
    %c0_40 = arith.constant 0 : index
    %44 = vector.load %arg47[%c0_39, %c0_40] : memref<120x128xf32, #tpu.memory_space<vmem>>, vector<24x128xf32>
    %c0_41 = arith.constant 0 : index
    %c0_42 = arith.constant 0 : index
    %45 = vector.load %arg15[%c0_41, %c0_42] : memref<4x24xf32, #tpu.memory_space<vmem>>, vector<4x24xf32>
    %cst_43 = arith.constant dense<0.000000e+00> : vector<4x128xf32>
    %46 = tpu.matmul %45, %44, %cst_43 {dimension_numbers = #tpu.dot_dimension_numbers<[1], [0], [0], [1], [0, 0, 1, 1], [], []>} : vector<4x24xf32>, vector<24x128xf32>, vector<4x128xf32> -> vector<4x128xf32>
    %c0_44 = arith.constant 0 : index
    %c0_45 = arith.constant 0 : index
    %47 = vector.load %arg16[%c0_44, %c0_45] : memref<4x1xf32, #tpu.memory_space<vmem>>, vector<4x1xf32>
    %48 = vector.broadcast %47 : vector<4x1xf32> to vector<4x128xf32>
    %49 = arith.addf %46, %48 : vector<4x128xf32>
    %c0_46 = arith.constant 0 : index
    %c0_47 = arith.constant 0 : index
    %50 = vector.load %arg10[%c0_46, %c0_47] : memref<128x8xf32, #tpu.memory_space<vmem>>, vector<128x8xf32>
    %c0_48 = arith.constant 0 : index
    %c0_49 = arith.constant 0 : index
    %51 = vector.load %arg11[%c0_48, %c0_49] : memref<8x128xf32, #tpu.memory_space<vmem>>, vector<8x128xf32>
    %c0_50 = arith.constant 0 : index
    %c0_51 = arith.constant 0 : index
    %52 = vector.load %arg17[%c0_50, %c0_51] : memref<1x128xf32, #tpu.memory_space<vmem>>, vector<1x128xf32>
    %c0_52 = arith.constant 0 : index
    %c0_53 = arith.constant 0 : index
    %53 = vector.load %arg18[%c0_52, %c0_53] : memref<1x128xf32, #tpu.memory_space<vmem>>, vector<1x128xf32>
    %c0_54 = arith.constant 0 : index
    %c0_55 = arith.constant 0 : index
    %54 = vector.load %arg19[%c0_54, %c0_55] : memref<4x1xf32, #tpu.memory_space<vmem>>, vector<4x1xf32>
    %cst_56 = arith.constant dense<0.000000e+00> : vector<4x8xf32>
    %55 = tpu.matmul %49, %50, %cst_56 {dimension_numbers = #tpu.dot_dimension_numbers<[1], [0], [0], [1], [0, 0, 1, 1], [], []>} : vector<4x128xf32>, vector<128x8xf32>, vector<4x8xf32> -> vector<4x8xf32>
    %cst_57 = arith.constant 6.250000e-02 : f32
    %56 = vector.broadcast %cst_57 : f32 to vector<4x8xf32>
    %57 = arith.mulf %55, %56 : vector<4x8xf32>
    %cst_58 = arith.constant dense<0.000000e+00> : vector<4x128xf32>
    %58 = tpu.matmul %57, %51, %cst_58 {dimension_numbers = #tpu.dot_dimension_numbers<[1], [0], [0], [1], [0, 0, 1, 1], [], []>} : vector<4x8xf32>, vector<8x128xf32>, vector<4x128xf32> -> vector<4x128xf32>
    %59 = arith.subf %49, %58 : vector<4x128xf32>
    %60 = arith.mulf %59, %59 : vector<4x128xf32>
    %cst_59 = arith.constant dense<0.000000e+00> : vector<4x8xf32>
    %61 = tpu.matmul %60, %50, %cst_59 {dimension_numbers = #tpu.dot_dimension_numbers<[1], [0], [0], [1], [0, 0, 1, 1], [], []>} : vector<4x128xf32>, vector<128x8xf32>, vector<4x8xf32> -> vector<4x8xf32>
    %cst_60 = arith.constant 6.250000e-02 : f32
    %62 = vector.broadcast %cst_60 : f32 to vector<4x8xf32>
    %63 = arith.mulf %61, %62 : vector<4x8xf32>
    %cst_61 = arith.constant 9.99999974E-6 : f32
    %64 = vector.broadcast %cst_61 : f32 to vector<4x8xf32>
    %65 = arith.addf %63, %64 : vector<4x8xf32>
    %66 = math.rsqrt %65 : vector<4x8xf32>
    %cst_62 = arith.constant dense<0.000000e+00> : vector<4x128xf32>
    %67 = tpu.matmul %66, %51, %cst_62 {dimension_numbers = #tpu.dot_dimension_numbers<[1], [0], [0], [1], [0, 0, 1, 1], [], []>} : vector<4x8xf32>, vector<8x128xf32>, vector<4x128xf32> -> vector<4x128xf32>
    %68 = arith.mulf %59, %67 : vector<4x128xf32>
    %69 = vector.broadcast %52 : vector<1x128xf32> to vector<4x128xf32>
    %70 = arith.mulf %68, %69 : vector<4x128xf32>
    %71 = vector.broadcast %53 : vector<1x128xf32> to vector<4x128xf32>
    %72 = arith.addf %70, %71 : vector<4x128xf32>
    %cst_63 = arith.constant 0.000000e+00 : f32
    %73 = vector.broadcast %cst_63 : f32 to vector<4x128xf32>
    %74 = arith.cmpf oge, %72, %73 : vector<4x128xf32>
    %75 = vector.broadcast %54 : vector<4x1xf32> to vector<4x128xf32>
    %76 = arith.mulf %75, %72 : vector<4x128xf32>
    %77 = arith.select %74, %72, %76 : vector<4x128xi1>, vector<4x128xf32>
    %c4_64 = arith.constant 4 : index
    %c384_65 = arith.constant 384 : index
    %78 = vector.load %arg46[%c4_64, %c384_65] : memref<24x528xf32, #tpu.memory_space<vmem>>, vector<4x128xf32>
    tpu.vector_store %arg46[%c4_64, %c384_65], %77 {strides = array<i32>} : memref<24x528xf32, #tpu.memory_space<vmem>>, vector<4x128xf32>,
    %c0_66 = arith.constant 0 : index
    %c351 = arith.constant 351 : index
    %79 = vector.load %arg46[%c0_66, %c351] : memref<24x528xf32, #tpu.memory_space<vmem>>, vector<8x128xf32>
    %80 = vector.broadcast %22 : vector<1x128xf32> to vector<8x128xf32>
    %81 = arith.mulf %79, %80 : vector<8x128xf32>
    %c0_67 = arith.constant 0 : index
    %c0_68 = arith.constant 0 : index
    %82 = vector.load %arg47[%c0_67, %c0_68] : memref<120x128xf32, #tpu.memory_space<vmem>>, vector<8x128xf32>
    tpu.vector_store %arg47[%c0_67, %c0_68], %81 {strides = array<i32>} : memref<120x128xf32, #tpu.memory_space<vmem>>, vector<8x128xf32>,
    %c0_69 = arith.constant 0 : index
    %c352 = arith.constant 352 : index
    %83 = vector.load %arg46[%c0_69, %c352] : memref<24x528xf32, #tpu.memory_space<vmem>>, vector<8x128xf32>
    %c8_70 = arith.constant 8 : index
    %c0_71 = arith.constant 0 : index
    %84 = vector.load %arg47[%c8_70, %c0_71] : memref<120x128xf32, #tpu.memory_space<vmem>>, vector<8x128xf32>
    tpu.vector_store %arg47[%c8_70, %c0_71], %83 {strides = array<i32>} : memref<120x128xf32, #tpu.memory_space<vmem>>, vector<8x128xf32>,
    %c0_72 = arith.constant 0 : index
    %c353 = arith.constant 353 : index
    %85 = vector.load %arg46[%c0_72, %c353] : memref<24x528xf32, #tpu.memory_space<vmem>>, vector<8x128xf32>
    %86 = vector.broadcast %23 : vector<1x128xf32> to vector<8x128xf32>
    %87 = arith.mulf %85, %86 : vector<8x128xf32>
    %c16_73 = arith.constant 16 : index
    %c0_74 = arith.constant 0 : index
    %88 = vector.load %arg47[%c16_73, %c0_74] : memref<120x128xf32, #tpu.memory_space<vmem>>, vector<8x128xf32>
    tpu.vector_store %arg47[%c16_73, %c0_74], %87 {strides = array<i32>} : memref<120x128xf32, #tpu.memory_space<vmem>>, vector<8x128xf32>,
    %c0_75 = arith.constant 0 : index
    %c383_76 = arith.constant 383 : index
    %89 = vector.load %arg46[%c0_75, %c383_76] : memref<24x528xf32, #tpu.memory_space<vmem>>, vector<8x128xf32>
    %90 = vector.broadcast %22 : vector<1x128xf32> to vector<8x128xf32>
    %91 = arith.mulf %89, %90 : vector<8x128xf32>
    %c24 = arith.constant 24 : index
    %c0_77 = arith.constant 0 : index
    %92 = vector.load %arg47[%c24, %c0_77] : memref<120x128xf32, #tpu.memory_space<vmem>>, vector<8x128xf32>
    tpu.vector_store %arg47[%c24, %c0_77], %91 {strides = array<i32>} : memref<120x128xf32, #tpu.memory_space<vmem>>, vector<8x128xf32>,
    %c0_78 = arith.constant 0 : index
    %c384_79 = arith.constant 384 : index
    %93 = vector.load %arg46[%c0_78, %c384_79] : memref<24x528xf32, #tpu.memory_space<vmem>>, vector<8x128xf32>
    %c32 = arith.constant 32 : index
    %c0_80 = arith.constant 0 : index
    %94 = vector.load %arg47[%c32, %c0_80] : memref<120x128xf32, #tpu.memory_space<vmem>>, vector<8x128xf32>
    tpu.vector_store %arg47[%c32, %c0_80], %93 {strides = array<i32>} : memref<120x128xf32, #tpu.memory_space<vmem>>, vector<8x128xf32>,
    %c0_81 = arith.constant 0 : index
    %c385_82 = arith.constant 385 : index
    %95 = vector.load %arg46[%c0_81, %c385_82] : memref<24x528xf32, #tpu.memory_space<vmem>>, vector<8x128xf32>
    %96 = vector.broadcast %23 : vector<1x128xf32> to vector<8x128xf32>
    %97 = arith.mulf %95, %96 : vector<8x128xf32>
    %c40 = arith.constant 40 : index
    %c0_83 = arith.constant 0 : index
    %98 = vector.load %arg47[%c40, %c0_83] : memref<120x128xf32, #tpu.memory_space<vmem>>, vector<8x128xf32>
    tpu.vector_store %arg47[%c40, %c0_83], %97 {strides = array<i32>} : memref<120x128xf32, #tpu.memory_space<vmem>>, vector<8x128xf32>,
    %c0_84 = arith.constant 0 : index
    %c0_85 = arith.constant 0 : index
    %99 = vector.load %arg47[%c0_84, %c0_85] : memref<120x128xf32, #tpu.memory_space<vmem>>, vector<48x128xf32>
    %c0_86 = arith.constant 0 : index
    %c0_87 = arith.constant 0 : index
    %100 = vector.load %arg20[%c0_86, %c0_87] : memref<4x48xf32, #tpu.memory_space<vmem>>, vector<4x48xf32>
    %cst_88 = arith.constant dense<0.000000e+00> : vector<4x128xf32>
    %101 = tpu.matmul %100, %99, %cst_88 {dimension_numbers = #tpu.dot_dimension_numbers<[1], [0], [0], [1], [0, 0, 1, 1], [], []>} : vector<4x48xf32>, vector<48x128xf32>, vector<4x128xf32> -> vector<4x128xf32>
    %c0_89 = arith.constant 0 : index
    %c0_90 = arith.constant 0 : index
    %102 = vector.load %arg21[%c0_89, %c0_90] : memref<4x1xf32, #tpu.memory_space<vmem>>, vector<4x1xf32>
    %103 = vector.broadcast %102 : vector<4x1xf32> to vector<4x128xf32>
    %104 = arith.addf %101, %103 : vector<4x128xf32>
    %c0_91 = arith.constant 0 : index
    %c0_92 = arith.constant 0 : index
    %105 = vector.load %arg10[%c0_91, %c0_92] : memref<128x8xf32, #tpu.memory_space<vmem>>, vector<128x8xf32>
    %c0_93 = arith.constant 0 : index
    %c0_94 = arith.constant 0 : index
    %106 = vector.load %arg11[%c0_93, %c0_94] : memref<8x128xf32, #tpu.memory_space<vmem>>, vector<8x128xf32>
    %c0_95 = arith.constant 0 : index
    %c0_96 = arith.constant 0 : index
    %107 = vector.load %arg22[%c0_95, %c0_96] : memref<1x128xf32, #tpu.memory_space<vmem>>, vector<1x128xf32>
    %c0_97 = arith.constant 0 : index
    %c0_98 = arith.constant 0 : index
    %108 = vector.load %arg23[%c0_97, %c0_98] : memref<1x128xf32, #tpu.memory_space<vmem>>, vector<1x128xf32>
    %c0_99 = arith.constant 0 : index
    %c0_100 = arith.constant 0 : index
    %109 = vector.load %arg24[%c0_99, %c0_100] : memref<4x1xf32, #tpu.memory_space<vmem>>, vector<4x1xf32>
    %cst_101 = arith.constant dense<0.000000e+00> : vector<4x8xf32>
    %110 = tpu.matmul %104, %105, %cst_101 {dimension_numbers = #tpu.dot_dimension_numbers<[1], [0], [0], [1], [0, 0, 1, 1], [], []>} : vector<4x128xf32>, vector<128x8xf32>, vector<4x8xf32> -> vector<4x8xf32>
    %cst_102 = arith.constant 6.250000e-02 : f32
    %111 = vector.broadcast %cst_102 : f32 to vector<4x8xf32>
    %112 = arith.mulf %110, %111 : vector<4x8xf32>
    %cst_103 = arith.constant dense<0.000000e+00> : vector<4x128xf32>
    %113 = tpu.matmul %112, %106, %cst_103 {dimension_numbers = #tpu.dot_dimension_numbers<[1], [0], [0], [1], [0, 0, 1, 1], [], []>} : vector<4x8xf32>, vector<8x128xf32>, vector<4x128xf32> -> vector<4x128xf32>
    %114 = arith.subf %104, %113 : vector<4x128xf32>
    %115 = arith.mulf %114, %114 : vector<4x128xf32>
    %cst_104 = arith.constant dense<0.000000e+00> : vector<4x8xf32>
    %116 = tpu.matmul %115, %105, %cst_104 {dimension_numbers = #tpu.dot_dimension_numbers<[1], [0], [0], [1], [0, 0, 1, 1], [], []>} : vector<4x128xf32>, vector<128x8xf32>, vector<4x8xf32> -> vector<4x8xf32>
    %cst_105 = arith.constant 6.250000e-02 : f32
    %117 = vector.broadcast %cst_105 : f32 to vector<4x8xf32>
    %118 = arith.mulf %116, %117 : vector<4x8xf32>
    %cst_106 = arith.constant 9.99999974E-6 : f32
    %119 = vector.broadcast %cst_106 : f32 to vector<4x8xf32>
    %120 = arith.addf %118, %119 : vector<4x8xf32>
    %121 = math.rsqrt %120 : vector<4x8xf32>
    %cst_107 = arith.constant dense<0.000000e+00> : vector<4x128xf32>
    %122 = tpu.matmul %121, %106, %cst_107 {dimension_numbers = #tpu.dot_dimension_numbers<[1], [0], [0], [1], [0, 0, 1, 1], [], []>} : vector<4x8xf32>, vector<8x128xf32>, vector<4x128xf32> -> vector<4x128xf32>
    %123 = arith.mulf %114, %122 : vector<4x128xf32>
    %124 = vector.broadcast %107 : vector<1x128xf32> to vector<4x128xf32>
    %125 = arith.mulf %123, %124 : vector<4x128xf32>
    %126 = vector.broadcast %108 : vector<1x128xf32> to vector<4x128xf32>
    %127 = arith.addf %125, %126 : vector<4x128xf32>
    %cst_108 = arith.constant 0.000000e+00 : f32
    %128 = vector.broadcast %cst_108 : f32 to vector<4x128xf32>
    %129 = arith.cmpf oge, %127, %128 : vector<4x128xf32>
    %130 = vector.broadcast %109 : vector<4x1xf32> to vector<4x128xf32>
    %131 = arith.mulf %130, %127 : vector<4x128xf32>
    %132 = arith.select %129, %127, %131 : vector<4x128xi1>, vector<4x128xf32>
    %c8_109 = arith.constant 8 : index
    %c384_110 = arith.constant 384 : index
    %133 = vector.load %arg46[%c8_109, %c384_110] : memref<24x528xf32, #tpu.memory_space<vmem>>, vector<4x128xf32>
    tpu.vector_store %arg46[%c8_109, %c384_110], %132 {strides = array<i32>} : memref<24x528xf32, #tpu.memory_space<vmem>>, vector<4x128xf32>,
    %c0_111 = arith.constant 0 : index
    %c319 = arith.constant 319 : index
    %134 = vector.load %arg46[%c0_111, %c319] : memref<24x528xf32, #tpu.memory_space<vmem>>, vector<12x128xf32>
    %135 = vector.broadcast %22 : vector<1x128xf32> to vector<12x128xf32>
    %136 = arith.mulf %134, %135 : vector<12x128xf32>
    %c0_112 = arith.constant 0 : index
    %c0_113 = arith.constant 0 : index
    %137 = vector.load %arg47[%c0_112, %c0_113] : memref<120x128xf32, #tpu.memory_space<vmem>>, vector<12x128xf32>
    tpu.vector_store %arg47[%c0_112, %c0_113], %136 {strides = array<i32>} : memref<120x128xf32, #tpu.memory_space<vmem>>, vector<12x128xf32>,
    %c0_114 = arith.constant 0 : index
    %c320 = arith.constant 320 : index
    %138 = vector.load %arg46[%c0_114, %c320] : memref<24x528xf32, #tpu.memory_space<vmem>>, vector<12x128xf32>
    %c12_115 = arith.constant 12 : index
    %c0_116 = arith.constant 0 : index
    %139 = vector.load %arg47[%c12_115, %c0_116] : memref<120x128xf32, #tpu.memory_space<vmem>>, vector<12x128xf32>
    tpu.vector_store %arg47[%c12_115, %c0_116], %138 {strides = array<i32>} : memref<120x128xf32, #tpu.memory_space<vmem>>, vector<12x128xf32>,
    %c0_117 = arith.constant 0 : index
    %c321 = arith.constant 321 : index
    %140 = vector.load %arg46[%c0_117, %c321] : memref<24x528xf32, #tpu.memory_space<vmem>>, vector<12x128xf32>
    %141 = vector.broadcast %23 : vector<1x128xf32> to vector<12x128xf32>
    %142 = arith.mulf %140, %141 : vector<12x128xf32>
    %c24_118 = arith.constant 24 : index
    %c0_119 = arith.constant 0 : index
    %143 = vector.load %arg47[%c24_118, %c0_119] : memref<120x128xf32, #tpu.memory_space<vmem>>, vector<12x128xf32>
    tpu.vector_store %arg47[%c24_118, %c0_119], %142 {strides = array<i32>} : memref<120x128xf32, #tpu.memory_space<vmem>>, vector<12x128xf32>,
    %c0_120 = arith.constant 0 : index
    %c383_121 = arith.constant 383 : index
    %144 = vector.load %arg46[%c0_120, %c383_121] : memref<24x528xf32, #tpu.memory_space<vmem>>, vector<12x128xf32>
    %145 = vector.broadcast %22 : vector<1x128xf32> to vector<12x128xf32>
    %146 = arith.mulf %144, %145 : vector<12x128xf32>
    %c36 = arith.constant 36 : index
    %c0_122 = arith.constant 0 : index
    %147 = vector.load %arg47[%c36, %c0_122] : memref<120x128xf32, #tpu.memory_space<vmem>>, vector<12x128xf32>
    tpu.vector_store %arg47[%c36, %c0_122], %146 {strides = array<i32>} : memref<120x128xf32, #tpu.memory_space<vmem>>, vector<12x128xf32>,
    %c0_123 = arith.constant 0 : index
    %c384_124 = arith.constant 384 : index
    %148 = vector.load %arg46[%c0_123, %c384_124] : memref<24x528xf32, #tpu.memory_space<vmem>>, vector<12x128xf32>
    %c48 = arith.constant 48 : index
    %c0_125 = arith.constant 0 : index
    %149 = vector.load %arg47[%c48, %c0_125] : memref<120x128xf32, #tpu.memory_space<vmem>>, vector<12x128xf32>
    tpu.vector_store %arg47[%c48, %c0_125], %148 {strides = array<i32>} : memref<120x128xf32, #tpu.memory_space<vmem>>, vector<12x128xf32>,
    %c0_126 = arith.constant 0 : index
    %c385_127 = arith.constant 385 : index
    %150 = vector.load %arg46[%c0_126, %c385_127] : memref<24x528xf32, #tpu.memory_space<vmem>>, vector<12x128xf32>
    %151 = vector.broadcast %23 : vector<1x128xf32> to vector<12x128xf32>
    %152 = arith.mulf %150, %151 : vector<12x128xf32>
    %c60 = arith.constant 60 : index
    %c0_128 = arith.constant 0 : index
    %153 = vector.load %arg47[%c60, %c0_128] : memref<120x128xf32, #tpu.memory_space<vmem>>, vector<12x128xf32>
    tpu.vector_store %arg47[%c60, %c0_128], %152 {strides = array<i32>} : memref<120x128xf32, #tpu.memory_space<vmem>>, vector<12x128xf32>,
    %c0_129 = arith.constant 0 : index
    %c0_130 = arith.constant 0 : index
    %154 = vector.load %arg47[%c0_129, %c0_130] : memref<120x128xf32, #tpu.memory_space<vmem>>, vector<72x128xf32>
    %c0_131 = arith.constant 0 : index
    %c0_132 = arith.constant 0 : index
    %155 = vector.load %arg25[%c0_131, %c0_132] : memref<4x72xf32, #tpu.memory_space<vmem>>, vector<4x72xf32>
    %cst_133 = arith.constant dense<0.000000e+00> : vector<4x128xf32>
    %156 = tpu.matmul %155, %154, %cst_133 {dimension_numbers = #tpu.dot_dimension_numbers<[1], [0], [0], [1], [0, 0, 1, 1], [], []>} : vector<4x72xf32>, vector<72x128xf32>, vector<4x128xf32> -> vector<4x128xf32>
    %c0_134 = arith.constant 0 : index
    %c0_135 = arith.constant 0 : index
    %157 = vector.load %arg26[%c0_134, %c0_135] : memref<4x1xf32, #tpu.memory_space<vmem>>, vector<4x1xf32>
    %158 = vector.broadcast %157 : vector<4x1xf32> to vector<4x128xf32>
    %159 = arith.addf %156, %158 : vector<4x128xf32>
    %c0_136 = arith.constant 0 : index
    %c0_137 = arith.constant 0 : index
    %160 = vector.load %arg10[%c0_136, %c0_137] : memref<128x8xf32, #tpu.memory_space<vmem>>, vector<128x8xf32>
    %c0_138 = arith.constant 0 : index
    %c0_139 = arith.constant 0 : index
    %161 = vector.load %arg11[%c0_138, %c0_139] : memref<8x128xf32, #tpu.memory_space<vmem>>, vector<8x128xf32>
    %c0_140 = arith.constant 0 : index
    %c0_141 = arith.constant 0 : index
    %162 = vector.load %arg27[%c0_140, %c0_141] : memref<1x128xf32, #tpu.memory_space<vmem>>, vector<1x128xf32>
    %c0_142 = arith.constant 0 : index
    %c0_143 = arith.constant 0 : index
    %163 = vector.load %arg28[%c0_142, %c0_143] : memref<1x128xf32, #tpu.memory_space<vmem>>, vector<1x128xf32>
    %c0_144 = arith.constant 0 : index
    %c0_145 = arith.constant 0 : index
    %164 = vector.load %arg29[%c0_144, %c0_145] : memref<4x1xf32, #tpu.memory_space<vmem>>, vector<4x1xf32>
    %cst_146 = arith.constant dense<0.000000e+00> : vector<4x8xf32>
    %165 = tpu.matmul %159, %160, %cst_146 {dimension_numbers = #tpu.dot_dimension_numbers<[1], [0], [0], [1], [0, 0, 1, 1], [], []>} : vector<4x128xf32>, vector<128x8xf32>, vector<4x8xf32> -> vector<4x8xf32>
    %cst_147 = arith.constant 6.250000e-02 : f32
    %166 = vector.broadcast %cst_147 : f32 to vector<4x8xf32>
    %167 = arith.mulf %165, %166 : vector<4x8xf32>
    %cst_148 = arith.constant dense<0.000000e+00> : vector<4x128xf32>
    %168 = tpu.matmul %167, %161, %cst_148 {dimension_numbers = #tpu.dot_dimension_numbers<[1], [0], [0], [1], [0, 0, 1, 1], [], []>} : vector<4x8xf32>, vector<8x128xf32>, vector<4x128xf32> -> vector<4x128xf32>
    %169 = arith.subf %159, %168 : vector<4x128xf32>
    %170 = arith.mulf %169, %169 : vector<4x128xf32>
    %cst_149 = arith.constant dense<0.000000e+00> : vector<4x8xf32>
    %171 = tpu.matmul %170, %160, %cst_149 {dimension_numbers = #tpu.dot_dimension_numbers<[1], [0], [0], [1], [0, 0, 1, 1], [], []>} : vector<4x128xf32>, vector<128x8xf32>, vector<4x8xf32> -> vector<4x8xf32>
    %cst_150 = arith.constant 6.250000e-02 : f32
    %172 = vector.broadcast %cst_150 : f32 to vector<4x8xf32>
    %173 = arith.mulf %171, %172 : vector<4x8xf32>
    %cst_151 = arith.constant 9.99999974E-6 : f32
    %174 = vector.broadcast %cst_151 : f32 to vector<4x8xf32>
    %175 = arith.addf %173, %174 : vector<4x8xf32>
    %176 = math.rsqrt %175 : vector<4x8xf32>
    %cst_152 = arith.constant dense<0.000000e+00> : vector<4x128xf32>
    %177 = tpu.matmul %176, %161, %cst_152 {dimension_numbers = #tpu.dot_dimension_numbers<[1], [0], [0], [1], [0, 0, 1, 1], [], []>} : vector<4x8xf32>, vector<8x128xf32>, vector<4x128xf32> -> vector<4x128xf32>
    %178 = arith.mulf %169, %177 : vector<4x128xf32>
    %179 = vector.broadcast %162 : vector<1x128xf32> to vector<4x128xf32>
    %180 = arith.mulf %178, %179 : vector<4x128xf32>
    %181 = vector.broadcast %163 : vector<1x128xf32> to vector<4x128xf32>
    %182 = arith.addf %180, %181 : vector<4x128xf32>
    %cst_153 = arith.constant 0.000000e+00 : f32
    %183 = vector.broadcast %cst_153 : f32 to vector<4x128xf32>
    %184 = arith.cmpf oge, %182, %183 : vector<4x128xf32>
    %185 = vector.broadcast %164 : vector<4x1xf32> to vector<4x128xf32>
    %186 = arith.mulf %185, %182 : vector<4x128xf32>
    %187 = arith.select %184, %182, %186 : vector<4x128xi1>, vector<4x128xf32>
    %c12_154 = arith.constant 12 : index
    %c384_155 = arith.constant 384 : index
    %188 = vector.load %arg46[%c12_154, %c384_155] : memref<24x528xf32, #tpu.memory_space<vmem>>, vector<4x128xf32>
    tpu.vector_store %arg46[%c12_154, %c384_155], %187 {strides = array<i32>} : memref<24x528xf32, #tpu.memory_space<vmem>>, vector<4x128xf32>,
    %c0_156 = arith.constant 0 : index
    %c255 = arith.constant 255 : index
    %189 = vector.load %arg46[%c0_156, %c255] : memref<24x528xf32, #tpu.memory_space<vmem>>, vector<16x128xf32>
    %190 = vector.broadcast %22 : vector<1x128xf32> to vector<16x128xf32>
    %191 = arith.mulf %189, %190 : vector<16x128xf32>
    %c0_157 = arith.constant 0 : index
    %c0_158 = arith.constant 0 : index
    %192 = vector.load %arg47[%c0_157, %c0_158] : memref<120x128xf32, #tpu.memory_space<vmem>>, vector<16x128xf32>
    tpu.vector_store %arg47[%c0_157, %c0_158], %191 {strides = array<i32>} : memref<120x128xf32, #tpu.memory_space<vmem>>, vector<16x128xf32>,
    %c0_159 = arith.constant 0 : index
    %c256 = arith.constant 256 : index
    %193 = vector.load %arg46[%c0_159, %c256] : memref<24x528xf32, #tpu.memory_space<vmem>>, vector<16x128xf32>
    %c16_160 = arith.constant 16 : index
    %c0_161 = arith.constant 0 : index
    %194 = vector.load %arg47[%c16_160, %c0_161] : memref<120x128xf32, #tpu.memory_space<vmem>>, vector<16x128xf32>
    tpu.vector_store %arg47[%c16_160, %c0_161], %193 {strides = array<i32>} : memref<120x128xf32, #tpu.memory_space<vmem>>, vector<16x128xf32>,
    %c0_162 = arith.constant 0 : index
    %c257 = arith.constant 257 : index
    %195 = vector.load %arg46[%c0_162, %c257] : memref<24x528xf32, #tpu.memory_space<vmem>>, vector<16x128xf32>
    %196 = vector.broadcast %23 : vector<1x128xf32> to vector<16x128xf32>
    %197 = arith.mulf %195, %196 : vector<16x128xf32>
    %c32_163 = arith.constant 32 : index
    %c0_164 = arith.constant 0 : index
    %198 = vector.load %arg47[%c32_163, %c0_164] : memref<120x128xf32, #tpu.memory_space<vmem>>, vector<16x128xf32>
    tpu.vector_store %arg47[%c32_163, %c0_164], %197 {strides = array<i32>} : memref<120x128xf32, #tpu.memory_space<vmem>>, vector<16x128xf32>,
    %c0_165 = arith.constant 0 : index
    %c383_166 = arith.constant 383 : index
    %199 = vector.load %arg46[%c0_165, %c383_166] : memref<24x528xf32, #tpu.memory_space<vmem>>, vector<16x128xf32>
    %200 = vector.broadcast %22 : vector<1x128xf32> to vector<16x128xf32>
    %201 = arith.mulf %199, %200 : vector<16x128xf32>
    %c48_167 = arith.constant 48 : index
    %c0_168 = arith.constant 0 : index
    %202 = vector.load %arg47[%c48_167, %c0_168] : memref<120x128xf32, #tpu.memory_space<vmem>>, vector<16x128xf32>
    tpu.vector_store %arg47[%c48_167, %c0_168], %201 {strides = array<i32>} : memref<120x128xf32, #tpu.memory_space<vmem>>, vector<16x128xf32>,
    %c0_169 = arith.constant 0 : index
    %c384_170 = arith.constant 384 : index
    %203 = vector.load %arg46[%c0_169, %c384_170] : memref<24x528xf32, #tpu.memory_space<vmem>>, vector<16x128xf32>
    %c64 = arith.constant 64 : index
    %c0_171 = arith.constant 0 : index
    %204 = vector.load %arg47[%c64, %c0_171] : memref<120x128xf32, #tpu.memory_space<vmem>>, vector<16x128xf32>
    tpu.vector_store %arg47[%c64, %c0_171], %203 {strides = array<i32>} : memref<120x128xf32, #tpu.memory_space<vmem>>, vector<16x128xf32>,
    %c0_172 = arith.constant 0 : index
    %c385_173 = arith.constant 385 : index
    %205 = vector.load %arg46[%c0_172, %c385_173] : memref<24x528xf32, #tpu.memory_space<vmem>>, vector<16x128xf32>
    %206 = vector.broadcast %23 : vector<1x128xf32> to vector<16x128xf32>
    %207 = arith.mulf %205, %206 : vector<16x128xf32>
    %c80 = arith.constant 80 : index
    %c0_174 = arith.constant 0 : index
    %208 = vector.load %arg47[%c80, %c0_174] : memref<120x128xf32, #tpu.memory_space<vmem>>, vector<16x128xf32>
    tpu.vector_store %arg47[%c80, %c0_174], %207 {strides = array<i32>} : memref<120x128xf32, #tpu.memory_space<vmem>>, vector<16x128xf32>,
    %c0_175 = arith.constant 0 : index
    %c0_176 = arith.constant 0 : index
    %209 = vector.load %arg47[%c0_175, %c0_176] : memref<120x128xf32, #tpu.memory_space<vmem>>, vector<96x128xf32>
    %c0_177 = arith.constant 0 : index
    %c0_178 = arith.constant 0 : index
    %210 = vector.load %arg30[%c0_177, %c0_178] : memref<4x96xf32, #tpu.memory_space<vmem>>, vector<4x96xf32>
    %cst_179 = arith.constant dense<0.000000e+00> : vector<4x128xf32>
    %211 = tpu.matmul %210, %209, %cst_179 {dimension_numbers = #tpu.dot_dimension_numbers<[1], [0], [0], [1], [0, 0, 1, 1], [], []>} : vector<4x96xf32>, vector<96x128xf32>, vector<4x128xf32> -> vector<4x128xf32>
    %c0_180 = arith.constant 0 : index
    %c0_181 = arith.constant 0 : index
    %212 = vector.load %arg31[%c0_180, %c0_181] : memref<4x1xf32, #tpu.memory_space<vmem>>, vector<4x1xf32>
    %213 = vector.broadcast %212 : vector<4x1xf32> to vector<4x128xf32>
    %214 = arith.addf %211, %213 : vector<4x128xf32>
    %c0_182 = arith.constant 0 : index
    %c0_183 = arith.constant 0 : index
    %215 = vector.load %arg10[%c0_182, %c0_183] : memref<128x8xf32, #tpu.memory_space<vmem>>, vector<128x8xf32>
    %c0_184 = arith.constant 0 : index
    %c0_185 = arith.constant 0 : index
    %216 = vector.load %arg11[%c0_184, %c0_185] : memref<8x128xf32, #tpu.memory_space<vmem>>, vector<8x128xf32>
    %c0_186 = arith.constant 0 : index
    %c0_187 = arith.constant 0 : index
    %217 = vector.load %arg32[%c0_186, %c0_187] : memref<1x128xf32, #tpu.memory_space<vmem>>, vector<1x128xf32>
    %c0_188 = arith.constant 0 : index
    %c0_189 = arith.constant 0 : index
    %218 = vector.load %arg33[%c0_188, %c0_189] : memref<1x128xf32, #tpu.memory_space<vmem>>, vector<1x128xf32>
    %c0_190 = arith.constant 0 : index
    %c0_191 = arith.constant 0 : index
    %219 = vector.load %arg34[%c0_190, %c0_191] : memref<4x1xf32, #tpu.memory_space<vmem>>, vector<4x1xf32>
    %cst_192 = arith.constant dense<0.000000e+00> : vector<4x8xf32>
    %220 = tpu.matmul %214, %215, %cst_192 {dimension_numbers = #tpu.dot_dimension_numbers<[1], [0], [0], [1], [0, 0, 1, 1], [], []>} : vector<4x128xf32>, vector<128x8xf32>, vector<4x8xf32> -> vector<4x8xf32>
    %cst_193 = arith.constant 6.250000e-02 : f32
    %221 = vector.broadcast %cst_193 : f32 to vector<4x8xf32>
    %222 = arith.mulf %220, %221 : vector<4x8xf32>
    %cst_194 = arith.constant dense<0.000000e+00> : vector<4x128xf32>
    %223 = tpu.matmul %222, %216, %cst_194 {dimension_numbers = #tpu.dot_dimension_numbers<[1], [0], [0], [1], [0, 0, 1, 1], [], []>} : vector<4x8xf32>, vector<8x128xf32>, vector<4x128xf32> -> vector<4x128xf32>
    %224 = arith.subf %214, %223 : vector<4x128xf32>
    %225 = arith.mulf %224, %224 : vector<4x128xf32>
    %cst_195 = arith.constant dense<0.000000e+00> : vector<4x8xf32>
    %226 = tpu.matmul %225, %215, %cst_195 {dimension_numbers = #tpu.dot_dimension_numbers<[1], [0], [0], [1], [0, 0, 1, 1], [], []>} : vector<4x128xf32>, vector<128x8xf32>, vector<4x8xf32> -> vector<4x8xf32>
    %cst_196 = arith.constant 6.250000e-02 : f32
    %227 = vector.broadcast %cst_196 : f32 to vector<4x8xf32>
    %228 = arith.mulf %226, %227 : vector<4x8xf32>
    %cst_197 = arith.constant 9.99999974E-6 : f32
    %229 = vector.broadcast %cst_197 : f32 to vector<4x8xf32>
    %230 = arith.addf %228, %229 : vector<4x8xf32>
    %231 = math.rsqrt %230 : vector<4x8xf32>
    %cst_198 = arith.constant dense<0.000000e+00> : vector<4x128xf32>
    %232 = tpu.matmul %231, %216, %cst_198 {dimension_numbers = #tpu.dot_dimension_numbers<[1], [0], [0], [1], [0, 0, 1, 1], [], []>} : vector<4x8xf32>, vector<8x128xf32>, vector<4x128xf32> -> vector<4x128xf32>
    %233 = arith.mulf %224, %232 : vector<4x128xf32>
    %234 = vector.broadcast %217 : vector<1x128xf32> to vector<4x128xf32>
    %235 = arith.mulf %233, %234 : vector<4x128xf32>
    %236 = vector.broadcast %218 : vector<1x128xf32> to vector<4x128xf32>
    %237 = arith.addf %235, %236 : vector<4x128xf32>
    %cst_199 = arith.constant 0.000000e+00 : f32
    %238 = vector.broadcast %cst_199 : f32 to vector<4x128xf32>
    %239 = arith.cmpf oge, %237, %238 : vector<4x128xf32>
    %240 = vector.broadcast %219 : vector<4x1xf32> to vector<4x128xf32>
    %241 = arith.mulf %240, %237 : vector<4x128xf32>
    %242 = arith.select %239, %237, %241 : vector<4x128xi1>, vector<4x128xf32>
    %c16_200 = arith.constant 16 : index
    %c384_201 = arith.constant 384 : index
    %243 = vector.load %arg46[%c16_200, %c384_201] : memref<24x528xf32, #tpu.memory_space<vmem>>, vector<4x128xf32>
    tpu.vector_store %arg46[%c16_200, %c384_201], %242 {strides = array<i32>} : memref<24x528xf32, #tpu.memory_space<vmem>>, vector<4x128xf32>,
    %c0_202 = arith.constant 0 : index
    %c127 = arith.constant 127 : index
    %244 = vector.load %arg46[%c0_202, %c127] : memref<24x528xf32, #tpu.memory_space<vmem>>, vector<20x128xf32>
    %245 = vector.broadcast %22 : vector<1x128xf32> to vector<20x128xf32>
    %246 = arith.mulf %244, %245 : vector<20x128xf32>
    %c0_203 = arith.constant 0 : index
    %c0_204 = arith.constant 0 : index
    %247 = vector.load %arg47[%c0_203, %c0_204] : memref<120x128xf32, #tpu.memory_space<vmem>>, vector<20x128xf32>
    tpu.vector_store %arg47[%c0_203, %c0_204], %246 {strides = array<i32>} : memref<120x128xf32, #tpu.memory_space<vmem>>, vector<20x128xf32>,
    %c0_205 = arith.constant 0 : index
    %c128 = arith.constant 128 : index
    %248 = vector.load %arg46[%c0_205, %c128] : memref<24x528xf32, #tpu.memory_space<vmem>>, vector<20x128xf32>
    %c20_206 = arith.constant 20 : index
    %c0_207 = arith.constant 0 : index
    %249 = vector.load %arg47[%c20_206, %c0_207] : memref<120x128xf32, #tpu.memory_space<vmem>>, vector<20x128xf32>
    tpu.vector_store %arg47[%c20_206, %c0_207], %248 {strides = array<i32>} : memref<120x128xf32, #tpu.memory_space<vmem>>, vector<20x128xf32>,
    %c0_208 = arith.constant 0 : index
    %c129 = arith.constant 129 : index
    %250 = vector.load %arg46[%c0_208, %c129] : memref<24x528xf32, #tpu.memory_space<vmem>>, vector<20x128xf32>
    %251 = vector.broadcast %23 : vector<1x128xf32> to vector<20x128xf32>
    %252 = arith.mulf %250, %251 : vector<20x128xf32>
    %c40_209 = arith.constant 40 : index
    %c0_210 = arith.constant 0 : index
    %253 = vector.load %arg47[%c40_209, %c0_210] : memref<120x128xf32, #tpu.memory_space<vmem>>, vector<20x128xf32>
    tpu.vector_store %arg47[%c40_209, %c0_210], %252 {strides = array<i32>} : memref<120x128xf32, #tpu.memory_space<vmem>>, vector<20x128xf32>,
    %c0_211 = arith.constant 0 : index
    %c383_212 = arith.constant 383 : index
    %254 = vector.load %arg46[%c0_211, %c383_212] : memref<24x528xf32, #tpu.memory_space<vmem>>, vector<20x128xf32>
    %255 = vector.broadcast %22 : vector<1x128xf32> to vector<20x128xf32>
    %256 = arith.mulf %254, %255 : vector<20x128xf32>
    %c60_213 = arith.constant 60 : index
    %c0_214 = arith.constant 0 : index
    %257 = vector.load %arg47[%c60_213, %c0_214] : memref<120x128xf32, #tpu.memory_space<vmem>>, vector<20x128xf32>
    tpu.vector_store %arg47[%c60_213, %c0_214], %256 {strides = array<i32>} : memref<120x128xf32, #tpu.memory_space<vmem>>, vector<20x128xf32>,
    %c0_215 = arith.constant 0 : index
    %c384_216 = arith.constant 384 : index
    %258 = vector.load %arg46[%c0_215, %c384_216] : memref<24x528xf32, #tpu.memory_space<vmem>>, vector<20x128xf32>
    %c80_217 = arith.constant 80 : index
    %c0_218 = arith.constant 0 : index
    %259 = vector.load %arg47[%c80_217, %c0_218] : memref<120x128xf32, #tpu.memory_space<vmem>>, vector<20x128xf32>
    tpu.vector_store %arg47[%c80_217, %c0_218], %258 {strides = array<i32>} : memref<120x128xf32, #tpu.memory_space<vmem>>, vector<20x128xf32>,
    %c0_219 = arith.constant 0 : index
    %c385_220 = arith.constant 385 : index
    %260 = vector.load %arg46[%c0_219, %c385_220] : memref<24x528xf32, #tpu.memory_space<vmem>>, vector<20x128xf32>
    %261 = vector.broadcast %23 : vector<1x128xf32> to vector<20x128xf32>
    %262 = arith.mulf %260, %261 : vector<20x128xf32>
    %c100 = arith.constant 100 : index
    %c0_221 = arith.constant 0 : index
    %263 = vector.load %arg47[%c100, %c0_221] : memref<120x128xf32, #tpu.memory_space<vmem>>, vector<20x128xf32>
    tpu.vector_store %arg47[%c100, %c0_221], %262 {strides = array<i32>} : memref<120x128xf32, #tpu.memory_space<vmem>>, vector<20x128xf32>,
    %c0_222 = arith.constant 0 : index
    %c0_223 = arith.constant 0 : index
    %264 = vector.load %arg47[%c0_222, %c0_223] : memref<120x128xf32, #tpu.memory_space<vmem>>, vector<120x128xf32>
    %c0_224 = arith.constant 0 : index
    %c0_225 = arith.constant 0 : index
    %265 = vector.load %arg35[%c0_224, %c0_225] : memref<4x120xf32, #tpu.memory_space<vmem>>, vector<4x120xf32>
    %cst_226 = arith.constant dense<0.000000e+00> : vector<4x128xf32>
    %266 = tpu.matmul %265, %264, %cst_226 {dimension_numbers = #tpu.dot_dimension_numbers<[1], [0], [0], [1], [0, 0, 1, 1], [], []>} : vector<4x120xf32>, vector<120x128xf32>, vector<4x128xf32> -> vector<4x128xf32>
    %c0_227 = arith.constant 0 : index
    %c0_228 = arith.constant 0 : index
    %267 = vector.load %arg36[%c0_227, %c0_228] : memref<4x1xf32, #tpu.memory_space<vmem>>, vector<4x1xf32>
    %268 = vector.broadcast %267 : vector<4x1xf32> to vector<4x128xf32>
    %269 = arith.addf %266, %268 : vector<4x128xf32>
    %c0_229 = arith.constant 0 : index
    %c0_230 = arith.constant 0 : index
    %270 = vector.load %arg10[%c0_229, %c0_230] : memref<128x8xf32, #tpu.memory_space<vmem>>, vector<128x8xf32>
    %c0_231 = arith.constant 0 : index
    %c0_232 = arith.constant 0 : index
    %271 = vector.load %arg11[%c0_231, %c0_232] : memref<8x128xf32, #tpu.memory_space<vmem>>, vector<8x128xf32>
    %c0_233 = arith.constant 0 : index
    %c0_234 = arith.constant 0 : index
    %272 = vector.load %arg37[%c0_233, %c0_234] : memref<1x128xf32, #tpu.memory_space<vmem>>, vector<1x128xf32>
    %c0_235 = arith.constant 0 : index
    %c0_236 = arith.constant 0 : index
    %273 = vector.load %arg38[%c0_235, %c0_236] : memref<1x128xf32, #tpu.memory_space<vmem>>, vector<1x128xf32>
    %c0_237 = arith.constant 0 : index
    %c0_238 = arith.constant 0 : index
    %274 = vector.load %arg39[%c0_237, %c0_238] : memref<4x1xf32, #tpu.memory_space<vmem>>, vector<4x1xf32>
    %cst_239 = arith.constant dense<0.000000e+00> : vector<4x8xf32>
    %275 = tpu.matmul %269, %270, %cst_239 {dimension_numbers = #tpu.dot_dimension_numbers<[1], [0], [0], [1], [0, 0, 1, 1], [], []>} : vector<4x128xf32>, vector<128x8xf32>, vector<4x8xf32> -> vector<4x8xf32>
    %cst_240 = arith.constant 6.250000e-02 : f32
    %276 = vector.broadcast %cst_240 : f32 to vector<4x8xf32>
    %277 = arith.mulf %275, %276 : vector<4x8xf32>
    %cst_241 = arith.constant dense<0.000000e+00> : vector<4x128xf32>
    %278 = tpu.matmul %277, %271, %cst_241 {dimension_numbers = #tpu.dot_dimension_numbers<[1], [0], [0], [1], [0, 0, 1, 1], [], []>} : vector<4x8xf32>, vector<8x128xf32>, vector<4x128xf32> -> vector<4x128xf32>
    %279 = arith.subf %269, %278 : vector<4x128xf32>
    %280 = arith.mulf %279, %279 : vector<4x128xf32>
    %cst_242 = arith.constant dense<0.000000e+00> : vector<4x8xf32>
    %281 = tpu.matmul %280, %270, %cst_242 {dimension_numbers = #tpu.dot_dimension_numbers<[1], [0], [0], [1], [0, 0, 1, 1], [], []>} : vector<4x128xf32>, vector<128x8xf32>, vector<4x8xf32> -> vector<4x8xf32>
    %cst_243 = arith.constant 6.250000e-02 : f32
    %282 = vector.broadcast %cst_243 : f32 to vector<4x8xf32>
    %283 = arith.mulf %281, %282 : vector<4x8xf32>
    %cst_244 = arith.constant 9.99999974E-6 : f32
    %284 = vector.broadcast %cst_244 : f32 to vector<4x8xf32>
    %285 = arith.addf %283, %284 : vector<4x8xf32>
    %286 = math.rsqrt %285 : vector<4x8xf32>
    %cst_245 = arith.constant dense<0.000000e+00> : vector<4x128xf32>
    %287 = tpu.matmul %286, %271, %cst_245 {dimension_numbers = #tpu.dot_dimension_numbers<[1], [0], [0], [1], [0, 0, 1, 1], [], []>} : vector<4x8xf32>, vector<8x128xf32>, vector<4x128xf32> -> vector<4x128xf32>
    %288 = arith.mulf %279, %287 : vector<4x128xf32>
    %289 = vector.broadcast %272 : vector<1x128xf32> to vector<4x128xf32>
    %290 = arith.mulf %288, %289 : vector<4x128xf32>
    %291 = vector.broadcast %273 : vector<1x128xf32> to vector<4x128xf32>
    %292 = arith.addf %290, %291 : vector<4x128xf32>
    %cst_246 = arith.constant 0.000000e+00 : f32
    %293 = vector.broadcast %cst_246 : f32 to vector<4x128xf32>
    %294 = arith.cmpf oge, %292, %293 : vector<4x128xf32>
    %295 = vector.broadcast %274 : vector<4x1xf32> to vector<4x128xf32>
    %296 = arith.mulf %295, %292 : vector<4x128xf32>
    %297 = arith.select %294, %292, %296 : vector<4x128xi1>, vector<4x128xf32>
    %c20_247 = arith.constant 20 : index
    %c384_248 = arith.constant 384 : index
    %298 = vector.load %arg46[%c20_247, %c384_248] : memref<24x528xf32, #tpu.memory_space<vmem>>, vector<4x128xf32>
    tpu.vector_store %arg46[%c20_247, %c384_248], %297 {strides = array<i32>} : memref<24x528xf32, #tpu.memory_space<vmem>>, vector<4x128xf32>,
    %c20_249 = arith.constant 20 : index
    %c383_250 = arith.constant 383 : index
    %299 = vector.load %arg46[%c20_249, %c383_250] : memref<24x528xf32, #tpu.memory_space<vmem>>, vector<4x128xf32>
    %300 = vector.broadcast %22 : vector<1x128xf32> to vector<4x128xf32>
    %301 = arith.mulf %299, %300 : vector<4x128xf32>
    %c0_251 = arith.constant 0 : index
    %c0_252 = arith.constant 0 : index
    %302 = vector.load %arg47[%c0_251, %c0_252] : memref<120x128xf32, #tpu.memory_space<vmem>>, vector<4x128xf32>
    tpu.vector_store %arg47[%c0_251, %c0_252], %301 {strides = array<i32>} : memref<120x128xf32, #tpu.memory_space<vmem>>, vector<4x128xf32>,
    %c20_253 = arith.constant 20 : index
    %c384_254 = arith.constant 384 : index
    %303 = vector.load %arg46[%c20_253, %c384_254] : memref<24x528xf32, #tpu.memory_space<vmem>>, vector<4x128xf32>
    %c4_255 = arith.constant 4 : index
    %c0_256 = arith.constant 0 : index
    %304 = vector.load %arg47[%c4_255, %c0_256] : memref<120x128xf32, #tpu.memory_space<vmem>>, vector<4x128xf32>
    tpu.vector_store %arg47[%c4_255, %c0_256], %303 {strides = array<i32>} : memref<120x128xf32, #tpu.memory_space<vmem>>, vector<4x128xf32>,
    %c20_257 = arith.constant 20 : index
    %c385_258 = arith.constant 385 : index
    %305 = vector.load %arg46[%c20_257, %c385_258] : memref<24x528xf32, #tpu.memory_space<vmem>>, vector<4x128xf32>
    %306 = vector.broadcast %23 : vector<1x128xf32> to vector<4x128xf32>
    %307 = arith.mulf %305, %306 : vector<4x128xf32>
    %c8_259 = arith.constant 8 : index
    %c0_260 = arith.constant 0 : index
    %308 = vector.load %arg47[%c8_259, %c0_260] : memref<120x128xf32, #tpu.memory_space<vmem>>, vector<4x128xf32>
    tpu.vector_store %arg47[%c8_259, %c0_260], %307 {strides = array<i32>} : memref<120x128xf32, #tpu.memory_space<vmem>>, vector<4x128xf32>,
    %c0_261 = arith.constant 0 : index
    %c0_262 = arith.constant 0 : index
    %309 = vector.load %arg47[%c0_261, %c0_262] : memref<120x128xf32, #tpu.memory_space<vmem>>, vector<12x128xf32>
    %c0_263 = arith.constant 0 : index
    %c0_264 = arith.constant 0 : index
    %310 = vector.load %arg40[%c0_263, %c0_264] : memref<8x12xf32, #tpu.memory_space<vmem>>, vector<8x12xf32>
    %cst_265 = arith.constant dense<0.000000e+00> : vector<8x128xf32>
    %311 = tpu.matmul %310, %309, %cst_265 {dimension_numbers = #tpu.dot_dimension_numbers<[1], [0], [0], [1], [0, 0, 1, 1], [], []>} : vector<8x12xf32>, vector<12x128xf32>, vector<8x128xf32> -> vector<8x128xf32>
    %c0_266 = arith.constant 0 : index
    %c0_267 = arith.constant 0 : index
    %312 = vector.load %arg12[%c0_266, %c0_267] : memref<128x64xf32, #tpu.memory_space<vmem>>, vector<128x64xf32>
    %cst_268 = arith.constant dense<0.000000e+00> : vector<8x64xf32>
    %313 = tpu.matmul %311, %312, %cst_268 {dimension_numbers = #tpu.dot_dimension_numbers<[1], [0], [0], [1], [0, 0, 1, 1], [], []>} : vector<8x128xf32>, vector<128x64xf32>, vector<8x64xf32> -> vector<8x64xf32>
    %c0_269 = arith.constant 0 : index
    %c0_270 = arith.constant 0 : index
    %314 = vector.load %arg41[%c0_269, %c0_270] : memref<8x1xf32, #tpu.memory_space<vmem>>, vector<8x1xf32>
    %315 = vector.broadcast %314 : vector<8x1xf32> to vector<8x64xf32>
    %316 = arith.addf %313, %315 : vector<8x64xf32>
    %c0_271 = arith.constant 0 : index
    %c0_272 = arith.constant 0 : index
    %317 = vector.load %arg13[%c0_271, %c0_272] : memref<64x8xf32, #tpu.memory_space<vmem>>, vector<64x8xf32>
    %c0_273 = arith.constant 0 : index
    %c0_274 = arith.constant 0 : index
    %318 = vector.load %arg14[%c0_273, %c0_274] : memref<8x64xf32, #tpu.memory_space<vmem>>, vector<8x64xf32>
    %c0_275 = arith.constant 0 : index
    %c0_276 = arith.constant 0 : index
    %319 = vector.load %arg42[%c0_275, %c0_276] : memref<1x64xf32, #tpu.memory_space<vmem>>, vector<1x64xf32>
    %c0_277 = arith.constant 0 : index
    %c0_278 = arith.constant 0 : index
    %320 = vector.load %arg43[%c0_277, %c0_278] : memref<1x64xf32, #tpu.memory_space<vmem>>, vector<1x64xf32>
    %c0_279 = arith.constant 0 : index
    %c0_280 = arith.constant 0 : index
    %321 = vector.load %arg44[%c0_279, %c0_280] : memref<8x1xf32, #tpu.memory_space<vmem>>, vector<8x1xf32>
    %cst_281 = arith.constant dense<0.000000e+00> : vector<8x8xf32>
    %322 = tpu.matmul %316, %317, %cst_281 {dimension_numbers = #tpu.dot_dimension_numbers<[1], [0], [0], [1], [0, 0, 1, 1], [], []>} : vector<8x64xf32>, vector<64x8xf32>, vector<8x8xf32> -> vector<8x8xf32>
    %cst_282 = arith.constant 1.250000e-01 : f32
    %323 = vector.broadcast %cst_282 : f32 to vector<8x8xf32>
    %324 = arith.mulf %322, %323 : vector<8x8xf32>
    %cst_283 = arith.constant dense<0.000000e+00> : vector<8x64xf32>
    %325 = tpu.matmul %324, %318, %cst_283 {dimension_numbers = #tpu.dot_dimension_numbers<[1], [0], [0], [1], [0, 0, 1, 1], [], []>} : vector<8x8xf32>, vector<8x64xf32>, vector<8x64xf32> -> vector<8x64xf32>
    %326 = arith.subf %316, %325 : vector<8x64xf32>
    %327 = arith.mulf %326, %326 : vector<8x64xf32>
    %cst_284 = arith.constant dense<0.000000e+00> : vector<8x8xf32>
    %328 = tpu.matmul %327, %317, %cst_284 {dimension_numbers = #tpu.dot_dimension_numbers<[1], [0], [0], [1], [0, 0, 1, 1], [], []>} : vector<8x64xf32>, vector<64x8xf32>, vector<8x8xf32> -> vector<8x8xf32>
    %cst_285 = arith.constant 1.250000e-01 : f32
    %329 = vector.broadcast %cst_285 : f32 to vector<8x8xf32>
    %330 = arith.mulf %328, %329 : vector<8x8xf32>
    %cst_286 = arith.constant 9.99999974E-6 : f32
    %331 = vector.broadcast %cst_286 : f32 to vector<8x8xf32>
    %332 = arith.addf %330, %331 : vector<8x8xf32>
    %333 = math.rsqrt %332 : vector<8x8xf32>
    %cst_287 = arith.constant dense<0.000000e+00> : vector<8x64xf32>
    %334 = tpu.matmul %333, %318, %cst_287 {dimension_numbers = #tpu.dot_dimension_numbers<[1], [0], [0], [1], [0, 0, 1, 1], [], []>} : vector<8x8xf32>, vector<8x64xf32>, vector<8x64xf32> -> vector<8x64xf32>
    %335 = arith.mulf %326, %334 : vector<8x64xf32>
    %336 = vector.broadcast %319 : vector<1x64xf32> to vector<8x64xf32>
    %337 = arith.mulf %335, %336 : vector<8x64xf32>
    %338 = vector.broadcast %320 : vector<1x64xf32> to vector<8x64xf32>
    %339 = arith.addf %337, %338 : vector<8x64xf32>
    %cst_288 = arith.constant 0.000000e+00 : f32
    %340 = vector.broadcast %cst_288 : f32 to vector<8x64xf32>
    %341 = arith.cmpf oge, %339, %340 : vector<8x64xf32>
    %342 = vector.broadcast %321 : vector<8x1xf32> to vector<8x64xf32>
    %343 = arith.mulf %342, %339 : vector<8x64xf32>
    %344 = arith.select %341, %339, %343 : vector<8x64xi1>, vector<8x64xf32>
    %c0_289 = arith.constant 0 : index
    %c0_290 = arith.constant 0 : index
    %c0_291 = arith.constant 0 : index
    %345 = vector.load %arg45[%c0_289, %c0_290, %c0_291] : memref<1x8x64xf32, #tpu.memory_space<vmem>>, vector<1x8x64xf32>
    %346 = vector.shape_cast %345 : vector<1x8x64xf32> to vector<8x64xf32>
    %347 = vector.shape_cast %344 : vector<8x64xf32> to vector<1x8x64xf32>
    tpu.vector_store %arg45[%c0_289, %c0_290, %c0_291], %347 {strides = array<i32>} : memref<1x8x64xf32, #tpu.memory_space<vmem>>, vector<1x8x64xf32>,
    return
  }
  func.func @transform_0(%arg0: i32) -> (i32, i32, i32) {
    %c0_i32 = arith.constant 0 : i32
    %c0_i32_0 = arith.constant 0 : i32
    %c0_i32_1 = arith.constant 0 : i32
    return %arg0, %c0_i32, %c0_i32_0 : i32, i32, i32
  }
  func.func @transform_1(%arg0: i32) -> (i32, i32, i32) {
    %c0_i32 = arith.constant 0 : i32
    %c0_i32_0 = arith.constant 0 : i32
    %c0_i32_1 = arith.constant 0 : i32
    return %arg0, %c0_i32, %c0_i32_0 : i32, i32, i32
  }
  func.func @transform_2(%arg0: i32) -> (i32, i32) {
    %c0_i32 = arith.constant 0 : i32
    %c0_i32_0 = arith.constant 0 : i32
    %c0_i32_1 = arith.constant 0 : i32
    return %c0_i32, %c0_i32_0 : i32, i32
  }
  func.func @transform_3(%arg0: i32) -> (i32, i32) {
    %c0_i32 = arith.constant 0 : i32
    %c0_i32_0 = arith.constant 0 : i32
    %c0_i32_1 = arith.constant 0 : i32
    return %c0_i32, %c0_i32_0 : i32, i32
  }
  func.func @transform_4(%arg0: i32) -> (i32, i32) {
    %c0_i32 = arith.constant 0 : i32
    %c0_i32_0 = arith.constant 0 : i32
    %c0_i32_1 = arith.constant 0 : i32
    return %c0_i32, %c0_i32_0 : i32, i32
  }
  func.func @transform_5(%arg0: i32) -> (i32, i32) {
    %c0_i32 = arith.constant 0 : i32
    %c0_i32_0 = arith.constant 0 : i32
    %c0_i32_1 = arith.constant 0 : i32
    return %c0_i32, %c0_i32_0 : i32, i32
  }
  func.func @transform_6(%arg0: i32) -> (i32, i32) {
    %c0_i32 = arith.constant 0 : i32
    %c0_i32_0 = arith.constant 0 : i32
    %c0_i32_1 = arith.constant 0 : i32
    return %c0_i32, %c0_i32_0 : i32, i32
  }
  func.func @transform_7(%arg0: i32) -> (i32, i32) {
    %c0_i32 = arith.constant 0 : i32
    %c0_i32_0 = arith.constant 0 : i32
    %c0_i32_1 = arith.constant 0 : i32
    return %c0_i32, %c0_i32_0 : i32, i32
  }
  func.func @transform_8(%arg0: i32) -> (i32, i32) {
    %c0_i32 = arith.constant 0 : i32
    %c0_i32_0 = arith.constant 0 : i32
    %c0_i32_1 = arith.constant 0 : i32
    return %c0_i32, %c0_i32_0 : i32, i32
  }
  func.func @transform_9(%arg0: i32) -> (i32, i32) {
    %c0_i32 = arith.constant 0 : i32
    %c0_i32_0 = arith.constant 0 : i32
    %c0_i32_1 = arith.constant 0 : i32
    return %c0_i32, %c0_i32_0 : i32, i32
  }
  func.func @transform_10(%arg0: i32) -> (i32, i32) {
    %c0_i32 = arith.constant 0 : i32
    %c0_i32_0 = arith.constant 0 : i32
    %c0_i32_1 = arith.constant 0 : i32
    return %c0_i32, %c0_i32_0 : i32, i32
  }
  func.func @transform_11(%arg0: i32) -> (i32, i32) {
    %c0_i32 = arith.constant 0 : i32
    %c0_i32_0 = arith.constant 0 : i32
    %c0_i32_1 = arith.constant 0 : i32
    return %c0_i32, %c0_i32_0 : i32, i32
  }
  func.func @transform_12(%arg0: i32) -> (i32, i32) {
    %c0_i32 = arith.constant 0 : i32
    %c0_i32_0 = arith.constant 0 : i32
    %c0_i32_1 = arith.constant 0 : i32
    return %c0_i32, %c0_i32_0 : i32, i32
  }
  func.func @transform_13(%arg0: i32) -> (i32, i32) {
    %c0_i32 = arith.constant 0 : i32
    %c0_i32_0 = arith.constant 0 : i32
    %c0_i32_1 = arith.constant 0 : i32
    return %c0_i32, %c0_i32_0 : i32, i32
  }
  func.func @transform_14(%arg0: i32) -> (i32, i32) {
    %c0_i32 = arith.constant 0 : i32
    %c0_i32_0 = arith.constant 0 : i32
    %c0_i32_1 = arith.constant 0 : i32
    return %c0_i32, %c0_i32_0 : i32, i32
  }
  func.func @transform_15(%arg0: i32) -> (i32, i32) {
    %c0_i32 = arith.constant 0 : i32
    %c0_i32_0 = arith.constant 0 : i32
    %c0_i32_1 = arith.constant 0 : i32
    return %c0_i32, %c0_i32_0 : i32, i32
  }
  func.func @transform_16(%arg0: i32) -> (i32, i32) {
    %c0_i32 = arith.constant 0 : i32
    %c0_i32_0 = arith.constant 0 : i32
    %c0_i32_1 = arith.constant 0 : i32
    return %c0_i32, %c0_i32_0 : i32, i32
  }
  func.func @transform_17(%arg0: i32) -> (i32, i32) {
    %c0_i32 = arith.constant 0 : i32
    %c0_i32_0 = arith.constant 0 : i32
    %c0_i32_1 = arith.constant 0 : i32
    return %c0_i32, %c0_i32_0 : i32, i32
  }
  func.func @transform_18(%arg0: i32) -> (i32, i32) {
    %c0_i32 = arith.constant 0 : i32
    %c0_i32_0 = arith.constant 0 : i32
    %c0_i32_1 = arith.constant 0 : i32
    return %c0_i32, %c0_i32_0 : i32, i32
  }
  func.func @transform_19(%arg0: i32) -> (i32, i32) {
    %c0_i32 = arith.constant 0 : i32
    %c0_i32_0 = arith.constant 0 : i32
    %c0_i32_1 = arith.constant 0 : i32
    return %c0_i32, %c0_i32_0 : i32, i32
  }
  func.func @transform_20(%arg0: i32) -> (i32, i32) {
    %c0_i32 = arith.constant 0 : i32
    %c0_i32_0 = arith.constant 0 : i32
    %c0_i32_1 = arith.constant 0 : i32
    return %c0_i32, %c0_i32_0 : i32, i32
  }
  func.func @transform_21(%arg0: i32) -> (i32, i32) {
    %c0_i32 = arith.constant 0 : i32
    %c0_i32_0 = arith.constant 0 : i32
    %c0_i32_1 = arith.constant 0 : i32
    return %c0_i32, %c0_i32_0 : i32, i32
  }
  func.func @transform_22(%arg0: i32) -> (i32, i32) {
    %c0_i32 = arith.constant 0 : i32
    %c0_i32_0 = arith.constant 0 : i32
    %c0_i32_1 = arith.constant 0 : i32
    return %c0_i32, %c0_i32_0 : i32, i32
  }
  func.func @transform_23(%arg0: i32) -> (i32, i32) {
    %c0_i32 = arith.constant 0 : i32
    %c0_i32_0 = arith.constant 0 : i32
    %c0_i32_1 = arith.constant 0 : i32
    return %c0_i32, %c0_i32_0 : i32, i32
  }
  func.func @transform_24(%arg0: i32) -> (i32, i32) {
    %c0_i32 = arith.constant 0 : i32
    %c0_i32_0 = arith.constant 0 : i32
    %c0_i32_1 = arith.constant 0 : i32
    return %c0_i32, %c0_i32_0 : i32, i32
  }
  func.func @transform_25(%arg0: i32) -> (i32, i32) {
    %c0_i32 = arith.constant 0 : i32
    %c0_i32_0 = arith.constant 0 : i32
    %c0_i32_1 = arith.constant 0 : i32
    return %c0_i32, %c0_i32_0 : i32, i32
  }
  func.func @transform_26(%arg0: i32) -> (i32, i32) {
    %c0_i32 = arith.constant 0 : i32
    %c0_i32_0 = arith.constant 0 : i32
    %c0_i32_1 = arith.constant 0 : i32
    return %c0_i32, %c0_i32_0 : i32, i32
  }
  func.func @transform_27(%arg0: i32) -> (i32, i32) {
    %c0_i32 = arith.constant 0 : i32
    %c0_i32_0 = arith.constant 0 : i32
    %c0_i32_1 = arith.constant 0 : i32
    return %c0_i32, %c0_i32_0 : i32, i32
  }
  func.func @transform_28(%arg0: i32) -> (i32, i32) {
    %c0_i32 = arith.constant 0 : i32
    %c0_i32_0 = arith.constant 0 : i32
    %c0_i32_1 = arith.constant 0 : i32
    return %c0_i32, %c0_i32_0 : i32, i32
  }
  func.func @transform_29(%arg0: i32) -> (i32, i32) {
    %c0_i32 = arith.constant 0 : i32
    %c0_i32_0 = arith.constant 0 : i32
    %c0_i32_1 = arith.constant 0 : i32
    return %c0_i32, %c0_i32_0 : i32, i32
  }
  func.func @transform_30(%arg0: i32) -> (i32, i32) {
    %c0_i32 = arith.constant 0 : i32
    %c0_i32_0 = arith.constant 0 : i32
    %c0_i32_1 = arith.constant 0 : i32
    return %c0_i32, %c0_i32_0 : i32, i32
  }
  func.func @transform_31(%arg0: i32) -> (i32, i32) {
    %c0_i32 = arith.constant 0 : i32
    %c0_i32_0 = arith.constant 0 : i32
    %c0_i32_1 = arith.constant 0 : i32
    return %c0_i32, %c0_i32_0 : i32, i32
  }
  func.func @transform_32(%arg0: i32) -> (i32, i32) {
    %c0_i32 = arith.constant 0 : i32
    %c0_i32_0 = arith.constant 0 : i32
    %c0_i32_1 = arith.constant 0 : i32
    return %c0_i32, %c0_i32_0 : i32, i32
  }
  func.func @transform_33(%arg0: i32) -> (i32, i32) {
    %c0_i32 = arith.constant 0 : i32
    %c0_i32_0 = arith.constant 0 : i32
    %c0_i32_1 = arith.constant 0 : i32
    return %c0_i32, %c0_i32_0 : i32, i32
  }
  func.func @transform_34(%arg0: i32) -> (i32, i32) {
    %c0_i32 = arith.constant 0 : i32
    %c0_i32_0 = arith.constant 0 : i32
    %c0_i32_1 = arith.constant 0 : i32
    return %c0_i32, %c0_i32_0 : i32, i32
  }
  func.func @transform_35(%arg0: i32) -> (i32, i32) {
    %c0_i32 = arith.constant 0 : i32
    %c0_i32_0 = arith.constant 0 : i32
    %c0_i32_1 = arith.constant 0 : i32
    return %c0_i32, %c0_i32_0 : i32, i32
  }
  func.func @transform_36(%arg0: i32) -> (i32, i32) {
    %c0_i32 = arith.constant 0 : i32
    %c0_i32_0 = arith.constant 0 : i32
    %c0_i32_1 = arith.constant 0 : i32
    return %c0_i32, %c0_i32_0 : i32, i32
  }
  func.func @transform_37(%arg0: i32) -> (i32, i32) {
    %c0_i32 = arith.constant 0 : i32
    %c0_i32_0 = arith.constant 0 : i32
    %c0_i32_1 = arith.constant 0 : i32
    return %c0_i32, %c0_i32_0 : i32, i32
  }
  func.func @transform_38(%arg0: i32) -> (i32, i32) {
    %c0_i32 = arith.constant 0 : i32
    %c0_i32_0 = arith.constant 0 : i32
    %c0_i32_1 = arith.constant 0 : i32
    return %c0_i32, %c0_i32_0 : i32, i32
  }
  func.func @transform_39(%arg0: i32) -> (i32, i32) {
    %c0_i32 = arith.constant 0 : i32
    %c0_i32_0 = arith.constant 0 : i32
    %c0_i32_1 = arith.constant 0 : i32
    return %c0_i32, %c0_i32_0 : i32, i32
  }
  func.func @transform_40(%arg0: i32) -> (i32, i32) {
    %c0_i32 = arith.constant 0 : i32
    %c0_i32_0 = arith.constant 0 : i32
    %c0_i32_1 = arith.constant 0 : i32
    return %c0_i32, %c0_i32_0 : i32, i32
  }
  func.func @transform_41(%arg0: i32) -> (i32, i32) {
    %c0_i32 = arith.constant 0 : i32
    %c0_i32_0 = arith.constant 0 : i32
    %c0_i32_1 = arith.constant 0 : i32
    return %c0_i32, %c0_i32_0 : i32, i32
  }
  func.func @transform_42(%arg0: i32) -> (i32, i32) {
    %c0_i32 = arith.constant 0 : i32
    %c0_i32_0 = arith.constant 0 : i32
    %c0_i32_1 = arith.constant 0 : i32
    return %c0_i32, %c0_i32_0 : i32, i32
  }
  func.func @transform_43(%arg0: i32) -> (i32, i32) {
    %c0_i32 = arith.constant 0 : i32
    %c0_i32_0 = arith.constant 0 : i32
    %c0_i32_1 = arith.constant 0 : i32
    return %c0_i32, %c0_i32_0 : i32, i32
  }
  func.func @transform_44(%arg0: i32) -> (i32, i32, i32) {
    %c0_i32 = arith.constant 0 : i32
    %c0_i32_0 = arith.constant 0 : i32
    %c0_i32_1 = arith.constant 0 : i32
    return %arg0, %c0_i32, %c0_i32_0 : i32, i32, i32
  }
}

</mosaic_0001>

<bundles_post_ra>
// kernel: encode_layer_forward.1
= control target key start
LH: loop header
LB: loop body
LE: loop exit
PB: predicated region body
PF: predicated region fallthrough
CT: control target
= control target key end

     0   :  { %s5946_s6 = smov 1   ;;  %s5947_s10 = smov 2   ;;  %s7234_s0 = inlined_call_operand.smem [shape: u32[45], index: -1, kind: input, shape index: {}] }
   0x1   :  { %s6016_s5 = sld [smem:[%s7234_s0]]   ;;  %s5948_s14 = smov 3  }
   0x2   :  { %s6021_s9 = sld [smem:[%s7234_s0 + %s5946_s6]]   ;;  %s5949_s18 = smov 4  }
   0x3   :  { %s6026_s13 = sld [smem:[%s7234_s0 + %s5947_s10]]   ;;  %s5950_s22 = smov 5  }
   0x4   :  { %s6031_s17 = sld [smem:[%s7234_s0 + %s5948_s14]]   ;;  %s5951_s26 = smov 6  }
   0x5   :  { %s6036_s21 = sld [smem:[%s7234_s0 + %s5949_s18]]   ;;  %s5952_s30 = smov 7  }
   0x6   :  { %s6041_s25 = sld [smem:[%s7234_s0 + %s5950_s22]]   ;;  %s5953_s4 = smov 8  }
   0x7   :  { %s6046_s29 = sld [smem:[%s7234_s0 + %s5951_s26]]   ;;  %s5954_s10 = smov 9  }
   0x8   :  { %s6051_s3 = sld [smem:[%s7234_s0 + %s5952_s30]]   ;;  %s5955_s15 = smov 10  }
   0x9   :  { %s6056_s8 = sld [smem:[%s7234_s0 + %s5953_s4]]   ;;  %s5956_s20 = smov 11  }
   0xa   :  { %s6061_s14 = sld [smem:[%s7234_s0 + %s5954_s10]]   ;;  %s5957_s26 = smov 12  }
   0xb   :  { %s6066_s19 = sld [smem:[%s7234_s0 + %s5955_s15]]   ;;  %s5958_s1 = smov 13  }
   0xc   :  { %s6071_s24 = sld [smem:[%s7234_s0 + %s5956_s20]]   ;;  %s5959_s7 = smov 14  }
   0xd   :  { %s6076_s30 = sld [smem:[%s7234_s0 + %s5957_s26]]   ;;  %s5960_s15 = smov 15  }
   0xe   :  { %s6081_s6 = sld [smem:[%s7234_s0 + %s5958_s1]]   ;;  %s5961_s22 = smov 16  }
   0xf   :  { %s6086_s12 = sld [smem:[%s7234_s0 + %s5959_s7]]   ;;  %s5962_s28 = smov 17  }
  0x10   :  { %s6091_s20 = sld [smem:[%s7234_s0 + %s5960_s15]]   ;;  %s5963_s7 = smov 18  }
  0x11   :  { %s6096_s27 = sld [smem:[%s7234_s0 + %s5961_s22]]   ;;  %s5964_s15 = smov 19  }
  0x12   :  { %7237 = sst [smem:[#allocation4_spill]] %s6071_s24  ;;  %s5965_s22 = smov 20  }
  0x13   :  { %7238 = sst [smem:[#allocation5_spill]] %s6076_s30 }
  0x14   :  { %7239 = sst [smem:[#allocation6_spill]] %s6081_s6 }
  0x15   :  { %s6101_s4 = sld [smem:[%s7234_s0 + %s5962_s28]]   ;;  %s5966_s28 = smov 21  }
  0x16   :  { %s6106_s6 = sld [smem:[%s7234_s0 + %s5963_s7]]   ;;  %s5967_s7 = smov 22  }
  0x17   :  { %7240 = sst [smem:[#allocation7_spill]] %s6096_s27 }
  0x18   :  { %s6111_s30 = sld [smem:[%s7234_s0 + %s5964_s15]]   ;;  %s5968_s15 = smov 23  }
  0x19   :  { %s6116_s24 = sld [smem:[%s7234_s0 + %s5965_s22]]   ;;  %s5969_s22 = smov 24  }
  0x1a   :  { %s6126_s27 = sld [smem:[%s7234_s0 + %s5967_s7]]   ;;  %s5971_s7 = smov 26  }
  0x1b   :  { %7241 = sst [smem:[#allocation8_spill]] %s6101_s4 }
  0x1c   :  { %s6121_s4 = sld [smem:[%s7234_s0 + %s5966_s28]]   ;;  %s5970_s28 = smov 25  }
  0x1e   :  { %7242 = sst [smem:[#allocation9_spill]] %s6111_s30 }
  0x1f   :  { %7243 = sst [smem:[#allocation10_spill]] %s6116_s24 }
  0x20   :  { %7245 = sst [smem:[#allocation12_spill]] %s6126_s27 }
  0x21   :  { %s6131_s30 = sld [smem:[%s7234_s0 + %s5968_s15]]   ;;  %s5972_s15 = smov 27  }
  0x22   :  { %7244 = sst [smem:[#allocation11_spill]] %s6121_s4 }
  0x23   :  { %s6136_s24 = sld [smem:[%s7234_s0 + %s5969_s22]]   ;;  %s5973_s22 = smov 28  }
  0x24   :  { %s6141_s4 = sld [smem:[%s7234_s0 + %s5970_s28]]   ;;  %s5974_s28 = smov 29  }
  0x25   :  { %s6146_s27 = sld [smem:[%s7234_s0 + %s5971_s7]]   ;;  %s5975_s7 = smov 30  }
  0x27   :  { %7246 = sst [smem:[#allocation13_spill]] %s6131_s30 }
  0x28   :  { %s6151_s30 = sld [smem:[%s7234_s0 + %s5972_s15]]   ;;  %s5976_s15 = smov 31  }
  0x29   :  { %7247 = sst [smem:[#allocation14_spill]] %s6136_s24 }
  0x2a   :  { %7248 = sst [smem:[#allocation15_spill]] %s6141_s4 }
  0x2b   :  { %7249 = sst [smem:[#allocation16_spill]] %s6146_s27 }
  0x2c   :  { %s6156_s24 = sld [smem:[%s7234_s0 + %s5973_s22]]   ;;  %s5977_s22 = smov 32  }
  0x2d   :  { %s6161_s4 = sld [smem:[%s7234_s0 + %s5974_s28]]   ;;  %s5978_s28 = smov 33  }
  0x2e   :  { %7250 = sst [smem:[#allocation17_spill]] %s6151_s30 }
  0x2f   :  { %s6166_s27 = sld [smem:[%s7234_s0 + %s5975_s7]]   ;;  %s5979_s7 = smov 34  }
  0x30   :  { %s6171_s30 = sld [smem:[%s7234_s0 + %s5976_s15]]   ;;  %s5980_s15 = smov 35  }
  0x32   :  { %7251 = sst [smem:[#allocation18_spill]] %s6156_s24 }
  0x33   :  { %7252 = sst [smem:[#allocation19_spill]] %s6161_s4 }
  0x34   :  { %s6176_s24 = sld [smem:[%s7234_s0 + %s5977_s22]]   ;;  %s5981_s22 = smov 36  }
  0x35   :  { %7253 = sst [smem:[#allocation20_spill]] %s6166_s27 }
  0x36   :  { %7254 = sst [smem:[#allocation21_spill]] %s6171_s30 }
  0x37   :  { %s6181_s4 = sld [smem:[%s7234_s0 + %s5978_s28]]   ;;  %s5982_s28 = smov 37  }
  0x38   :  { %s6186_s27 = sld [smem:[%s7234_s0 + %s5979_s7]]   ;;  %s5983_s7 = smov 38  }
  0x39   :  { %s6191_s30 = sld [smem:[%s7234_s0 + %s5980_s15]]   ;;  %s5984_s15 = smov 39  }
  0x3a   :  { %7255 = sst [smem:[#allocation22_spill]] %s6176_s24 }
  0x3b   :  { %s6196_s24 = sld [smem:[%s7234_s0 + %s5981_s22]]   ;;  %s5985_s22 = smov 40  }
  0x3d   :  { %7256 = sst [smem:[#allocation23_spill]] %s6181_s4 }
  0x3e   :  { %7257 = sst [smem:[#allocation24_spill]] %s6186_s27 }
  0x3f   :  { %7258 = sst [smem:[#allocation25_spill]] %s6191_s30 }
  0x40   :  { %s6201_s4 = sld [smem:[%s7234_s0 + %s5982_s28]]   ;;  %s5986_s28 = smov 41  }
  0x41   :  { %7259 = sst [smem:[#allocation26_spill]] %s6196_s24 }
  0x42   :  { %s6206_s27 = sld [smem:[%s7234_s0 + %s5983_s7]]   ;;  %s5987_s7 = smov 42  }
  0x43   :  { %s6211_s30 = sld [smem:[%s7234_s0 + %s5984_s15]]   ;;  %s5988_s15 = smov 43  }
  0x44   :  { %s6216_s24 = sld [smem:[%s7234_s0 + %s5985_s22]]   ;;  %s5989_s22 = smov 44  }
  0x46   :  { %7260 = sst [smem:[#allocation27_spill]] %s6201_s4 }
  0x47   :  { %s6221_s4 = sld [smem:[%s7234_s0 + %s5986_s28]]   ;;  %s6238_s28 = smov 0  }
  0x48   :  { %7261 = sst [smem:[#allocation28_spill]] %s6206_s27 }
  0x49   :  { %7262 = sst [smem:[#allocation29_spill]] %s6211_s30 }
  0x4a   :  { %7263 = sst [smem:[#allocation30_spill]] %s6216_s24 }
  0x4b   :  { %s6226_s27 = sld [smem:[%s7234_s0 + %s5987_s7]]  }
  0x4c   :  { %s6231_s30 = sld [smem:[%s7234_s0 + %s5988_s15]]  }
  0x4d   :  { %s6236_s24 = sld [smem:[%s7234_s0 + %s5989_s22]]  }
  0x4e LB: > { %s4902_s1 = sadd.s32 4294967295, %s5944_s28   ;;  %p4906_p0 = scmp.ge.s32.totalorder %s5944_s28, 1  ;;  %s5944_s28 = sphi %s6238_s28, %s99_s28  }
  0x4f   : > { %p1215_p1 = scmp.lt.s32.totalorder %s5944_s28, 3 }
  0x51   : > { %p1216_p2 = pnand %p4906_p0, %p1215_p1 }
  0x52   : > { %p1323_p3 = scmp.lt.s32.totalorder (!%p1216_p2), %s4902_s1, 1  ;;  %s5993_s7 = smov (!%p1216_p2), 113  }
  0x53   : > { %1219 = sbr.rel (%p1216_p2) target bundleno = 7706 (0x1e1a), region = 196  ;;  %s5994_s10 = smov (!%p1216_p2), 127  }
  0x54   : > { %s5995_s11 = smov (!%p1216_p2), 15   ;;  %s5996_s15 = smov (!%p1216_p2), 1  }
  0x55   : > { %s5997_s16 = smov (!%p1216_p2), 111   ;;  %s5998_s22 = smov (!%p1216_p2), 17  }
  0x56   : > { %s5999_s23 = smov (!%p1216_p2), 16   ;;  %s6000_s26 = smov (!%p1216_p2), 97  }
  0x58   : > { %v1351_v0 = vld [vmem:[%s6026_s13] sm:$0xff]  ;;  %vm1356_vm0 = vcmask 31744   ;;  %s7292_s1 = smov (!%p1323_p3, %s4902_s1), 1  ;;  %vm1363_vm1 = vcmask 1043456   ;;  %v1352_v2 = vld [vmem:[%s6026_s13 + $0x8] sm:$0xff]  ;;  %v5990_v3 = vmov 0.0  }
  0x59   : > { %5241 = vmatprep.mubr.msk.f32.mxu0 %vm1356_vm0, %v1351_v0  ;;  %s4907_s0 = sshll.u32 %s7292_s1, 2  ;;  %5244 = vmatprep.subr.mxu1 %v5990_v3  ;;  %1335 = vst [vmem:[#allocation2] sm:$0xff] %v5990_v3  ;;  %1337 = vst [vmem:[#allocation2 + $0x10] sm:$0xff] %v5990_v3  ;;  %vm5991_vm2 = vmmov 0   ;;  %vm1339_vm3 = vcmask 130048   ;;  %v1355_v4 = vld [vmem:[%s6031_s17 + $0x8] sm:$0xff] }
  0x5a   : > { %s1330_s2 = scalar_lea.vmem %s6021_s9, %s4907_s0  ;;  %1338 = vst [vmem:[#allocation2 + $0x18] sm:$0xff] %v5990_v3  ;;  %1343 = vst [vmem:[#allocation2 + $0x38] sm:$0xff] %v5990_v3  ;;  %5248 = vmatprep.mubr.msk.f32.mxu1 %vm5991_vm2, %v5990_v3  ;;  %v1354_v6 = vld [vmem:[%s6031_s17] sm:$0xff]  ;;  %v1445_v7 = vld [vmem:[%s6036_s21 + $0x8] sm:$0xff]  ;;  %v5992_v17 = vmov 0   ;;  %s1326_s18 = scalar_lea.vmem %s6016_s5, %s4907_s0  ;;  %vm1586_vm6 = vcmask 121856  }
  0x5b   : > { %v1353_v1 = vld [vmem:[%s1330_s2] sm:$0xf]  ;;  %1344 = vst [vmem:[#allocation2 + $0x40] sm:$0xff] %v5990_v3  ;;  %1346 = vst [vmem:[#allocation2 + $0x50] sm:$0xff] %v5990_v3  ;;  %5916 = vset.pattern.permute.xlu0 %v5992_v17  ;;  %5917 = vset.pattern.permute.xlu1 %v5992_v17  ;;  %s6001_s0 = smov 95   ;;  %vm1622_vm7 = vcmask 1039360  }
  0x5c   : > { %5239 = vmatprep.subr.msk.mxu0 %vm1363_vm1, %v1353_v1  ;;  %1347 = vst [vmem:[#allocation2 + $0x58] sm:$0xff] %v5990_v3  ;;  %1348 = vst [vmem:[#allocation2 + $0x60] sm:$0xff] %v5990_v3  ;;  %v1444_v10 = vld [vmem:[%s6036_s21] sm:$0xff]  ;;  %vm1603_vm8 = vcmask 7168   ;;  %vm1553_vm9 = vcmask 138240   ;;  %vm1636_vm10 = vcmask 195584  }
  0x5d   : > { %5240 = vmatpush3.msk.msra.mxu0 %vm1363_vm1, %v1353_v1  ;;  %1349 = vst [vmem:[#allocation2 + $0x68] sm:$0xff] %v5990_v3  ;;  %3144 = vst [vmem:[#allocation3 + $0x18] sm:$0xff] %v5990_v3  ;;  %v1450_v15 = vld [vmem:[%s6041_s25] sm:$0xf]  ;;  %v6370_v17 = vld [vmem:[%s6061_s14 + $0x48] sm:$0xff]  ;;  %vm1801_vm11 = vcmask 64512  }
  0x5e   : > { %5242 = vmatmul.mubr.msk.f32.vlgmr.msra.gmra.mxu0 %vm1356_vm0, %v1352_v2  ;;  %5295 = vmatprep.subr.mxu0 %v5990_v3  ;;  %1340 = vst.msk [vmem:[#allocation2 + $0x20] sm:$0xff] %vm1339_vm3, %v5990_v3  ;;  %1345 = vst.msk [vmem:[#allocation2 + $0x48] sm:$0xff] %vm1339_vm3, %v5990_v3  ;;  %v6289_v18 = vld [vmem:[%s6056_s8] ss:$0 sm:$0xff]  ;;  %s7264_s2 = sld [smem:[#allocation7_spill]]  ;;  %vm2092_vm13 = vcmask 252928  }
  0x5f   : > { %5297 = vmatprep.mubr.msk.f32.mxu0 %vm5991_vm2, %v5990_v3  ;;  %1350 = vst.msk [vmem:[#allocation2 + $0x70] sm:$0xff] %vm1339_vm3, %v5990_v3  ;;  %1575 = vrot.lane.b32.xlu1 %v6289_v18, %s5993_s7  ;;  %v6293_v19 = vld [vmem:[%s6051_s3] ss:$0 sm:$0xff]  ;;  %s7265_s7 = sld [smem:[#allocation8_spill]]  ;;  %vm2075_vm14 = vcmask 261120   ;;  %vm2063_vm15 = vcmask 269312  }
  0x60   : > { %v1568_v21 = vld [vmem:[#allocation2 + $0x10] sm:$0xf]  ;;  %v1451_v23 = vld [vmem:[%s6046_s29] sm:$0xf]  ;;  %vm2137_vm0 = vcmask 392192  }
  0x61   : > { %v1590_v28 = vld [vmem:[#allocation2 + $0x10] sm:$0xf]  ;;  %v1525_v30 = vld [vmem:[%s1326_s18] sm:$0xf]  ;;  %s7267_s18 = sld [smem:[#allocation10_spill]] }
  0x62   : > { %v1535_v36 = vld [vmem:[#allocation2 + $0x10] sm:$0xf]  ;;  %v1630_v49 = vld [vmem:[%s6091_s20] sm:$0xf] }
  0x63   : > { %1592 = vrot.lane.b32.xlu1 %v6293_v19, %s5994_s10  ;;  %v1557_v47 = vld [vmem:[#allocation2 + $0x10] sm:$0xf]  ;;  %v1729_v51 = vld [vmem:[%s6106_s6] sm:$0xf] }
  0x65   : > { %v1610_v33 = vld [vmem:[#allocation2 + $0x20] sm:$0xf] }
  0x66   : > { %v2112_v53 = vld [vmem:[#allocation2 + $0x20] sm:$0xff] }
  0xd1   : > { %v1576_v20 = vpop.permute.xlu1 %1575 }
  0xd2   : > { %v1578_v22 = vmul.f32 %v1576_v20, %v1568_v21  ;;  %v6380_v21 = vld [vmem:[%s6061_s14 + $0x38] sm:$0xff] }
  0xd4   : > { %1582 = vrot.lane.b32.xlu1 %v1578_v22, %s5995_s11  ;;  %v6385_v22 = vld [vmem:[%s6061_s14 + $0x30] sm:$0xff] }
  0xd5   : > { %v6299_v26 = vpop.permute.xlu1 %1592 }
  0xd6   : > { %v1595_v29 = vmul.f32 %v6299_v26, %v1590_v28  ;;  %v6322_v52 = vmul.f32 0.0, %v6299_v26  ;;  %v6412_v28 = vld [vmem:[%s6061_s14 + $0x8] sm:$0xff] }
  0xd8   : > { %1599 = vrot.lane.b32.xlu1 %v1595_v29, %s5996_s15  ;;  %v6417_v29 = vld [vmem:[%s6061_s14] sm:$0xff] }
 0x11e   : > { %v5243_v5 = vpop.f32.mrf.mxu0 }
 0x11f   : > { %v1439_v8 = vadd.f32 %v5243_v5, %v1355_v4 }
 0x120   : > { %v1433_v9 = vpop.f32.mrf.mxu0 }
 0x121   : > { %v1434_v11 = vadd.f32 %v1433_v9, %v1354_v6  ;;  %vm1443_vm4 = vcmp.ge.f32.partialorder %v1439_v8, 0.0  ;;  %v1447_v12 = vmul.f32 %v1445_v7, %v1439_v8  ;;  %v1629_v9 = vld [vmem:[%s6086_s12] sm:$0xf] }
 0x123   : > { %v1446_v13 = vmul.f32 %v1444_v10, %v1434_v11  ;;  %v1449_v14 = vsel %vm1443_vm4, %v1439_v8, %v1447_v12  ;;  %vm1442_vm5 = vcmp.ge.f32.partialorder %v1434_v11, 0.0  ;;  %v6343_v12 = vld [vmem:[%s6061_s14 + $0x70] sm:$0xff]  ;;  %vm2623_vm4 = vcmask 515072  }
 0x124   : > { %5245 = vmatpush3.msra.mxu1 %v1449_v14  ;;  %v6355_v14 = vld [vmem:[%s6061_s14 + $0x60] sm:$0xff] }
 0x125   : > { %5246 = vmatprep.subr.mxu1 %v5990_v3  ;;  %v1448_v16 = vsel %vm1442_vm5, %v1434_v11, %v1446_v13  ;;  %v6339_v11 = vld [vmem:[%s6061_s14 + $0x78] sm:$0xff]  ;;  %v6350_v13 = vld [vmem:[%s6061_s14 + $0x68] sm:$0xff]  ;;  %vm2593_vm5 = vcmask 523264  }
 0x126   : > { %5247 = vmatpush3.msra.mxu1 %v1448_v16  ;;  %v6365_v16 = vld [vmem:[%s6061_s14 + $0x50] sm:$0xff] }
 0x127   : > { %5249 = vmatmul.mubr.msk.f32.vlgmr.msra.gmra.mxu1 %vm1339_vm3, %v1450_v15  ;;  %5251 = vmatprep.subr.mxu1 %v5990_v3  ;;  %v6360_v15 = vld [vmem:[%s6061_s14 + $0x58] sm:$0xff] }
 0x128   : > { %5257 = vmatprep.mubr.msk.f32.mxu1 %vm5991_vm2, %v5990_v3 }
 0x146   : > { %v1583_v55 = vpop.permute.xlu1 %1582 }
 0x14a   : > { %v1600_v56 = vpop.permute.xlu1 %1599 }
 0x1e7   : > { %v1521_v24 = vpop.f32.mrf.mxu1 }
 0x1e8   : > { %v1522_v25 = vadd.f32 %v1521_v24, %v1451_v23  ;;  %v6390_v23 = vld [vmem:[%s6061_s14 + $0x28] sm:$0xff]  ;;  %v6395_v24 = vld [vmem:[%s6061_s14 + $0x20] sm:$0xff] }
 0x1e9   : > { %v5250_v27 = vpop.f32.mrf.mxu1 }
 0x1ea   : > { %1528 = vperm.xlu0 %5916, %v1522_v25   ;;  %v6400_v25 = vld [vmem:[%s6061_s14 + $0x18] sm:$0xff]  ;;  %v6405_v27 = vld [vmem:[%s6061_s14 + $0x10] sm:$0xff] }
 0x1ee   : > { %1611 = vrot.lane.b32.xlu0 %v6289_v18, %s5996_s15 }
 0x1f2   : > { %1542 = vrot.lane.b32.xlu0 %v6293_v19, %s5997_s16  ;;  %s7266_s16 = sld [smem:[#allocation13_spill]] }
 0x265   : > { %v1529_v31 = vpop.permute.xlu0 %1528 }
 0x266   : > { %v1531_v32 = vadd.f32 %v1529_v31, %v1525_v30 }
 0x268   : > { %1532 = vst [vmem:[#allocation2 + $0x18] sm:$0xf] %v1531_v32 }
 0x269   : > { %v6309_v34 = vpop.permute.xlu0 %1611 }
 0x26a   : > { %v1615_v35 = vmul.f32 %v6309_v34, %v1610_v33  ;;  %v6328_v54 = vmul.f32 %v2112_v53, %v6309_v34 }
 0x26c   : > { %1620 = vrot.lane.b32.xlu0 %v1615_v35, %s5994_s10  ;;  %v6424_v35 = vld [vmem:[%s6066_s19] sm:$0xff] }
 0x26d   : > { %v1543_v37 = vpop.permute.xlu0 %1542  ;;  %5296 = vmatpush3.msra.mxu0 %v6424_v35 }
 0x26e   : > { %v1545_v38 = vmul.f32 %v1543_v37, %v1535_v36  ;;  %5300 = vmatprep.subr.mxu0 %v5990_v3 }
 0x26f   : > { %v1569_v39 = vld [vmem:[#allocation2 + $0x18] sm:$0xf] }
 0x270   : > { %v1609_v40 = vld [vmem:[#allocation2 + $0x18] sm:$0xf]  ;;  %1549 = vrot.lane.b32.xlu1 %v1545_v38, %s5998_s22  ;;  %v1579_v41 = vmul.f32 %v1576_v20, %v1569_v39  ;;  %v6375_v20 = vld [vmem:[%s6061_s14 + $0x40] sm:$0xff] }
 0x271   : > { %v1607_v42 = vld [vmem:[#allocation2 + $0x18] sm:$0xf]  ;;  %v1614_v44 = vmul.f32 %v6309_v34, %v1609_v40 }
 0x272   : > { %v1591_v43 = vld [vmem:[#allocation2 + $0x18] sm:$0xf]  ;;  %1608 = vst [vmem:[#allocation3 + $0x10] sm:$0xf] %v1607_v42  ;;  %1584 = vrot.lane.b32.xlu0 %v1579_v41, %s5995_s11  ;;  %s6002_s11 = smov 32  }
 0x273   : > { %v1596_v45 = vmul.f32 %v6299_v26, %v1591_v43  ;;  %v1536_v46 = vld [vmem:[#allocation2 + $0x18] sm:$0xf] }
 0x274   : > { %1618 = vrot.lane.b32.xlu1 %v1614_v44, %s5994_s10  ;;  %v1546_v48 = vmul.f32 %v1543_v37, %v1536_v46  ;;  %v1558_v50 = vld [vmem:[#allocation2 + $0x18] sm:$0xf] }
 0x276   : > { %1601 = vrot.lane.b32.xlu0 %v1596_v45, %s5996_s15 }
 0x278   : > { %1561 = vrot.lane.b32.xlu1 %v1557_v47, %s5999_s23 }
 0x27a   : > { %1551 = vrot.lane.b32.xlu0 %v1546_v48, %s5998_s22  ;;  %v4919_v48 = vld [vmem:[%s7264_s2] ss:$0 sm:$0xff]  ;;  %s6003_s22 = smov 31   ;;  %s7268_s2 = sld [smem:[#allocation9_spill]] }
 0x27c   : > { %1633 = vperm.xlu1 %5917, %v1630_v49  }
 0x27e   : > { %1563 = vrot.lane.b32.xlu0 %v1558_v50, %s5999_s23  ;;  %s6004_s23 = smov 33  }
 0x280   : > { %2081 = vrot.lane.b32.xlu1 %v6289_v18, %s6000_s26  ;;  %s6005_s26 = smov 63  }
 0x282   : > { %2041 = vperm.xlu0 %5916, %v1729_v51   ;;  %v4920_v51 = vld [vmem:[%s7265_s7] ss:$0 sm:$0xff]  ;;  %s6007_s7 = smov 64  }
 0x284   : > { %2102 = vrot.lane.b32.xlu1 %v6322_v52, %s5996_s15 }
 0x286   : > { %2052 = vrot.lane.b32.xlu0 %v6293_v19, %s6001_s0  ;;  %s6006_s0 = smov 65  }
 0x28a   : > { %2119 = vrot.lane.b32.xlu0 %v6328_v54, %s5994_s10 }
 0x2de   : > { %v1621_v57 = vpop.permute.xlu0 %1620 }
 0x2e2   : > { %v1550_v58 = vpop.permute.xlu1 %1549 }
 0x2e4   : > { %v1585_v59 = vpop.permute.xlu0 %1584 }
 0x2e5   : > { %v1587_v60 = vsel %vm1586_vm6, %v1583_v55, %v1585_v59  ;;  %vm2570_vm6 = vcmask 531456  }
 0x2e6   : > { %1589 = vst [vmem:[#allocation3 + $0x8] sm:$0xf] %v1587_v60  ;;  %v1619_v61 = vpop.permute.xlu1 %1618 }
 0x2e7   : > { %v1623_v62 = vsel %vm1622_vm7, %v1619_v61, %v1621_v57 }
 0x2e8   : > { %1625 = vst [vmem:[#allocation3 + $0x14] sm:$0xf] %v1623_v62  ;;  %v1602_v63 = vpop.permute.xlu0 %1601 }
 0x2e9   : > { %v1604_v0 = vsel %vm1603_vm8, %v1600_v56, %v1602_v63 }
 0x2ea   : > { %1606 = vst [vmem:[#allocation3 + $0xc] sm:$0xf] %v1604_v0  ;;  %v1562_v4 = vpop.permute.xlu1 %1561 }
 0x2ec   : > { %v1552_v1 = vpop.permute.xlu0 %1551 }
 0x2ed   : > { %v1554_v2 = vsel %vm1553_vm9, %v1550_v58, %v1552_v1  ;;  %vm2702_vm9 = vcmask 588800  }
 0x2ee   : > { %1556 = vst [vmem:[#allocation3] sm:$0xf] %v1554_v2 }
 0x2ef   : > { %v1628_v5 = vld [vmem:[#allocation3 + $0x10] sm:$0xff] }
 0x2f0   : > { %5252 = vmatpush3.msra.mxu1 %v1628_v5  ;;  %v1564_v6 = vpop.permute.xlu0 %1563 }
 0x2f1   : > { %v1565_v7 = vsel %vm1339_vm3, %v1562_v4, %v1564_v6  ;;  %5253 = vmatprep.subr.mxu1 %v5990_v3  ;;  %v1627_v8 = vld [vmem:[#allocation3 + $0x8] sm:$0xff] }
 0x2f2   : > { %1567 = vst [vmem:[#allocation3 + $0x4] sm:$0xf] %v1565_v7  ;;  %5254 = vmatpush3.msra.mxu1 %v1627_v8  ;;  %v2230_v8 = vld [vmem:[%s7266_s16] sm:$0xf]  ;;  %s7270_s16 = sld [smem:[#allocation12_spill]] }
 0x2f3   : > { %5255 = vmatprep.subr.mxu1 %v5990_v3 }
 0x2f7   : > { %v1634_v30 = vpop.permute.xlu1 %1633 }
 0x2f9   : > { %v1626_v10 = vld [vmem:[#allocation3] sm:$0xff] }
 0x2fa   : > { %5256 = vmatpush3.msra.mxu1 %v1626_v10  ;;  %v2663_v10 = vld [vmem:[#allocation2 + $0x48] sm:$0xf] }
 0x2fb   : > { %5258 = vmatmul.mubr.msk.f32.vlgmr.msra.gmra.mxu1 %vm1636_vm10, %v1629_v9  ;;  %5260 = vmatprep.subr.mxu1 %v5990_v3  ;;  %v2082_v0 = vpop.permute.xlu1 %2081  ;;  %v2131_v9 = vld [vmem:[%s7267_s18] sm:$0xf]  ;;  %s7271_s18 = sld [smem:[#allocation15_spill]] }
 0x2fc   : > { %5261 = vmatpush3.msra.mxu1 %v6339_v11  ;;  %5292 = vmatprep.mubr.msk.f32.mxu1 %vm5991_vm2, %v5990_v3  ;;  %v2084_v1 = vmul.f32 0.0, %v2082_v0 }
 0x2fd   : > { %5262 = vmatprep.subr.mxu1 %v5990_v3  ;;  %v2042_v57 = vpop.permute.xlu0 %2041 }
 0x2fe   : > { %5263 = vmatpush3.msra.mxu1 %v6343_v12 }
 0x2ff   : > { %5264 = vmatprep.subr.mxu1 %v5990_v3 }
 0x300   : > { %5265 = vmatpush3.msra.mxu1 %v6350_v13 }
 0x301   : > { %5266 = vmatprep.subr.mxu1 %v5990_v3  ;;  %v2053_v5 = vpop.permute.xlu0 %2052 }
 0x302   : > { %5267 = vmatpush3.msra.mxu1 %v6355_v14  ;;  %v2055_v6 = vmul.f32 0.0, %v2053_v5 }
 0x303   : > { %5268 = vmatprep.subr.mxu1 %v5990_v3 }
 0x304   : > { %5269 = vmatpush3.msra.mxu1 %v6360_v15 }
 0x305   : > { %5270 = vmatprep.subr.mxu1 %v5990_v3 }
 0x306   : > { %5271 = vmatpush3.msra.mxu1 %v6365_v16 }
 0x307   : > { %5272 = vmatprep.subr.mxu1 %v5990_v3 }
 0x308   : > { %5273 = vmatpush3.msra.mxu1 %v6370_v17 }
 0x309   : > { %5274 = vmatprep.subr.mxu1 %v5990_v3 }
 0x30a   : > { %5275 = vmatpush3.msra.mxu1 %v6375_v20 }
 0x30b   : > { %5276 = vmatprep.subr.mxu1 %v5990_v3 }
 0x30c   : > { %5277 = vmatpush3.msra.mxu1 %v6380_v21 }
 0x30d   : > { %5278 = vmatprep.subr.mxu1 %v5990_v3 }
 0x30e   : > { %5279 = vmatpush3.msra.mxu1 %v6385_v22 }
 0x30f   : > { %5280 = vmatprep.subr.mxu1 %v5990_v3 }
 0x310   : > { %5281 = vmatpush3.msra.mxu1 %v6390_v23 }
 0x311   : > { %5282 = vmatprep.subr.mxu1 %v5990_v3 }
 0x312   : > { %5283 = vmatpush3.msra.mxu1 %v6395_v24 }
 0x313   : > { %5284 = vmatprep.subr.mxu1 %v5990_v3 }
 0x314   : > { %5285 = vmatpush3.msra.mxu1 %v6400_v25 }
 0x315   : > { %5286 = vmatprep.subr.mxu1 %v5990_v3 }
 0x316   : > { %5287 = vmatpush3.msra.mxu1 %v6405_v27 }
 0x317   : > { %5288 = vmatprep.subr.mxu1 %v5990_v3 }
 0x318   : > { %5289 = vmatpush3.msra.mxu1 %v6412_v28 }
 0x319   : > { %5290 = vmatprep.subr.mxu1 %v5990_v3 }
 0x31a   : > { %5291 = vmatpush3.msra.mxu1 %v6417_v29 }
 0x31b   : > { %5335 = vmatprep.subr.mxu1 %v5990_v3 }
 0x3bb   : > { %v1706_v31 = vpop.f32.mrf.mxu1 }
 0x3bc   : > { %v1707_v32 = vadd.f32 %v1706_v31, %v1634_v30  ;;  %v2632_v30 = vld [vmem:[#allocation2 + $0x38] sm:$0xf]  ;;  %v2667_v31 = vmul.f32 %v2663_v10, %v6309_v34 }
 0x3bd   : > { %v5259_v33 = vpop.f32.mrf.mxu1 }
 0x3be   : > { %5293 = vmatmul.mubr.f32.vlgmr.msra.gmra.mxu1 %v1707_v32 }
 0x3bf   : > { %5337 = vmatprep.mubr.msk.f32.mxu1 %vm5991_vm2, %v5990_v3  ;;  %5336 = vmatpush3.msra.mxu1 %v6424_v35 }
 0x3c0   : > { %5340 = vmatprep.subr.mxu1 %v5990_v3 }
 0x47e   : > { %v1796_v36 = vpop.f32.mrf.mxu1 }
 0x47f   : > { %v1800_v37 = vmul.f32 0.0625, %v1796_v36 }
 0x480   : > { %v5294_v38 = vpop.f32.mrf.mxu1 }
 0x481   : > { %5298 = vmatmul.mubr.msk.f32.vlgmr.msra.gmra.mxu0 %vm1801_vm11, %v1800_v37 }
 0x482   : > { %5301 = vmatpush3.msra.mxu0 %v6339_v11  ;;  %5332 = vmatprep.mubr.msk.f32.mxu0 %vm5991_vm2, %v5990_v3 }
 0x483   : > { %5302 = vmatprep.subr.mxu0 %v5990_v3 }
 0x484   : > { %5303 = vmatpush3.msra.mxu0 %v6343_v12 }
 0x485   : > { %5304 = vmatprep.subr.mxu0 %v5990_v3 }
 0x486   : > { %5305 = vmatpush3.msra.mxu0 %v6350_v13 }
 0x487   : > { %5306 = vmatprep.subr.mxu0 %v5990_v3 }
 0x488   : > { %5307 = vmatpush3.msra.mxu0 %v6355_v14 }
 0x489   : > { %5308 = vmatprep.subr.mxu0 %v5990_v3 }
 0x48a   : > { %5309 = vmatpush3.msra.mxu0 %v6360_v15 }
 0x48b   : > { %5310 = vmatprep.subr.mxu0 %v5990_v3 }
 0x48c   : > { %5311 = vmatpush3.msra.mxu0 %v6365_v16 }
 0x48d   : > { %5312 = vmatprep.subr.mxu0 %v5990_v3 }
 0x48e   : > { %5313 = vmatpush3.msra.mxu0 %v6370_v17 }
 0x48f   : > { %5314 = vmatprep.subr.mxu0 %v5990_v3 }
 0x490   : > { %5315 = vmatpush3.msra.mxu0 %v6375_v20 }
 0x491   : > { %5316 = vmatprep.subr.mxu0 %v5990_v3 }
 0x492   : > { %5317 = vmatpush3.msra.mxu0 %v6380_v21 }
 0x493   : > { %5318 = vmatprep.subr.mxu0 %v5990_v3 }
 0x494   : > { %5319 = vmatpush3.msra.mxu0 %v6385_v22 }
 0x495   : > { %5320 = vmatprep.subr.mxu0 %v5990_v3 }
 0x496   : > { %5321 = vmatpush3.msra.mxu0 %v6390_v23 }
 0x497   : > { %5322 = vmatprep.subr.mxu0 %v5990_v3 }
 0x498   : > { %5323 = vmatpush3.msra.mxu0 %v6395_v24 }
 0x499   : > { %5324 = vmatprep.subr.mxu0 %v5990_v3 }
 0x49a   : > { %5325 = vmatpush3.msra.mxu0 %v6400_v25 }
 0x49b   : > { %5326 = vmatprep.subr.mxu0 %v5990_v3 }
 0x49c   : > { %5327 = vmatpush3.msra.mxu0 %v6405_v27 }
 0x49d   : > { %5328 = vmatprep.subr.mxu0 %v5990_v3 }
 0x49e   : > { %5329 = vmatpush3.msra.mxu0 %v6412_v28 }
 0x49f   : > { %5330 = vmatprep.subr.mxu0 %v5990_v3 }
 0x4a0   : > { %5331 = vmatpush3.msra.mxu0 %v6417_v29 }
 0x4a1   : > { %5355 = vmatprep.subr.mxu0 %v5990_v3 }
 0x541   : > { %v1871_v39 = vpop.f32.mrf.mxu0 }
 0x542   : > { %v1875_v40 = vsub.f32 %v1707_v32, %v1871_v39  ;;  %v2636_v32 = vmul.f32 %v2632_v30, %v6299_v26 }
 0x543   : > { %v5299_v41 = vpop.f32.mrf.mxu0 }
 0x544   : > { %v1876_v42 = vmul.f32 %v1875_v40, %v1875_v40 }
 0x546   : > { %5333 = vmatmul.mubr.f32.vlgmr.msra.gmra.mxu0 %v1876_v42 }
 0x547   : > { %5356 = vmatpush3.msra.mxu0 %v6339_v11  ;;  %5387 = vmatprep.mubr.msk.f32.mxu0 %vm5991_vm2, %v5990_v3 }
 0x548   : > { %5357 = vmatprep.subr.mxu0 %v5990_v3 }
 0x549   : > { %5358 = vmatpush3.msra.mxu0 %v6343_v12 }
 0x54a   : > { %5359 = vmatprep.subr.mxu0 %v5990_v3 }
 0x54b   : > { %5360 = vmatpush3.msra.mxu0 %v6350_v13 }
 0x54c   : > { %5361 = vmatprep.subr.mxu0 %v5990_v3 }
 0x54d   : > { %5362 = vmatpush3.msra.mxu0 %v6355_v14 }
 0x54e   : > { %5363 = vmatprep.subr.mxu0 %v5990_v3 }
 0x54f   : > { %5364 = vmatpush3.msra.mxu0 %v6360_v15 }
 0x550   : > { %5365 = vmatprep.subr.mxu0 %v5990_v3 }
 0x551   : > { %5366 = vmatpush3.msra.mxu0 %v6365_v16 }
 0x552   : > { %5367 = vmatprep.subr.mxu0 %v5990_v3 }
 0x553   : > { %5368 = vmatpush3.msra.mxu0 %v6370_v17 }
 0x554   : > { %5369 = vmatprep.subr.mxu0 %v5990_v3 }
 0x555   : > { %5370 = vmatpush3.msra.mxu0 %v6375_v20 }
 0x556   : > { %5371 = vmatprep.subr.mxu0 %v5990_v3 }
 0x557   : > { %5372 = vmatpush3.msra.mxu0 %v6380_v21 }
 0x558   : > { %5373 = vmatprep.subr.mxu0 %v5990_v3 }
 0x559   : > { %5374 = vmatpush3.msra.mxu0 %v6385_v22 }
 0x55a   : > { %5375 = vmatprep.subr.mxu0 %v5990_v3 }
 0x55b   : > { %5376 = vmatpush3.msra.mxu0 %v6390_v23 }
 0x55c   : > { %5377 = vmatprep.subr.mxu0 %v5990_v3 }
 0x55d   : > { %5378 = vmatpush3.msra.mxu0 %v6395_v24 }
 0x55e   : > { %5379 = vmatprep.subr.mxu0 %v5990_v3 }
 0x55f   : > { %5380 = vmatpush3.msra.mxu0 %v6400_v25 }
 0x560   : > { %5381 = vmatprep.subr.mxu0 %v5990_v3 }
 0x561   : > { %5382 = vmatpush3.msra.mxu0 %v6405_v27 }
 0x562   : > { %5383 = vmatprep.subr.mxu0 %v5990_v3 }
 0x563   : > { %5384 = vmatpush3.msra.mxu0 %v6412_v28 }
 0x564   : > { %5385 = vmatprep.subr.mxu0 %v5990_v3 }
 0x565   : > { %5386 = vmatpush3.msra.mxu0 %v6417_v29 }
 0x566   : > { %5430 = vmatprep.subr.mxu0 %v5990_v3 }
 0x606   : > { %v1943_v43 = vpop.f32.mrf.mxu0 }
 0x607   : > { %v1947_v44 = vmul.f32 0.0625, %v1943_v43 }
 0x608   : > { %v5334_v45 = vpop.f32.mrf.mxu0 }
 0x609   : > { %v1948_v46 = vadd.f32 1e-05, %v1947_v44 }
 0x60b   : > { %5923 = vrsqrt.f32 %v1948_v46  ;;  %v2130_v46 = vld [vmem:[%s7268_s2] sm:$0xf]  ;;  %s7276_s2 = sld [smem:[#allocation23_spill]] }
 0x618   : > { %v5924_v47 = vpop.eup %5923 }
 0x619   : > { %5338 = vmatmul.mubr.msk.f32.vlgmr.msra.gmra.mxu1 %vm1801_vm11, %v5924_v47 }
 0x61a   : > { %5352 = vmatprep.mubr.msk.f32.mxu1 %vm5991_vm2, %v5990_v3 }
 0x6d9   : > { %v2019_v49 = vpop.f32.mrf.mxu1 }
 0x6da   : > { %v2023_v50 = vmul.f32 %v2019_v49, %v1875_v40 }
 0x6db   : > { %v5339_v53 = vpop.f32.mrf.mxu1 }
 0x6dc   : > { %v2030_v55 = vmul.f32 %v4919_v48, %v2023_v50 }
 0x6de   : > { %v2037_v56 = vadd.f32 %v4920_v51, %v2030_v55  ;;  %v2602_v51 = vld [vmem:[#allocation2 + $0x38] sm:$0xf] }
 0x6e0   : > { %vm2038_vm12 = vcmp.ge.f32.partialorder %v2037_v56, 0.0  ;;  %v2044_v58 = vmul.f32 %v2042_v57, %v2037_v56 }
 0x6e2   : > { %v2045_v59 = vsel %vm2038_vm12, %v2037_v56, %v2044_v58  ;;  %vm3246_vm12 = vcmask 785408  }
 0x6e3   : > { %v2047_v60 = vrot.slane %v2045_v59, 4 }
 0x6e5   : > { %2049 = vst [vmem:[#allocation2 + $0x18] sm:$0xf0] %v2047_v60 }
 0x6ec   : > { %v6504_v61 = vld [vmem:[#allocation2 + $0x18] sm:$0xff] }
 0x6ed   : > { %v6506_v62 = vld [vmem:[#allocation2 + $0x18] sm:$0xff]  ;;  %2073 = vrot.lane.b32.xlu0 %v6504_v61, %s6002_s11  ;;  %v6511_v63 = vmul.f32 %v6504_v61, %v6309_v34  ;;  %2110 = vst [vmem:[#allocation3 + $0x20] sm:$0xff] %v6504_v61  ;;  %v6519_v2 = vmul.f32 %v6504_v61, %v6299_v26  ;;  %v2085_v4 = vmul.f32 %v2082_v0, %v6504_v61 }
 0x6ee   : > { %3782 = vst [vmem:[#allocation3 + $0x50] sm:$0xff] %v6506_v62  ;;  %v2056_v7 = vmul.f32 %v6504_v61, %v2053_v5 }
 0x6ef   : > { %2117 = vrot.lane.b32.xlu1 %v6511_v63, %s5994_s10 }
 0x6f1   : > { %2104 = vrot.lane.b32.xlu0 %v6519_v2, %s5996_s15 }
 0x6f3   : > { %2088 = vrot.lane.b32.xlu1 %v2084_v1, %s6003_s22 }
 0x6f5   : > { %2090 = vrot.lane.b32.xlu0 %v2085_v4, %s6003_s22  ;;  %s7272_s22 = sld [smem:[#allocation18_spill]] }
 0x6f7   : > { %2071 = vrot.lane.b32.xlu1 %v5990_v3, %s6002_s11  ;;  %s7269_s11 = sld [smem:[#allocation11_spill]] }
 0x6f9   : > { %2061 = vrot.lane.b32.xlu0 %v2056_v7, %s6004_s23 }
 0x6fb   : > { %2059 = vrot.lane.b32.xlu1 %v2055_v6, %s6004_s23  ;;  %s7273_s23 = sld [smem:[#allocation14_spill]] }
 0x6fd   : > { %2541 = vperm.xlu0 %5916, %v2230_v8  }
 0x6ff   : > { %2134 = vperm.xlu1 %5917, %v2131_v9  }
 0x701   : > { %2551 = vrot.lane.b32.xlu0 %v6293_v19, %s6005_s26  ;;  %v2103_v19 = vpop.permute.xlu1 %2102 }
 0x703   : > { %2604 = vrot.lane.b32.xlu1 %v6289_v18, %s6006_s0  ;;  %v2120_v18 = vpop.permute.xlu0 %2119 }
 0x705   : > { %2674 = vrot.lane.b32.xlu0 %v6328_v54, %s5994_s10 }
 0x707   : > { %2642 = vrot.lane.b32.xlu1 %v6322_v52, %s5996_s15 }
 0x709   : > { %2678 = vrot.lane.b32.xlu0 %v2667_v31, %s5994_s10 }
 0x70b   : > { %2646 = vrot.lane.b32.xlu1 %v2636_v32, %s5996_s15 }
 0x70d   : > { %2644 = vrot.lane.b32.xlu0 %v6519_v2, %s5996_s15 }
 0x75f   : > { %v2074_v33 = vpop.permute.xlu0 %2073 }
 0x761   : > { %v2118_v36 = vpop.permute.xlu1 %2117 }
 0x762   : > { %v2121_v37 = vsel %vm1622_vm7, %v2118_v36, %v2120_v18 }
 0x763   : > { %2123 = vst [vmem:[#allocation3 + $0x28] sm:$0xff] %v2121_v37  ;;  %v2105_v38 = vpop.permute.xlu0 %2104  ;;  %5341 = vmatpush3.msra.mxu1 %v2121_v37 }
 0x764   : > { %5342 = vmatprep.subr.mxu1 %v5990_v3  ;;  %v2106_v39 = vsel %vm1603_vm8, %v2103_v19, %v2105_v38 }
 0x765   : > { %v2089_v52 = vpop.permute.xlu1 %2088  ;;  %5343 = vmatpush3.msra.mxu1 %v6504_v61 }
 0x766   : > { %5344 = vmatprep.subr.mxu1 %v5990_v3 }
 0x767   : > { %v2091_v40 = vpop.permute.xlu0 %2090  ;;  %5345 = vmatpush3.msra.mxu1 %v2106_v39 }
 0x768   : > { %v2093_v41 = vsel %vm2092_vm13, %v2089_v52, %v2091_v40  ;;  %5346 = vmatprep.subr.mxu1 %v5990_v3 }
 0x769   : > { %2095 = vst [vmem:[#allocation3 + $0x10] sm:$0xff] %v2093_v41  ;;  %v2072_v42 = vpop.permute.xlu1 %2071  ;;  %5347 = vmatpush3.msra.mxu1 %v2093_v41 }
 0x76a   : > { %v2076_v43 = vsel %vm2075_vm14, %v2072_v42, %v2074_v33  ;;  %5348 = vmatprep.subr.mxu1 %v5990_v3  ;;  %v4924_v42 = vld [vmem:[%s7269_s11] ss:$0 sm:$0xff]  ;;  %s7278_s11 = sld [smem:[#allocation19_spill]]  ;;  %vm3846_vm14 = vcmask 982016  }
 0x76b   : > { %2078 = vst [vmem:[#allocation3 + $0x8] sm:$0xff] %v2076_v43  ;;  %5349 = vmatpush3.msra.mxu1 %v2076_v43  ;;  %v2062_v44 = vpop.permute.xlu0 %2061 }
 0x76c   : > { %5350 = vmatprep.subr.mxu1 %v5990_v3 }
 0x76d   : > { %v2060_v45 = vpop.permute.xlu1 %2059 }
 0x76e   : > { %v2064_v47 = vsel %vm2063_vm15, %v2060_v45, %v2062_v44  ;;  %v4925_v45 = vld [vmem:[%s7270_s16] ss:$0 sm:$0xff]  ;;  %s7279_s16 = sld [smem:[#allocation21_spill]] }
 0x76f   : > { %5351 = vmatpush3.msra.mxu1 %v2064_v47 }
 0x770   : > { %5353 = vmatmul.mubr.msk.f32.vlgmr.msra.gmra.mxu1 %vm2137_vm0, %v2130_v46  ;;  %5390 = vmatprep.subr.mxu1 %v5990_v3  ;;  %vm4290_vm0 = vcmask 97280  }
 0x771   : > { %5391 = vmatpush3.msra.mxu1 %v6424_v35  ;;  %5392 = vmatprep.mubr.msk.f32.mxu1 %vm5991_vm2, %v5990_v3 }
 0x772   : > { %5395 = vmatprep.subr.mxu1 %v5990_v3 }
 0x778   : > { %v6556_v48 = vpop.permute.xlu0 %2541 }
 0x77a   : > { %v2135_v49 = vpop.permute.xlu1 %2134 }
 0x77c   : > { %v6558_v50 = vpop.permute.xlu0 %2551 }
 0x77e   : > { %v6560_v53 = vpop.permute.xlu1 %2604 }
 0x77f   : > { %v2609_v55 = vmul.f32 %v6560_v53, %v2602_v51  ;;  %v2608_v56 = vmul.f32 %v6560_v53, %v6504_v61  ;;  %v2607_v58 = vmul.f32 0.0, %v6560_v53 }
 0x780   : > { %v2675_v57 = vpop.permute.xlu0 %2674 }
 0x781   : > { %2619 = vrot.lane.b32.xlu1 %v2609_v55, %s6005_s26  ;;  %2617 = vrot.lane.b32.xlu0 %v2608_v56, %s6005_s26 }
 0x782   : > { %v2643_v60 = vpop.permute.xlu1 %2642 }
 0x784   : > { %v6568_v59 = vpop.permute.xlu0 %2678 }
 0x785   : > { %2587 = vrot.lane.b32.xlu0 %v6504_v61, %s6007_s7  ;;  %2615 = vrot.lane.b32.xlu1 %v2607_v58, %s6005_s26  ;;  %v2579_v58 = vld [vmem:[#allocation2 + $0x38] sm:$0xf] }
 0x786   : > { %v6576_v4 = vpop.permute.xlu1 %2646 }
 0x788   : > { %v2645_v0 = vpop.permute.xlu0 %2644 }
 0x789   : > { %v2650_v1 = vsel %vm1603_vm8, %v2643_v60, %v2645_v0  ;;  %2672 = vrot.lane.b32.xlu1 %v6511_v63, %s5994_s10 }
 0x78a   : > { %2654 = vst [vmem:[#allocation3 + $0x24] sm:$0xff] %v2650_v1 }
 0x7f3   : > { %v6578_v5 = vpop.permute.xlu1 %2619 }
 0x7f7   : > { %v6580_v6 = vpop.permute.xlu1 %2615 }
 0x7fb   : > { %v2673_v7 = vpop.permute.xlu1 %2672 }
 0x7fc   : > { %v2680_v8 = vsel %vm1622_vm7, %v2673_v7, %v2675_v57  ;;  %v6666_v7 = vld [vmem:[#allocation2] sm:$0xff] }
 0x7fd   : > { %2684 = vst [vmem:[#allocation3 + $0x3c] sm:$0xff] %v2680_v8  ;;  %v2549_v8 = vld [vmem:[#allocation2 + $0x38] sm:$0xf] }
 0x830   : > { %v2207_v9 = vpop.f32.mrf.mxu1 }
 0x831   : > { %v2208_v10 = vadd.f32 %v2207_v9, %v2135_v49 }
 0x832   : > { %v5354_v30 = vpop.f32.mrf.mxu1 }
 0x833   : > { %5388 = vmatmul.mubr.f32.vlgmr.msra.gmra.mxu0 %v2208_v10 }
 0x834   : > { %5431 = vmatpush3.msra.mxu0 %v6424_v35  ;;  %5432 = vmatprep.mubr.msk.f32.mxu0 %vm5991_vm2, %v5990_v3 }
 0x835   : > { %5435 = vmatprep.subr.mxu0 %v5990_v3 }
 0x8f3   : > { %v2297_v31 = vpop.f32.mrf.mxu0 }
 0x8f4   : > { %v2301_v32 = vmul.f32 0.0625, %v2297_v31 }
 0x8f5   : > { %v5389_v18 = vpop.f32.mrf.mxu0 }
 0x8f6   : > { %5393 = vmatmul.mubr.msk.f32.vlgmr.msra.gmra.mxu1 %vm1801_vm11, %v2301_v32  ;;  %v2554_v32 = vmul.f32 %v6666_v7, %v6558_v50 }
 0x8f7   : > { %5396 = vmatpush3.msra.mxu1 %v6339_v11  ;;  %5427 = vmatprep.mubr.msk.f32.mxu1 %vm5991_vm2, %v5990_v3 }
 0x8f8   : > { %5397 = vmatprep.subr.mxu1 %v5990_v3 }
 0x8f9   : > { %5398 = vmatpush3.msra.mxu1 %v6343_v12 }
 0x8fa   : > { %5399 = vmatprep.subr.mxu1 %v5990_v3 }
 0x8fb   : > { %5400 = vmatpush3.msra.mxu1 %v6350_v13 }
 0x8fc   : > { %5401 = vmatprep.subr.mxu1 %v5990_v3 }
 0x8fd   : > { %5402 = vmatpush3.msra.mxu1 %v6355_v14 }
 0x8fe   : > { %5403 = vmatprep.subr.mxu1 %v5990_v3 }
 0x8ff   : > { %5404 = vmatpush3.msra.mxu1 %v6360_v15 }
 0x900   : > { %5405 = vmatprep.subr.mxu1 %v5990_v3 }
 0x901   : > { %5406 = vmatpush3.msra.mxu1 %v6365_v16 }
 0x902   : > { %5407 = vmatprep.subr.mxu1 %v5990_v3 }
 0x903   : > { %5408 = vmatpush3.msra.mxu1 %v6370_v17 }
 0x904   : > { %5409 = vmatprep.subr.mxu1 %v5990_v3 }
 0x905   : > { %5410 = vmatpush3.msra.mxu1 %v6375_v20 }
 0x906   : > { %5411 = vmatprep.subr.mxu1 %v5990_v3 }
 0x907   : > { %5412 = vmatpush3.msra.mxu1 %v6380_v21 }
 0x908   : > { %5413 = vmatprep.subr.mxu1 %v5990_v3 }
 0x909   : > { %5414 = vmatpush3.msra.mxu1 %v6385_v22 }
 0x90a   : > { %5415 = vmatprep.subr.mxu1 %v5990_v3 }
 0x90b   : > { %5416 = vmatpush3.msra.mxu1 %v6390_v23 }
 0x90c   : > { %5417 = vmatprep.subr.mxu1 %v5990_v3 }
 0x90d   : > { %5418 = vmatpush3.msra.mxu1 %v6395_v24 }
 0x90e   : > { %5419 = vmatprep.subr.mxu1 %v5990_v3 }
 0x90f   : > { %5420 = vmatpush3.msra.mxu1 %v6400_v25 }
 0x910   : > { %5421 = vmatprep.subr.mxu1 %v5990_v3 }
 0x911   : > { %5422 = vmatpush3.msra.mxu1 %v6405_v27 }
 0x912   : > { %5423 = vmatprep.subr.mxu1 %v5990_v3 }
 0x913   : > { %5424 = vmatpush3.msra.mxu1 %v6412_v28 }
 0x914   : > { %5425 = vmatprep.subr.mxu1 %v5990_v3 }
 0x915   : > { %5426 = vmatpush3.msra.mxu1 %v6417_v29 }
 0x916   : > { %5456 = vmatprep.subr.mxu1 %v5990_v3 }
 0x9b6   : > { %v2371_v19 = vpop.f32.mrf.mxu1 }
 0x9b7   : > { %v2375_v33 = vsub.f32 %v2208_v10, %v2371_v19  ;;  %v2556_v10 = vmul.f32 %v6558_v50, %v2549_v8  ;;  %v2555_v19 = vmul.f32 %v6558_v50, %v6504_v61 }
 0x9b8   : > { %v5394_v36 = vpop.f32.mrf.mxu1 }
 0x9b9   : > { %v2376_v37 = vmul.f32 %v2375_v33, %v2375_v33  ;;  %v3204_v36 = vld [vmem:[#allocation2 + $0x48] sm:$0xff] }
 0x9bb   : > { %5428 = vmatmul.mubr.f32.vlgmr.msra.gmra.mxu1 %v2376_v37  ;;  %v6688_v37 = vmul.f32 %v3204_v36, %v6309_v34 }
 0x9bc   : > { %5457 = vmatpush3.msra.mxu1 %v6339_v11  ;;  %5488 = vmatprep.mubr.msk.f32.mxu1 %vm5991_vm2, %v5990_v3 }
 0x9bd   : > { %5458 = vmatprep.subr.mxu1 %v5990_v3 }
 0x9be   : > { %5459 = vmatpush3.msra.mxu1 %v6343_v12 }
 0x9bf   : > { %5460 = vmatprep.subr.mxu1 %v5990_v3 }
 0x9c0   : > { %5461 = vmatpush3.msra.mxu1 %v6350_v13 }
 0x9c1   : > { %5462 = vmatprep.subr.mxu1 %v5990_v3 }
 0x9c2   : > { %5463 = vmatpush3.msra.mxu1 %v6355_v14 }
 0x9c3   : > { %5464 = vmatprep.subr.mxu1 %v5990_v3 }
 0x9c4   : > { %5465 = vmatpush3.msra.mxu1 %v6360_v15 }
 0x9c5   : > { %5466 = vmatprep.subr.mxu1 %v5990_v3 }
 0x9c6   : > { %5467 = vmatpush3.msra.mxu1 %v6365_v16 }
 0x9c7   : > { %5468 = vmatprep.subr.mxu1 %v5990_v3 }
 0x9c8   : > { %5469 = vmatpush3.msra.mxu1 %v6370_v17 }
 0x9c9   : > { %5470 = vmatprep.subr.mxu1 %v5990_v3 }
 0x9ca   : > { %5471 = vmatpush3.msra.mxu1 %v6375_v20 }
 0x9cb   : > { %5472 = vmatprep.subr.mxu1 %v5990_v3 }
 0x9cc   : > { %5473 = vmatpush3.msra.mxu1 %v6380_v21 }
 0x9cd   : > { %5474 = vmatprep.subr.mxu1 %v5990_v3 }
 0x9ce   : > { %5475 = vmatpush3.msra.mxu1 %v6385_v22 }
 0x9cf   : > { %5476 = vmatprep.subr.mxu1 %v5990_v3 }
 0x9d0   : > { %5477 = vmatpush3.msra.mxu1 %v6390_v23 }
 0x9d1   : > { %5478 = vmatprep.subr.mxu1 %v5990_v3 }
 0x9d2   : > { %5479 = vmatpush3.msra.mxu1 %v6395_v24 }
 0x9d3   : > { %5480 = vmatprep.subr.mxu1 %v5990_v3 }
 0x9d4   : > { %5481 = vmatpush3.msra.mxu1 %v6400_v25 }
 0x9d5   : > { %5482 = vmatprep.subr.mxu1 %v5990_v3 }
 0x9d6   : > { %5483 = vmatpush3.msra.mxu1 %v6405_v27 }
 0x9d7   : > { %5484 = vmatprep.subr.mxu1 %v5990_v3 }
 0x9d8   : > { %5485 = vmatpush3.msra.mxu1 %v6412_v28 }
 0x9d9   : > { %5486 = vmatprep.subr.mxu1 %v5990_v3 }
 0x9da   : > { %5487 = vmatpush3.msra.mxu1 %v6417_v29 }
 0x9db   : > { %5531 = vmatprep.subr.mxu1 %v5990_v3 }
 0xa7b   : > { %v2443_v38 = vpop.f32.mrf.mxu1 }
 0xa7c   : > { %v2447_v52 = vmul.f32 0.0625, %v2443_v38 }
 0xa7d   : > { %v5429_v39 = vpop.f32.mrf.mxu1 }
 0xa7e   : > { %v2448_v40 = vadd.f32 1e-05, %v2447_v52 }
 0xa80   : > { %5925 = vrsqrt.f32 %v2448_v40 }
 0xa8d   : > { %v5926_v41 = vpop.eup %5925 }
 0xa8e   : > { %5433 = vmatmul.mubr.msk.f32.vlgmr.msra.gmra.mxu0 %vm1801_vm11, %v5926_v41 }
 0xa8f   : > { %5453 = vmatprep.mubr.msk.f32.mxu0 %vm5991_vm2, %v5990_v3 }
 0xb4e   : > { %v2519_v43 = vpop.f32.mrf.mxu0 }
 0xb4f   : > { %v2523_v44 = vmul.f32 %v2519_v43, %v2375_v33  ;;  %v2795_v33 = vld [vmem:[%s7272_s22] sm:$0xf]  ;;  %s7281_s22 = sld [smem:[#allocation28_spill]] }
 0xb50   : > { %v5434_v46 = vpop.f32.mrf.mxu0 }
 0xb51   : > { %v2530_v47 = vmul.f32 %v4924_v42, %v2523_v44 }
 0xb53   : > { %v2537_v49 = vadd.f32 %v4925_v45, %v2530_v47 }
 0xb55   : > { %vm2538_vm3 = vcmp.ge.f32.partialorder %v2537_v49, 0.0  ;;  %v2544_v51 = vmul.f32 %v6556_v48, %v2537_v49  ;;  %v5918_v48 = vpack.i.bf16 %v2579_v58, %v6666_v7 }
 0xb57   : > { %v2545_v55 = vsel %vm2538_vm3, %v2537_v49, %v2544_v51 }
 0xb58   : > { %2546 = vst [vmem:[#allocation2 + $0x40] sm:$0xf] %v2545_v55 }
 0xb5f   : > { %v2662_v56 = vld [vmem:[#allocation2 + $0x40] sm:$0xf] }
 0xb60   : > { %v2633_v57 = vld [vmem:[#allocation2 + $0x40] sm:$0xf]  ;;  %v2666_v60 = vmul.f32 %v2662_v56, %v6309_v34 }
 0xb61   : > { %v2637_v0 = vmul.f32 %v2633_v57, %v6299_v26  ;;  %v2603_v3 = vld [vmem:[#allocation2 + $0x40] sm:$0xf] }
 0xb62   : > { %v2657_v1 = vld [vmem:[#allocation2 + $0x40] sm:$0xf]  ;;  %2676 = vrot.lane.b32.xlu1 %v2666_v60, %s5994_s10  ;;  %v2610_v9 = vmul.f32 %v6560_v53, %v2603_v3 }
 0xb63   : > { %2648 = vrot.lane.b32.xlu0 %v2637_v0, %s5996_s15  ;;  %2659 = vst [vmem:[#allocation3 + $0x38] sm:$0xf] %v2657_v1  ;;  %v2580_v30 = vld [vmem:[#allocation2 + $0x40] sm:$0xf] }
 0xb64   : > { %v2550_v31 = vld [vmem:[#allocation2 + $0x40] sm:$0xf] }
 0xb65   : > { %v2557_v18 = vmul.f32 %v6558_v50, %v2550_v31  ;;  %v2696_v53 = vld [vmem:[%s7271_s18] sm:$0xf]  ;;  %v2618_v50 = vpop.permute.xlu0 %2617  ;;  %s7280_s18 = sld [smem:[#allocation22_spill]] }
 0xb66   : > { %5919 = vrot.lane.b32.xlu1 %v5918_v48, %s6007_s7  ;;  %v2624_v58 = vsel %vm2623_vm4, %v6580_v6, %v2618_v50  ;;  %v2695_v1 = vld [vmem:[%s7273_s23] sm:$0xf]  ;;  %s7282_s23 = sld [smem:[#allocation25_spill]] }
 0xb67   : > { %2621 = vrot.lane.b32.xlu0 %v2610_v9, %s6005_s26  ;;  %s7274_s26 = sld [smem:[#allocation16_spill]] }
 0xb69   : > { %v2588_v38 = vpop.permute.xlu0 %2587 }
 0xb6a   : > { %2591 = vrot.lane.b32.xlu1 %v2580_v30, %s6007_s7  ;;  %s7277_s7 = sld [smem:[#allocation20_spill]] }
 0xb6b   : > { %2566 = vrot.lane.b32.xlu0 %v2556_v10, %s6006_s0 }
 0xb6e   : > { %2568 = vrot.lane.b32.xlu1 %v2557_v18, %s6006_s0 }
 0xb6f   : > { %2562 = vrot.lane.b32.xlu0 %v2554_v32, %s6006_s0 }
 0xb72   : > { %2564 = vrot.lane.b32.xlu1 %v2555_v19, %s6006_s0  ;;  %s7275_s0 = sld [smem:[#allocation17_spill]] }
 0xb73   : > { %2699 = vperm.xlu0 %5916, %v2696_v53  }
 0xb76   : > { %3106 = vperm.xlu1 %5917, %v2795_v33  }
 0xb77   : > { %3213 = vrot.lane.b32.xlu0 %v6511_v63, %s5994_s10 }
 0xb7a   : > { %3219 = vrot.lane.b32.xlu1 %v6688_v37, %s5994_s10 }
 0xb7e   : > { %3215 = vrot.lane.b32.xlu1 %v6328_v54, %s5994_s10 }
 0xb82   : > { %3185 = vrot.lane.b32.xlu1 %v6519_v2, %s5996_s15 }
 0xbd4   : > { %v2677_v52 = vpop.permute.xlu1 %2676 }
 0xbd5   : > { %v2649_v39 = vpop.permute.xlu0 %2648  ;;  %v2681_v40 = vsel %vm1622_vm7, %v2677_v52, %v6568_v59  ;;  %v6794_v52 = vmul.f32 %v6666_v7, %v6309_v34 }
 0xbd6   : > { %v2651_v41 = vsel %vm1603_vm8, %v6576_v4, %v2649_v39  ;;  %2685 = vst [vmem:[#allocation3 + $0x44] sm:$0xf] %v2681_v40  ;;  %v2693_v4 = vld [vmem:[#allocation3 + $0x38] sm:$0xff]  ;;  %v3339_v39 = vld [vmem:[%s7276_s2] sm:$0xf]  ;;  %s7285_s2 = sld [smem:[#allocation27_spill]] }
 0xbd7   : > { %2655 = vst [vmem:[#allocation3 + $0x2c] sm:$0xf] %v2651_v41  ;;  %v3240_v40 = vld [vmem:[%s7277_s7] sm:$0xf]  ;;  %s7286_s7 = sld [smem:[#allocation30_spill]] }
 0xbd8   : > { %v5920_v42 = vpop.permute.xlu1 %5919 }
 0xbd9   : > { %v2622_v43 = vpop.permute.xlu0 %2621  ;;  %v5922_v54 = vunpack.i.h.bf16 %v5920_v42  ;;  %v5921_v44 = vunpack.i.l.bf16 %v5920_v42  ;;  %v3786_v42 = vld [vmem:[#allocation2 + $0x20] sm:$0xff] }
 0xbda   : > { %v2625_v2 = vsel %vm2623_vm4, %v6578_v5, %v2622_v43  ;;  %v3791_v43 = vmul.f32 %v6506_v62, %v6309_v34 }
 0xbdb   : > { %2629 = vst [vmem:[#allocation3 + $0x20] sm:$0xf] %v2625_v2  ;;  %v2594_v45 = vsel %vm2593_vm5, %v5921_v44, %v2588_v38  ;;  %v6783_v38 = vmul.f32 %v6666_v7, %v6299_v26  ;;  %v3747_v2 = vmul.f32 %v6506_v62, %v6299_v26  ;;  %v6839_v62 = vld [vmem:[%s6061_s14 + $0x68] sm:$0xff] }
 0xbdc   : > { %2598 = vst [vmem:[#allocation3 + $0xc] sm:$0xff] %v2594_v45  ;;  %v2592_v46 = vpop.permute.xlu1 %2591  ;;  %v3706_v45 = vld [vmem:[#allocation2 + $0x60] sm:$0xf] }
 0xbdd   : > { %v2595_v59 = vsel %vm2593_vm5, %v5922_v54, %v2592_v46  ;;  %v2694_v47 = vld [vmem:[#allocation3 + $0x40] sm:$0xff]  ;;  %v2567_v49 = vpop.permute.xlu0 %2566  ;;  %v3792_v54 = vmul.f32 %v3786_v42, %v6309_v34 }
 0xbde   : > { %2599 = vst [vmem:[#allocation3 + $0x14] sm:$0xf] %v2595_v59  ;;  %5436 = vmatpush3.msra.mxu0 %v2694_v47  ;;  %3199 = vst [vmem:[#allocation3 + $0x40] sm:$0xff] %v6504_v61  ;;  %v2691_v55 = vld [vmem:[#allocation3 + $0x28] sm:$0xff]  ;;  %v6828_v46 = vld [vmem:[%s6061_s14 + $0x78] sm:$0xff]  ;;  %v3712_v59 = vmul.f32 %v3706_v45, %v6309_v34 }
 0xbdf   : > { %5437 = vmatprep.subr.mxu0 %v6666_v7  ;;  %v6833_v47 = vld [vmem:[%s6061_s14 + $0x70] sm:$0xff] }
 0xbe0   : > { %v2569_v51 = vpop.permute.xlu1 %2568  ;;  %5438 = vmatpush3.msra.mxu0 %v2693_v4  ;;  %v6844_v4 = vld [vmem:[%s6061_s14 + $0x60] sm:$0xff] }
 0xbe1   : > { %v2572_v5 = vsel %vm2570_vm6, %v2567_v49, %v2569_v51  ;;  %5439 = vmatprep.subr.mxu0 %v6666_v7  ;;  %v2563_v3 = vpop.permute.xlu0 %2562  ;;  %v6849_v49 = vld [vmem:[%s6061_s14 + $0x58] sm:$0xff]  ;;  %v6854_v51 = vld [vmem:[%s6061_s14 + $0x50] sm:$0xff] }
 0xbe2   : > { %2576 = vst [vmem:[#allocation3 + $0x8] sm:$0xf] %v2572_v5  ;;  %5440 = vmatpush3.msra.mxu0 %v6504_v61  ;;  %v2690_v56 = vld [vmem:[#allocation3 + $0x20] sm:$0xff]  ;;  %v6859_v5 = vld [vmem:[%s6061_s14 + $0x48] sm:$0xff] }
 0xbe3   : > { %5441 = vmatprep.subr.mxu0 %v6666_v7 }
 0xbe4   : > { %5442 = vmatpush3.msra.mxu0 %v2691_v55  ;;  %v2565_v60 = vpop.permute.xlu1 %2564  ;;  %v6864_v55 = vld [vmem:[%s6061_s14 + $0x40] sm:$0xff] }
 0xbe5   : > { %5443 = vmatprep.subr.mxu0 %v6666_v7  ;;  %v2688_v57 = vld [vmem:[#allocation3 + $0x10] sm:$0xff]  ;;  %v2571_v48 = vsel %vm2570_vm6, %v2563_v3, %v2565_v60  ;;  %v6884_v60 = vld [vmem:[%s6061_s14 + $0x20] sm:$0xff]  ;;  %v6894_v3 = vld [vmem:[%s6061_s14 + $0x10] sm:$0xff] }
 0xbe6   : > { %5444 = vmatpush3.msra.mxu0 %v2690_v56  ;;  %3143 = vst [vmem:[#allocation3 + $0x10] sm:$0xff] %v6666_v7  ;;  %v6869_v56 = vld [vmem:[%s6061_s14 + $0x38] sm:$0xff] }
 0xbe7   : > { %5445 = vmatprep.subr.mxu0 %v6666_v7  ;;  %3698 = vst [vmem:[#allocation3 + $0x14] sm:$0xff] %v6666_v7 }
 0xbe8   : > { %5446 = vmatpush3.msra.mxu0 %v2624_v58  ;;  %v6879_v58 = vld [vmem:[%s6061_s14 + $0x28] sm:$0xff] }
 0xbe9   : > { %5447 = vmatprep.subr.mxu0 %v6666_v7  ;;  %v2687_v0 = vld [vmem:[#allocation3 + $0x8] sm:$0xff] }
 0xbea   : > { %5448 = vmatpush3.msra.mxu0 %v2688_v57  ;;  %v6874_v57 = vld [vmem:[%s6061_s14 + $0x30] sm:$0xff] }
 0xbeb   : > { %5449 = vmatprep.subr.mxu0 %v6666_v7 }
 0xbec   : > { %5450 = vmatpush3.msra.mxu0 %v2687_v0  ;;  %v6889_v0 = vld [vmem:[%s6061_s14 + $0x18] sm:$0xff] }
 0xbed   : > { %5451 = vmatprep.subr.mxu0 %v6666_v7 }
 0xbee   : > { %5452 = vmatpush3.msra.mxu0 %v2571_v48  ;;  %v2700_v6 = vpop.permute.xlu0 %2699 }
 0xbef   : > { %5454 = vmatmul.mubr.msk.f32.vlgmr.msra.gmra.mxu0 %vm2702_vm9, %v2695_v1  ;;  %5491 = vmatprep.subr.mxu0 %v6666_v7 }
 0xbf0   : > { %5492 = vmatpush3.msra.mxu0 %v6424_v35  ;;  %5493 = vmatprep.mubr.msk.f32.mxu0 %vm5991_vm2, %v6666_v7 }
 0xbf1   : > { %5496 = vmatprep.subr.mxu0 %v6666_v7 }
 0xcaf   : > { %v2772_v8 = vpop.f32.mrf.mxu0 }
 0xcb0   : > { %v2773_v9 = vadd.f32 %v2772_v8, %v2700_v6  ;;  %v3214_v6 = vpop.permute.xlu0 %3213 }
 0xcb1   : > { %v5455_v10 = vpop.f32.mrf.mxu0 }
 0xcb2   : > { %5489 = vmatmul.mubr.f32.vlgmr.msra.gmra.mxu1 %v2773_v9 }
 0xcb3   : > { %5532 = vmatpush3.msra.mxu1 %v6424_v35  ;;  %5533 = vmatprep.mubr.msk.f32.mxu1 %vm5991_vm2, %v6666_v7  ;;  %v3107_v35 = vpop.permute.xlu1 %3106 }
 0xcb4   : > { %5536 = vmatprep.subr.mxu1 %v6666_v7 }
 0xcb7   : > { %v3220_v1 = vpop.permute.xlu1 %3219 }
 0xcbb   : > { %v3216_v48 = vpop.permute.xlu1 %3215 }
 0xcbf   : > { %v3186_v8 = vpop.permute.xlu1 %3185 }
 0xd72   : > { %v2862_v30 = vpop.f32.mrf.mxu1 }
 0xd73   : > { %v2866_v31 = vmul.f32 0.0625, %v2862_v30 }
 0xd74   : > { %v5490_v32 = vpop.f32.mrf.mxu1 }
 0xd75   : > { %5494 = vmatmul.mubr.msk.f32.vlgmr.msra.gmra.mxu0 %vm1801_vm11, %v2866_v31  ;;  %v3221_v31 = vsel %vm1622_vm7, %v3214_v6, %v3216_v48 }
 0xd76   : > { %5497 = vmatpush3.msra.mxu0 %v6339_v11  ;;  %5528 = vmatprep.mubr.msk.f32.mxu0 %vm5991_vm2, %v6666_v7 }
 0xd77   : > { %5498 = vmatprep.subr.mxu0 %v6666_v7 }
 0xd78   : > { %5499 = vmatpush3.msra.mxu0 %v6343_v12 }
 0xd79   : > { %5500 = vmatprep.subr.mxu0 %v6666_v7 }
 0xd7a   : > { %5501 = vmatpush3.msra.mxu0 %v6350_v13 }
 0xd7b   : > { %5502 = vmatprep.subr.mxu0 %v6666_v7 }
 0xd7c   : > { %5503 = vmatpush3.msra.mxu0 %v6355_v14 }
 0xd7d   : > { %5504 = vmatprep.subr.mxu0 %v6666_v7 }
 0xd7e   : > { %5505 = vmatpush3.msra.mxu0 %v6360_v15 }
 0xd7f   : > { %5506 = vmatprep.subr.mxu0 %v6666_v7 }
 0xd80   : > { %5507 = vmatpush3.msra.mxu0 %v6365_v16 }
 0xd81   : > { %5508 = vmatprep.subr.mxu0 %v6666_v7 }
 0xd82   : > { %5509 = vmatpush3.msra.mxu0 %v6370_v17 }
 0xd83   : > { %5510 = vmatprep.subr.mxu0 %v6666_v7 }
 0xd84   : > { %5511 = vmatpush3.msra.mxu0 %v6375_v20 }
 0xd85   : > { %5512 = vmatprep.subr.mxu0 %v6666_v7 }
 0xd86   : > { %5513 = vmatpush3.msra.mxu0 %v6380_v21 }
 0xd87   : > { %5514 = vmatprep.subr.mxu0 %v6666_v7 }
 0xd88   : > { %5515 = vmatpush3.msra.mxu0 %v6385_v22  ;;  %v4929_v22 = vld [vmem:[%s7274_s26] ss:$0 sm:$0xff]  ;;  %s7283_s26 = sld [smem:[#allocation24_spill]] }
 0xd89   : > { %5516 = vmatprep.subr.mxu0 %v6666_v7 }
 0xd8a   : > { %5517 = vmatpush3.msra.mxu0 %v6390_v23 }
 0xd8b   : > { %5518 = vmatprep.subr.mxu0 %v6666_v7 }
 0xd8c   : > { %5519 = vmatpush3.msra.mxu0 %v6395_v24 }
 0xd8d   : > { %5520 = vmatprep.subr.mxu0 %v6666_v7 }
 0xd8e   : > { %5521 = vmatpush3.msra.mxu0 %v6400_v25  ;;  %v4930_v25 = vld [vmem:[%s7275_s0] ss:$0 sm:$0xff]  ;;  %s7284_s0 = sld [smem:[#allocation26_spill]] }
 0xd8f   : > { %5522 = vmatprep.subr.mxu0 %v6666_v7 }
 0xd90   : > { %5523 = vmatpush3.msra.mxu0 %v6405_v27 }
 0xd91   : > { %5524 = vmatprep.subr.mxu0 %v6666_v7 }
 0xd92   : > { %5525 = vmatpush3.msra.mxu0 %v6412_v28 }
 0xd93   : > { %5526 = vmatprep.subr.mxu0 %v6666_v7 }
 0xd94   : > { %5527 = vmatpush3.msra.mxu0 %v6417_v29 }
 0xd95   : > { %5563 = vmatprep.subr.mxu0 %v6666_v7 }
 0xe35   : > { %v2936_v11 = vpop.f32.mrf.mxu0 }
 0xe36   : > { %v2940_v12 = vsub.f32 %v2773_v9, %v2936_v11 }
 0xe37   : > { %v5495_v13 = vpop.f32.mrf.mxu0 }
 0xe38   : > { %v2941_v14 = vmul.f32 %v2940_v12, %v2940_v12 }
 0xe3a   : > { %5529 = vmatmul.mubr.f32.vlgmr.msra.gmra.mxu0 %v2941_v14 }
 0xe3b   : > { %5595 = vmatprep.mubr.msk.f32.mxu0 %vm5991_vm2, %v6666_v7  ;;  %5564 = vmatpush3.msra.mxu0 %v6828_v46 }
 0xe3c   : > { %5565 = vmatprep.subr.mxu0 %v6666_v7 }
 0xe3d   : > { %5566 = vmatpush3.msra.mxu0 %v6833_v47 }
 0xe3e   : > { %5567 = vmatprep.subr.mxu0 %v6666_v7 }
 0xe3f   : > { %5568 = vmatpush3.msra.mxu0 %v6839_v62 }
 0xe40   : > { %5569 = vmatprep.subr.mxu0 %v6666_v7 }
 0xe41   : > { %5570 = vmatpush3.msra.mxu0 %v6844_v4 }
 0xe42   : > { %5571 = vmatprep.subr.mxu0 %v6666_v7 }
 0xe43   : > { %5572 = vmatpush3.msra.mxu0 %v6849_v49 }
 0xe44   : > { %5573 = vmatprep.subr.mxu0 %v6666_v7 }
 0xe45   : > { %5574 = vmatpush3.msra.mxu0 %v6854_v51 }
 0xe46   : > { %5575 = vmatprep.subr.mxu0 %v6666_v7 }
 0xe47   : > { %5576 = vmatpush3.msra.mxu0 %v6859_v5 }
 0xe48   : > { %5577 = vmatprep.subr.mxu0 %v6666_v7 }
 0xe49   : > { %5578 = vmatpush3.msra.mxu0 %v6864_v55 }
 0xe4a   : > { %5579 = vmatprep.subr.mxu0 %v6666_v7 }
 0xe4b   : > { %5580 = vmatpush3.msra.mxu0 %v6869_v56 }
 0xe4c   : > { %5581 = vmatprep.subr.mxu0 %v6666_v7 }
 0xe4d   : > { %5582 = vmatpush3.msra.mxu0 %v6874_v57 }
 0xe4e   : > { %5583 = vmatprep.subr.mxu0 %v6666_v7 }
 0xe4f   : > { %5584 = vmatpush3.msra.mxu0 %v6879_v58 }
 0xe50   : > { %5585 = vmatprep.subr.mxu0 %v6666_v7 }
 0xe51   : > { %5586 = vmatpush3.msra.mxu0 %v6884_v60 }
 0xe52   : > { %5587 = vmatprep.subr.mxu0 %v6666_v7 }
 0xe53   : > { %5588 = vmatpush3.msra.mxu0 %v6889_v0 }
 0xe54   : > { %5589 = vmatprep.subr.mxu0 %v6666_v7 }
 0xe55   : > { %5590 = vmatpush3.msra.mxu0 %v6894_v3 }
 0xe56   : > { %5591 = vmatprep.subr.mxu0 %v6666_v7 }
 0xefa   : > { %v3008_v15 = vpop.f32.mrf.mxu0 }
 0xefb   : > { %v3012_v16 = vmul.f32 0.0625, %v3008_v15 }
 0xefc   : > { %v5530_v17 = vpop.f32.mrf.mxu0 }
 0xefd   : > { %v3013_v20 = vadd.f32 1e-05, %v3012_v16 }
 0xeff   : > { %5927 = vrsqrt.f32 %v3013_v20 }
 0xf0c   : > { %v5928_v21 = vpop.eup %5927 }
 0xf0d   : > { %5534 = vmatmul.mubr.msk.f32.vlgmr.msra.gmra.mxu1 %vm1801_vm11, %v5928_v21  ;;  %v3697_v21 = vld [vmem:[#allocation2 + $0x58] sm:$0xf] }
 0xf0e   : > { %5560 = vmatprep.mubr.msk.f32.mxu1 %vm5991_vm2, %v6666_v7 }
 0xfcd   : > { %v3084_v23 = vpop.f32.mrf.mxu1 }
 0xfce   : > { %v3088_v24 = vmul.f32 %v3084_v23, %v2940_v12 }
 0xfcf   : > { %v5535_v27 = vpop.f32.mrf.mxu1 }
 0xfd0   : > { %v3095_v28 = vmul.f32 %v4929_v22, %v3088_v24 }
 0xfd2   : > { %v3102_v29 = vadd.f32 %v4930_v25, %v3095_v28  ;;  %v3239_v28 = vld [vmem:[%s7278_s11] sm:$0xf]  ;;  %s7287_s11 = sld [smem:[#allocation29_spill]] }
 0xfd4   : > { %vm3103_vm10 = vcmp.ge.f32.partialorder %v3102_v29, 0.0  ;;  %v3109_v18 = vmul.f32 %v3107_v35, %v3102_v29 }
 0xfd6   : > { %v3110_v53 = vsel %vm3103_vm10, %v3102_v29, %v3109_v18 }
 0xfd7   : > { %v3112_v19 = vrot.slane %v3110_v53, 4 }
 0xfd9   : > { %3114 = vst [vmem:[#allocation2 + $0x40] sm:$0xf0] %v3112_v19 }
 0xfe0   : > { %v6772_v33 = vld [vmem:[#allocation2 + $0x40] sm:$0xff] }
 0xfe1   : > { %v3207_v36 = vmul.f32 %v6772_v33, %v6309_v34  ;;  %v3178_v50 = vmul.f32 %v6772_v33, %v6299_v26  ;;  %3200 = vst [vmem:[#allocation3 + $0x48] sm:$0xff] %v6772_v33 }
 0xfe3   : > { %3217 = vrot.lane.b32.xlu0 %v3207_v36, %s5994_s10  ;;  %3189 = vrot.lane.b32.xlu1 %v3178_v50, %s5996_s15 }
 0xfe7   : > { %3187 = vrot.lane.b32.xlu0 %v6783_v38, %s5996_s15  ;;  %3163 = vrot.lane.b32.xlu1 %v3207_v36, %s5994_s10 }
 0xfeb   : > { %3183 = vrot.lane.b32.xlu0 %v6783_v38, %s5996_s15  ;;  %3159 = vrot.lane.b32.xlu1 %v6511_v63, %s5994_s10  ;;  %v3790_v63 = vld [vmem:[#allocation2 + $0x70] sm:$0xf] }
 0xfec   : > { %v3796_v41 = vmul.f32 %v3790_v63, %v6309_v34 }
 0xfef   : > { %3161 = vrot.lane.b32.xlu0 %v6794_v52, %s5994_s10  ;;  %3133 = vrot.lane.b32.xlu1 %v6783_v38, %s5996_s15 }
 0xff3   : > { %3157 = vrot.lane.b32.xlu0 %v6794_v52, %s5994_s10  ;;  %3129 = vrot.lane.b32.xlu1 %v6783_v38, %s5996_s15 }
 0xff7   : > { %3131 = vrot.lane.b32.xlu0 %v6783_v38, %s5996_s15  ;;  %3650 = vperm.xlu1 %5917, %v3339_v39  }
 0xffb   : > { %3127 = vrot.lane.b32.xlu0 %v6783_v38, %s5996_s15  ;;  %3809 = vrot.lane.b32.xlu1 %v6688_v37, %s5994_s10  ;;  %v3744_v37 = vld [vmem:[#allocation2 + $0x60] sm:$0xf] }
 0xffc   : > { %v3750_v44 = vmul.f32 %v3744_v37, %v6299_v26  ;;  %v6938_v37 = vld [vmem:[%s6061_s14 + $0x8] sm:$0xff] }
 0xffd   : > { %5592 = vmatpush3.msra.mxu0 %v6938_v37 }
 0xffe   : > { %5593 = vmatprep.subr.mxu0 %v6666_v7 }
 0xfff   : > { %3243 = vperm.xlu0 %5916, %v3240_v40   ;;  %3813 = vrot.lane.b32.xlu1 %v3796_v41, %s5994_s10 }
0x1003   : > { %3803 = vrot.lane.b32.xlu0 %v3791_v43, %s5994_s10  ;;  %3805 = vrot.lane.b32.xlu1 %v3792_v54, %s5994_s10 }
0x1007   : > { %3762 = vrot.lane.b32.xlu0 %v6783_v38, %s5996_s15  ;;  %3764 = vrot.lane.b32.xlu1 %v3178_v50, %s5996_s15 }
0x100b   : > { %3766 = vrot.lane.b32.xlu0 %v3750_v44, %s5996_s15  ;;  %3760 = vrot.lane.b32.xlu1 %v3747_v2, %s5996_s15  ;;  %v6942_v44 = vld [vmem:[%s6061_s14] sm:$0xff] }
0x100c   : > { %5594 = vmatpush3.msra.mxu0 %v6942_v44 }
0x100d   : > { %5638 = vmatprep.subr.mxu0 %v6666_v7 }
0x100f   : > { %3807 = vrot.lane.b32.xlu0 %v3207_v36, %s5994_s10  ;;  %3729 = vrot.lane.b32.xlu1 %v3712_v59, %s5994_s10 }
0x1055   : > { %v3190_v9 = vpop.permute.xlu1 %3189  ;;  %v3218_v10 = vpop.permute.xlu0 %3217 }
0x1056   : > { %v3222_v30 = vsel %vm1622_vm7, %v3218_v10, %v3220_v1  ;;  %v6950_v1 = vld [vmem:[%s6066_s19] sm:$0xff] }
0x1057   : > { %5537 = vmatpush3.msra.mxu1 %v3222_v30 }
0x1058   : > { %5538 = vmatprep.subr.mxu1 %v6666_v7 }
0x1059   : > { %v3188_v32 = vpop.permute.xlu0 %3187  ;;  %5539 = vmatpush3.msra.mxu1 %v3221_v31  ;;  %v3164_v12 = vpop.permute.xlu1 %3163 }
0x105a   : > { %v3192_v11 = vsel %vm1603_vm8, %v3188_v32, %v3190_v9  ;;  %5540 = vmatprep.subr.mxu1 %v6666_v7 }
0x105b   : > { %3196 = vst [vmem:[#allocation3 + $0x38] sm:$0xff] %v3192_v11  ;;  %5541 = vmatpush3.msra.mxu1 %v6772_v33 }
0x105c   : > { %5542 = vmatprep.subr.mxu1 %v6666_v7 }
0x105d   : > { %v3184_v13 = vpop.permute.xlu0 %3183  ;;  %5543 = vmatpush3.msra.mxu1 %v6504_v61  ;;  %v3160_v15 = vpop.permute.xlu1 %3159 }
0x105e   : > { %5544 = vmatprep.subr.mxu1 %v6666_v7  ;;  %v3191_v14 = vsel %vm1603_vm8, %v3184_v13, %v3186_v8 }
0x105f   : > { %5545 = vmatpush3.msra.mxu1 %v3192_v11 }
0x1060   : > { %5546 = vmatprep.subr.mxu1 %v6666_v7 }
0x1061   : > { %v3162_v16 = vpop.permute.xlu0 %3161  ;;  %5547 = vmatpush3.msra.mxu1 %v3191_v14  ;;  %v3134_v22 = vpop.permute.xlu1 %3133 }
0x1062   : > { %v3166_v17 = vsel %vm1622_vm7, %v3162_v16, %v3164_v12  ;;  %5548 = vmatprep.subr.mxu1 %v6666_v7 }
0x1063   : > { %5549 = vmatpush3.msra.mxu1 %v3166_v17 }
0x1064   : > { %5550 = vmatprep.subr.mxu1 %v6666_v7 }
0x1065   : > { %v3158_v20 = vpop.permute.xlu0 %3157  ;;  %v3130_v25 = vpop.permute.xlu1 %3129 }
0x1066   : > { %v3165_v61 = vsel %vm1622_vm7, %v3158_v20, %v3160_v15  ;;  %v4934_v15 = vld [vmem:[%s7279_s16] ss:$0 sm:$0xff]  ;;  %s7288_s16 = sld [smem:[#allocation4_spill]] }
0x1067   : > { %3169 = vst [vmem:[#allocation3 + $0x20] sm:$0xff] %v3165_v61  ;;  %5551 = vmatpush3.msra.mxu1 %v3165_v61  ;;  %v4935_v20 = vld [vmem:[%s7280_s18] ss:$0 sm:$0xff]  ;;  %s4909_s18 = sshll.u32 %s7292_s1, 3 }
0x1068   : > { %3700 = vst [vmem:[#allocation3 + $0x24] sm:$0xf] %v3697_v21  ;;  %5552 = vmatprep.subr.mxu1 %v6666_v7  ;;  %3699 = vst [vmem:[#allocation3 + $0x1c] sm:$0xff] %v6666_v7 }
0x1069   : > { %v3132_v23 = vpop.permute.xlu0 %3131  ;;  %5553 = vmatpush3.msra.mxu1 %v6666_v7 }
0x106a   : > { %5554 = vmatprep.subr.mxu1 %v6666_v7  ;;  %v3136_v24 = vsel %vm1603_vm8, %v3132_v23, %v3134_v22 }
0x106b   : > { %5555 = vmatpush3.msra.mxu1 %v6666_v7 }
0x106c   : > { %5556 = vmatprep.subr.mxu1 %v6666_v7 }
0x106d   : > { %v3128_v27 = vpop.permute.xlu0 %3127  ;;  %5557 = vmatpush3.msra.mxu1 %v3136_v24 }
0x106e   : > { %v3135_v29 = vsel %vm1603_vm8, %v3128_v27, %v3130_v25  ;;  %5558 = vmatprep.subr.mxu1 %v6666_v7 }
0x106f   : > { %5559 = vmatpush3.msra.mxu1 %v3135_v29 }
0x1070   : > { %5561 = vmatmul.mubr.msk.f32.vlgmr.msra.gmra.mxu1 %vm3246_vm12, %v3239_v28  ;;  %5598 = vmatprep.subr.mxu1 %v6666_v7 }
0x1071   : > { %5600 = vmatprep.mubr.msk.f32.mxu1 %vm5991_vm2, %v6666_v7  ;;  %5599 = vmatpush3.msra.mxu1 %v6950_v1 }
0x1072   : > { %v6928_v35 = vpop.permute.xlu1 %3650  ;;  %5603 = vmatprep.subr.mxu1 %v6666_v7 }
0x1076   : > { %v3810_v18 = vpop.permute.xlu1 %3809 }
0x107a   : > { %v6930_v53 = vpop.permute.xlu1 %3813  ;;  %v3244_v19 = vpop.permute.xlu0 %3243 }
0x107e   : > { %v3806_v36 = vpop.permute.xlu1 %3805  ;;  %v3804_v50 = vpop.permute.xlu0 %3803 }
0x107f   : > { %v3815_v39 = vsel %vm1622_vm7, %v3804_v50, %v3806_v36  ;;  %v3661_v36 = vld [vmem:[#allocation2 + $0x58] sm:$0xf] }
0x1080   : > { %3821 = vst [vmem:[#allocation3 + $0x64] sm:$0xff] %v3815_v39  ;;  %v3667_v50 = vmul.f32 %v3661_v36, %v6299_v26  ;;  %v3660_v39 = vld [vmem:[#allocation2 + $0x50] sm:$0xf] }
0x1082   : > { %v3765_v63 = vpop.permute.xlu1 %3764  ;;  %v3763_v40 = vpop.permute.xlu0 %3762 }
0x1083   : > { %v3771_v41 = vsel %vm1603_vm8, %v3763_v40, %v3765_v63  ;;  %v3666_v63 = vmul.f32 %v3660_v39, %v6299_v26  ;;  %v3939_v40 = vld [vmem:[%s7281_s22] sm:$0xf]  ;;  %s1334_s22 = scalar_lea.vmem %s6236_s24, %s4909_s18 }
0x1084   : > { %3777 = vst [vmem:[#allocation3 + $0x44] sm:$0xff] %v3771_v41  ;;  %v4275_v41 = vld [vmem:[#allocation2 + $0x70] sm:$0xf0] }
0x1086   : > { %v6934_v42 = vpop.permute.xlu0 %3766 }
0x108a   : > { %v3808_v43 = vpop.permute.xlu0 %3807 }
0x108b   : > { %v3816_v54 = vsel %vm1622_vm7, %v3808_v43, %v3810_v18  ;;  %v4277_v43 = vmul.f32 %v4275_v41, %v6309_v34 }
0x108c   : > { %3822 = vst [vmem:[#allocation3 + $0x6c] sm:$0xff] %v3816_v54  ;;  %v3761_v54 = vpop.permute.xlu1 %3760 }
0x1130   : > { %v3316_v2 = vpop.f32.mrf.mxu1 }
0x1131   : > { %v3317_v45 = vadd.f32 %v3316_v2, %v3244_v19  ;;  %v3705_v19 = vld [vmem:[#allocation2 + $0x58] sm:$0xf]  ;;  %v3730_v2 = vpop.permute.xlu1 %3729 }
0x1132   : > { %v5562_v59 = vpop.f32.mrf.mxu1 }
0x1133   : > { %5596 = vmatmul.mubr.f32.vlgmr.msra.gmra.mxu0 %v3317_v45 }
0x1134   : > { %5640 = vmatprep.mubr.msk.f32.mxu0 %vm5991_vm2, %v6666_v7  ;;  %5639 = vmatpush3.msra.mxu0 %v6950_v1 }
0x1135   : > { %5643 = vmatprep.subr.mxu0 %v6666_v7 }
0x11f3   : > { %v3406_v48 = vpop.f32.mrf.mxu0 }
0x11f4   : > { %v3410_v6 = vmul.f32 0.0625, %v3406_v48 }
0x11f5   : > { %v5597_v8 = vpop.f32.mrf.mxu0 }
0x11f6   : > { %5601 = vmatmul.mubr.msk.f32.vlgmr.msra.gmra.mxu1 %vm1801_vm11, %v3410_v6 }
0x11f7   : > { %5604 = vmatpush3.msra.mxu1 %v6828_v46  ;;  %5635 = vmatprep.mubr.msk.f32.mxu1 %vm5991_vm2, %v6666_v7 }
0x11f8   : > { %5605 = vmatprep.subr.mxu1 %v6666_v7 }
0x11f9   : > { %5606 = vmatpush3.msra.mxu1 %v6833_v47 }
0x11fa   : > { %5607 = vmatprep.subr.mxu1 %v6666_v7 }
0x11fb   : > { %5608 = vmatpush3.msra.mxu1 %v6839_v62 }
0x11fc   : > { %5609 = vmatprep.subr.mxu1 %v6666_v7 }
0x11fd   : > { %5610 = vmatpush3.msra.mxu1 %v6844_v4 }
0x11fe   : > { %5611 = vmatprep.subr.mxu1 %v6666_v7 }
0x11ff   : > { %5612 = vmatpush3.msra.mxu1 %v6849_v49 }
0x1200   : > { %5613 = vmatprep.subr.mxu1 %v6666_v7 }
0x1201   : > { %5614 = vmatpush3.msra.mxu1 %v6854_v51 }
0x1202   : > { %5615 = vmatprep.subr.mxu1 %v6666_v7 }
0x1203   : > { %5616 = vmatpush3.msra.mxu1 %v6859_v5 }
0x1204   : > { %5617 = vmatprep.subr.mxu1 %v6666_v7 }
0x1205   : > { %5618 = vmatpush3.msra.mxu1 %v6864_v55 }
0x1206   : > { %5619 = vmatprep.subr.mxu1 %v6666_v7 }
0x1207   : > { %5620 = vmatpush3.msra.mxu1 %v6869_v56 }
0x1208   : > { %5621 = vmatprep.subr.mxu1 %v6666_v7 }
0x1209   : > { %5622 = vmatpush3.msra.mxu1 %v6874_v57 }
0x120a   : > { %5623 = vmatprep.subr.mxu1 %v6666_v7 }
0x120b   : > { %5624 = vmatpush3.msra.mxu1 %v6879_v58 }
0x120c   : > { %5625 = vmatprep.subr.mxu1 %v6666_v7 }
0x120d   : > { %5626 = vmatpush3.msra.mxu1 %v6884_v60 }
0x120e   : > { %5627 = vmatprep.subr.mxu1 %v6666_v7 }
0x120f   : > { %5628 = vmatpush3.msra.mxu1 %v6889_v0 }
0x1210   : > { %5629 = vmatprep.subr.mxu1 %v6666_v7 }
0x1211   : > { %5630 = vmatpush3.msra.mxu1 %v6894_v3 }
0x1212   : > { %5631 = vmatprep.subr.mxu1 %v6666_v7 }
0x1213   : > { %5632 = vmatpush3.msra.mxu1 %v6938_v37 }
0x1214   : > { %5633 = vmatprep.subr.mxu1 %v6666_v7 }
0x1215   : > { %5634 = vmatpush3.msra.mxu1 %v6942_v44 }
0x1216   : > { %5676 = vmatprep.subr.mxu1 %v6666_v7 }
0x12b6   : > { %v3480_v9 = vpop.f32.mrf.mxu1 }
0x12b7   : > { %v3484_v10 = vsub.f32 %v3317_v45, %v3480_v9 }
0x12b8   : > { %v5602_v30 = vpop.f32.mrf.mxu1 }
0x12b9   : > { %v3485_v31 = vmul.f32 %v3484_v10, %v3484_v10 }
0x12bb   : > { %5636 = vmatmul.mubr.f32.vlgmr.msra.gmra.mxu1 %v3485_v31 }
0x12bc   : > { %5677 = vmatpush3.msra.mxu1 %v6828_v46  ;;  %5708 = vmatprep.mubr.msk.f32.mxu1 %vm5991_vm2, %v6666_v7 }
0x12bd   : > { %5678 = vmatprep.subr.mxu1 %v6666_v7 }
0x12be   : > { %5679 = vmatpush3.msra.mxu1 %v6833_v47 }
0x12bf   : > { %5680 = vmatprep.subr.mxu1 %v6666_v7 }
0x12c0   : > { %5681 = vmatpush3.msra.mxu1 %v6839_v62 }
0x12c1   : > { %5682 = vmatprep.subr.mxu1 %v6666_v7 }
0x12c2   : > { %5683 = vmatpush3.msra.mxu1 %v6844_v4 }
0x12c3   : > { %5684 = vmatprep.subr.mxu1 %v6666_v7 }
0x12c4   : > { %5685 = vmatpush3.msra.mxu1 %v6849_v49 }
0x12c5   : > { %5686 = vmatprep.subr.mxu1 %v6666_v7 }
0x12c6   : > { %5687 = vmatpush3.msra.mxu1 %v6854_v51 }
0x12c7   : > { %5688 = vmatprep.subr.mxu1 %v6666_v7 }
0x12c8   : > { %5689 = vmatpush3.msra.mxu1 %v6859_v5 }
0x12c9   : > { %5690 = vmatprep.subr.mxu1 %v6666_v7 }
0x12ca   : > { %5691 = vmatpush3.msra.mxu1 %v6864_v55 }
0x12cb   : > { %5692 = vmatprep.subr.mxu1 %v6666_v7 }
0x12cc   : > { %5693 = vmatpush3.msra.mxu1 %v6869_v56 }
0x12cd   : > { %5694 = vmatprep.subr.mxu1 %v6666_v7 }
0x12ce   : > { %5695 = vmatpush3.msra.mxu1 %v6874_v57 }
0x12cf   : > { %5696 = vmatprep.subr.mxu1 %v6666_v7 }
0x12d0   : > { %5697 = vmatpush3.msra.mxu1 %v6879_v58 }
0x12d1   : > { %5698 = vmatprep.subr.mxu1 %v6666_v7 }
0x12d2   : > { %5699 = vmatpush3.msra.mxu1 %v6884_v60 }
0x12d3   : > { %5700 = vmatprep.subr.mxu1 %v6666_v7 }
0x12d4   : > { %5701 = vmatpush3.msra.mxu1 %v6889_v0 }
0x12d5   : > { %5702 = vmatprep.subr.mxu1 %v6666_v7 }
0x12d6   : > { %5703 = vmatpush3.msra.mxu1 %v6894_v3 }
0x12d7   : > { %5704 = vmatprep.subr.mxu1 %v6666_v7 }
0x12d8   : > { %5705 = vmatpush3.msra.mxu1 %v6938_v37 }
0x12d9   : > { %5706 = vmatprep.subr.mxu1 %v6666_v7 }
0x12da   : > { %5707 = vmatpush3.msra.mxu1 %v6942_v44 }
0x12db   : > { %5751 = vmatprep.subr.mxu1 %v6666_v7 }
0x137b   : > { %v3552_v32 = vpop.f32.mrf.mxu1 }
0x137c   : > { %v3556_v11 = vmul.f32 0.0625, %v3552_v32 }
0x137d   : > { %v5637_v12 = vpop.f32.mrf.mxu1 }
0x137e   : > { %v3557_v13 = vadd.f32 1e-05, %v3556_v11 }
0x1380   : > { %5929 = vrsqrt.f32 %v3557_v13 }
0x138d   : > { %v5930_v14 = vpop.eup %5929 }
0x138e   : > { %5641 = vmatmul.mubr.msk.f32.vlgmr.msra.gmra.mxu0 %vm1801_vm11, %v5930_v14 }
0x138f   : > { %5673 = vmatprep.mubr.msk.f32.mxu0 %vm5991_vm2, %v6666_v7 }
0x144e   : > { %v3628_v16 = vpop.f32.mrf.mxu0 }
0x144f   : > { %v3632_v17 = vmul.f32 %v3628_v16, %v3484_v10  ;;  %v5936_v16 = vld [vmem:[#allocation3 + $0x50] sm:$0xff] }
0x1450   : > { %v5642_v21 = vpop.f32.mrf.mxu0 }
0x1451   : > { %v3639_v61 = vmul.f32 %v4934_v15, %v3632_v17 }
0x1453   : > { %v3646_v22 = vadd.f32 %v4935_v20, %v3639_v61 }
0x1455   : > { %vm3647_vm13 = vcmp.ge.f32.partialorder %v3646_v22, 0.0  ;;  %v3653_v23 = vmul.f32 %v6928_v35, %v3646_v22  ;;  %v3711_v35 = vmul.f32 %v3705_v19, %v6309_v34 }
0x1457   : > { %v3654_v24 = vsel %vm3647_vm13, %v3646_v22, %v3653_v23 }
0x1458   : > { %3655 = vst [vmem:[#allocation2 + $0x68] sm:$0xf] %v3654_v24 }
0x145f   : > { %v3789_v25 = vld [vmem:[#allocation2 + $0x68] sm:$0xf] }
0x1460   : > { %v3745_v27 = vld [vmem:[#allocation2 + $0x68] sm:$0xf]  ;;  %v3795_v29 = vmul.f32 %v3789_v25, %v6309_v34  ;;  %v7081_v25 = vld [vmem:[#allocation2] sm:$0xff] }
0x1461   : > { %v3781_v28 = vld [vmem:[#allocation2 + $0x68] sm:$0xf]  ;;  %v3751_v18 = vmul.f32 %v3745_v27, %v6299_v26  ;;  %v3828_v27 = vld [vmem:[#allocation3 + $0x20] sm:$0xff] }
0x1462   : > { %3784 = vst [vmem:[#allocation3 + $0x60] sm:$0xf] %v3781_v28  ;;  %3811 = vrot.lane.b32.xlu0 %v3795_v29, %s5994_s10 }
0x1463   : > { %3768 = vrot.lane.b32.xlu1 %v3751_v18, %s5996_s15  ;;  %v3827_v18 = vld [vmem:[#allocation3 + $0x18] sm:$0xff] }
0x1466   : > { %3758 = vrot.lane.b32.xlu0 %v6783_v38, %s5996_s15 }
0x1467   : > { %3725 = vrot.lane.b32.xlu1 %v6794_v52, %s5994_s10 }
0x1469   : > { %v3836_v12 = vld [vmem:[#allocation3 + $0x60] sm:$0xff] }
0x146a   : > { %3727 = vrot.lane.b32.xlu0 %v3711_v35, %s5994_s10  ;;  %v3839_v35 = vld [vmem:[%s7283_s26] sm:$0xf] }
0x146b   : > { %3721 = vrot.lane.b32.xlu1 %v6794_v52, %s5994_s10 }
0x146e   : > { %3723 = vrot.lane.b32.xlu0 %v6794_v52, %s5994_s10 }
0x146f   : > { %3684 = vrot.lane.b32.xlu1 %v3667_v50, %s5996_s15 }
0x1472   : > { %3719 = vrot.lane.b32.xlu0 %v6794_v52, %s5994_s10  ;;  %v3840_v52 = vld [vmem:[%s7282_s23] sm:$0xf] }
0x1473   : > { %3680 = vrot.lane.b32.xlu1 %v6783_v38, %s5996_s15 }
0x1476   : > { %3682 = vrot.lane.b32.xlu0 %v3666_v63, %s5996_s15 }
0x1477   : > { %3676 = vrot.lane.b32.xlu1 %v6783_v38, %s5996_s15 }
0x147a   : > { %3678 = vrot.lane.b32.xlu0 %v6783_v38, %s5996_s15 }
0x147b   : > { %4250 = vperm.xlu1 %5917, %v3939_v40  }
0x147e   : > { %3674 = vrot.lane.b32.xlu0 %v6783_v38, %s5996_s15 }
0x147f   : > { %4282 = vrot.lane.b32.xlu1 %v4277_v43, %s5994_s10 }
0x1482   : > { %3843 = vperm.xlu0 %5916, %v3840_v52  }
0x14d4   : > { %v3812_v59 = vpop.permute.xlu0 %3811 }
0x14d5   : > { %v3769_v45 = vpop.permute.xlu1 %3768  ;;  %v3817_v6 = vsel %vm1622_vm7, %v3812_v59, %v6930_v53 }
0x14d6   : > { %v3772_v48 = vsel %vm1603_vm8, %v6934_v42, %v3769_v45  ;;  %3823 = vst [vmem:[#allocation3 + $0x74] sm:$0xf] %v3817_v6  ;;  %v3837_v42 = vld [vmem:[#allocation3 + $0x68] sm:$0xff] }
0x14d7   : > { %3778 = vst [vmem:[#allocation3 + $0x4c] sm:$0xf] %v3772_v48 }
0x14d8   : > { %v3759_v9 = vpop.permute.xlu0 %3758 }
0x14d9   : > { %v3726_v8 = vpop.permute.xlu1 %3725  ;;  %v3770_v38 = vsel %vm1603_vm8, %v3759_v9, %v3761_v54  ;;  %v4259_v9 = vld [vmem:[#allocation2 + $0x60] sm:$0xf0] }
0x14da   : > { %3776 = vst [vmem:[#allocation3 + $0x3c] sm:$0xff] %v3770_v38  ;;  %v4470_v38 = vld [vmem:[%s6231_s30] sm:$0xff] }
0x14dc   : > { %v3728_v10 = vpop.permute.xlu0 %3727 }
0x14dd   : > { %v3733_v30 = vsel %vm1622_vm7, %v3728_v10, %v3730_v2  ;;  %v3838_v31 = vld [vmem:[#allocation3 + $0x70] sm:$0xff]  ;;  %v3722_v32 = vpop.permute.xlu1 %3721  ;;  %v4261_v10 = vmul.f32 %v4259_v9, %v6299_v26 }
0x14de   : > { %3739 = vst [vmem:[#allocation3 + $0x38] sm:$0xf] %v3733_v30  ;;  %5644 = vmatpush3.msra.mxu0 %v3838_v31  ;;  %v3833_v17 = vld [vmem:[#allocation3 + $0x48] sm:$0xff] }
0x14df   : > { %5645 = vmatprep.subr.mxu0 %v6666_v7  ;;  %v4383_v30 = vld [vmem:[%s7286_s7] sm:$0xff] }
0x14e0   : > { %5646 = vmatpush3.msra.mxu0 %v3837_v42  ;;  %v3724_v11 = vpop.permute.xlu0 %3723 }
0x14e1   : > { %v3732_v53 = vsel %vm1622_vm7, %v3724_v11, %v3726_v8  ;;  %5647 = vmatprep.subr.mxu0 %v6666_v7  ;;  %v3685_v13 = vpop.permute.xlu1 %3684  ;;  %v3832_v61 = vld [vmem:[#allocation3 + $0x40] sm:$0xff] }
0x14e2   : > { %5648 = vmatpush3.msra.mxu0 %v3836_v12  ;;  %v4289_v12 = vld [vmem:[%s7287_s11] sm:$0xff] }
0x14e3   : > { %5649 = vmatprep.subr.mxu0 %v6666_v7 }
0x14e4   : > { %5650 = vmatpush3.msra.mxu0 %v6772_v33  ;;  %v3720_v14 = vpop.permute.xlu0 %3719 }
0x14e5   : > { %v3731_v15 = vsel %vm1622_vm7, %v3720_v14, %v3722_v32  ;;  %5651 = vmatprep.subr.mxu0 %v6666_v7  ;;  %v3681_v22 = vpop.permute.xlu1 %3680  ;;  %v3831_v33 = vld [vmem:[#allocation3 + $0x38] sm:$0xff]  ;;  %v4382_v14 = vld [vmem:[%s7288_s16 + $0x78] sm:$0xff] }
0x14e6   : > { %3737 = vst [vmem:[#allocation3 + $0x28] sm:$0xff] %v3731_v15  ;;  %5652 = vmatpush3.msra.mxu0 %v5936_v16  ;;  %v4380_v16 = vld [vmem:[%s7288_s16 + $0x68] sm:$0xff] }
0x14e7   : > { %5653 = vmatprep.subr.mxu0 %v6666_v7 }
0x14e8   : > { %5654 = vmatpush3.msra.mxu0 %v3833_v17  ;;  %v3683_v20 = vpop.permute.xlu0 %3682  ;;  %v4379_v17 = vld [vmem:[%s7288_s16 + $0x60] sm:$0xff] }
0x14e9   : > { %v3688_v21 = vsel %vm1603_vm8, %v3683_v20, %v3685_v13  ;;  %5655 = vmatprep.subr.mxu0 %v6666_v7  ;;  %v3677_v28 = vpop.permute.xlu1 %3676  ;;  %v4378_v20 = vld [vmem:[%s7288_s16 + $0x58] sm:$0xff] }
0x14ea   : > { %3694 = vst [vmem:[#allocation3 + $0x10] sm:$0xf] %v3688_v21  ;;  %5656 = vmatpush3.msra.mxu0 %v3832_v61  ;;  %v4377_v21 = vld [vmem:[%s7288_s16 + $0x50] sm:$0xff]  ;;  %v4376_v61 = vld [vmem:[%s7288_s16 + $0x48] sm:$0xff] }
0x14eb   : > { %5657 = vmatprep.subr.mxu0 %v6666_v7 }
0x14ec   : > { %5658 = vmatpush3.msra.mxu0 %v3831_v33  ;;  %v3679_v23 = vpop.permute.xlu0 %3678  ;;  %v4374_v33 = vld [vmem:[%s7288_s16 + $0x38] sm:$0xff] }
0x14ed   : > { %v3687_v24 = vsel %vm1603_vm8, %v3679_v23, %v3681_v22  ;;  %5659 = vmatprep.subr.mxu0 %v7081_v25  ;;  %v4375_v22 = vld [vmem:[%s7288_s16 + $0x40] sm:$0xff]  ;;  %v4373_v23 = vld [vmem:[%s7288_s16 + $0x30] sm:$0xff] }
0x14ee   : > { %3693 = vst [vmem:[#allocation3 + $0x8] sm:$0xff] %v3687_v24  ;;  %5660 = vmatpush3.msra.mxu0 %v3732_v53 }
0x14ef   : > { %5661 = vmatprep.subr.mxu0 %v7081_v25 }
0x14f0   : > { %5662 = vmatpush3.msra.mxu0 %v3731_v15  ;;  %v3675_v29 = vpop.permute.xlu0 %3674  ;;  %v4381_v15 = vld [vmem:[%s7288_s16 + $0x70] sm:$0xff] }
0x14f1   : > { %v3686_v7 = vsel %vm1603_vm8, %v3675_v29, %v3677_v28  ;;  %5663 = vmatprep.subr.mxu0 %v7081_v25  ;;  %v3826_v19 = vld [vmem:[#allocation3 + $0x10] sm:$0xff]  ;;  %v4370_v28 = vld [vmem:[%s7288_s16 + $0x18] sm:$0xff]  ;;  %v4369_v29 = vld [vmem:[%s7288_s16 + $0x10] sm:$0xff] }
0x14f2   : > { %3692 = vst [vmem:[#allocation3] sm:$0xff] %v3686_v7  ;;  %5664 = vmatpush3.msra.mxu0 %v3828_v27  ;;  %v4371_v27 = vld [vmem:[%s7288_s16 + $0x20] sm:$0xff] }
0x14f3   : > { %5665 = vmatprep.subr.mxu0 %v7081_v25 }
0x14f4   : > { %5666 = vmatpush3.msra.mxu0 %v3827_v18  ;;  %v4367_v18 = vld [vmem:[%s7288_s16] sm:$0xff] }
0x14f5   : > { %5667 = vmatprep.subr.mxu0 %v7081_v25 }
0x14f6   : > { %5668 = vmatpush3.msra.mxu0 %v3826_v19 }
0x14f7   : > { %5669 = vmatprep.subr.mxu0 %v7081_v25 }
0x14f8   : > { %5670 = vmatpush3.msra.mxu0 %v3687_v24  ;;  %v4372_v24 = vld [vmem:[%s7288_s16 + $0x28] sm:$0xff] }
0x14f9   : > { %5671 = vmatprep.subr.mxu0 %v7081_v25 }
0x14fa   : > { %5672 = vmatpush3.msra.mxu0 %v3686_v7  ;;  %v4368_v7 = vld [vmem:[%s7288_s16 + $0x8] sm:$0xff] }
0x14fb   : > { %5674 = vmatmul.mubr.msk.f32.vlgmr.msra.gmra.mxu0 %vm3846_vm14, %v3839_v35  ;;  %5711 = vmatprep.subr.mxu0 %v7081_v25 }
0x14fc   : > { %5712 = vmatpush3.msra.mxu0 %v6950_v1  ;;  %5713 = vmatprep.mubr.msk.f32.mxu0 %vm5991_vm2, %v7081_v25 }
0x14fd   : > { %5716 = vmatprep.subr.mxu0 %v7081_v25  ;;  %v3844_v36 = vpop.permute.xlu0 %3843 }
0x15bb   : > { %v3916_v50 = vpop.f32.mrf.mxu0 }
0x15bc   : > { %v3917_v39 = vadd.f32 %v3916_v50, %v3844_v36 }
0x15bd   : > { %v5675_v63 = vpop.f32.mrf.mxu0 }
0x15be   : > { %5709 = vmatmul.mubr.f32.vlgmr.msra.gmra.mxu1 %v3917_v39 }
0x15bf   : > { %5752 = vmatpush3.msra.mxu1 %v6950_v1  ;;  %5753 = vmatprep.mubr.msk.f32.mxu1 %vm5991_vm2, %v7081_v25  ;;  %v4251_v1 = vpop.permute.xlu1 %4250 }
0x15c0   : > { %5756 = vmatprep.subr.mxu1 %v7081_v25 }
0x15c3   : > { %v4283_v31 = vpop.permute.xlu1 %4282 }
0x167e   : > { %v4006_v40 = vpop.f32.mrf.mxu1 }
0x167f   : > { %v4010_v41 = vmul.f32 0.0625, %v4006_v40 }
0x1680   : > { %v5710_v43 = vpop.f32.mrf.mxu1 }
0x1681   : > { %5714 = vmatmul.mubr.msk.f32.vlgmr.msra.gmra.mxu0 %vm1801_vm11, %v4010_v41 }
0x1682   : > { %5717 = vmatpush3.msra.mxu0 %v6828_v46  ;;  %5748 = vmatprep.mubr.msk.f32.mxu0 %vm5991_vm2, %v7081_v25 }
0x1683   : > { %5718 = vmatprep.subr.mxu0 %v7081_v25 }
0x1684   : > { %5719 = vmatpush3.msra.mxu0 %v6833_v47 }
0x1685   : > { %5720 = vmatprep.subr.mxu0 %v7081_v25 }
0x1686   : > { %5721 = vmatpush3.msra.mxu0 %v6839_v62 }
0x1687   : > { %5722 = vmatprep.subr.mxu0 %v7081_v25 }
0x1688   : > { %5723 = vmatpush3.msra.mxu0 %v6844_v4 }
0x1689   : > { %5724 = vmatprep.subr.mxu0 %v7081_v25 }
0x168a   : > { %5725 = vmatpush3.msra.mxu0 %v6849_v49 }
0x168b   : > { %5726 = vmatprep.subr.mxu0 %v7081_v25 }
0x168c   : > { %5727 = vmatpush3.msra.mxu0 %v6854_v51 }
0x168d   : > { %5728 = vmatprep.subr.mxu0 %v7081_v25 }
0x168e   : > { %5729 = vmatpush3.msra.mxu0 %v6859_v5 }
0x168f   : > { %5730 = vmatprep.subr.mxu0 %v7081_v25 }
0x1690   : > { %5731 = vmatpush3.msra.mxu0 %v6864_v55 }
0x1691   : > { %5732 = vmatprep.subr.mxu0 %v7081_v25 }
0x1692   : > { %5733 = vmatpush3.msra.mxu0 %v6869_v56 }
0x1693   : > { %5734 = vmatprep.subr.mxu0 %v7081_v25 }
0x1694   : > { %5735 = vmatpush3.msra.mxu0 %v6874_v57  ;;  %v4939_v57 = vld [vmem:[%s7284_s0] ss:$0 sm:$0xff] }
0x1695   : > { %5736 = vmatprep.subr.mxu0 %v7081_v25 }
0x1696   : > { %5737 = vmatpush3.msra.mxu0 %v6879_v58 }
0x1697   : > { %5738 = vmatprep.subr.mxu0 %v7081_v25 }
0x1698   : > { %5739 = vmatpush3.msra.mxu0 %v6884_v60 }
0x1699   : > { %5740 = vmatprep.subr.mxu0 %v7081_v25 }
0x169a   : > { %5741 = vmatpush3.msra.mxu0 %v6889_v0  ;;  %v4940_v0 = vld [vmem:[%s7285_s2] ss:$0 sm:$0xff] }
0x169b   : > { %5742 = vmatprep.subr.mxu0 %v7081_v25 }
0x169c   : > { %5743 = vmatpush3.msra.mxu0 %v6894_v3 }
0x169d   : > { %5744 = vmatprep.subr.mxu0 %v7081_v25 }
0x169e   : > { %5745 = vmatpush3.msra.mxu0 %v6938_v37 }
0x169f   : > { %5746 = vmatprep.subr.mxu0 %v7081_v25 }
0x16a0   : > { %5747 = vmatpush3.msra.mxu0 %v6942_v44 }
0x16a1   : > { %5798 = vmatprep.subr.mxu0 %v7081_v25 }
0x1741   : > { %v4080_v46 = vpop.f32.mrf.mxu0 }
0x1742   : > { %v4084_v47 = vsub.f32 %v3917_v39, %v4080_v46 }
0x1743   : > { %v5715_v62 = vpop.f32.mrf.mxu0 }
0x1744   : > { %v4085_v4 = vmul.f32 %v4084_v47, %v4084_v47 }
0x1746   : > { %5749 = vmatmul.mubr.f32.vlgmr.msra.gmra.mxu0 %v4085_v4 }
0x1747   : > { %5814 = vmatprep.mubr.msk.f32.mxu0 %vm5991_vm2, %v7081_v25 }
0x1806   : > { %v4152_v49 = vpop.f32.mrf.mxu0 }
0x1807   : > { %v4156_v51 = vmul.f32 0.0625, %v4152_v49 }
0x1808   : > { %v5750_v5 = vpop.f32.mrf.mxu0 }
0x1809   : > { %v4157_v55 = vadd.f32 1e-05, %v4156_v51 }
0x180b   : > { %5931 = vrsqrt.f32 %v4157_v55 }
0x1818   : > { %v5932_v56 = vpop.eup %5931 }
0x1819   : > { %5754 = vmatmul.mubr.msk.f32.vlgmr.msra.gmra.mxu1 %vm1801_vm11, %v5932_v56 }
0x181a   : > { %5760 = vmatprep.mubr.msk.f32.mxu1 %vm5991_vm2, %v7081_v25 }
0x18d9   : > { %v4228_v58 = vpop.f32.mrf.mxu1 }
0x18da   : > { %v4232_v60 = vmul.f32 %v4228_v58, %v4084_v47 }
0x18db   : > { %v5755_v3 = vpop.f32.mrf.mxu1 }
0x18dc   : > { %v4239_v37 = vmul.f32 %v4939_v57, %v4232_v60 }
0x18de   : > { %v4246_v44 = vadd.f32 %v4940_v0, %v4239_v37 }
0x18e0   : > { %vm4247_vm15 = vcmp.ge.f32.partialorder %v4246_v44, 0.0  ;;  %v4253_v52 = vmul.f32 %v4251_v1, %v4246_v44 }
0x18e2   : > { %v4254_v54 = vsel %vm4247_vm15, %v4246_v44, %v4253_v52 }
0x18e3   : > { %v4256_v2 = vrot.slane %v4254_v54, 4  ;;  %v4947_v54 = vld [vmem:[%s6221_s4] ss:$0 sm:$0xff] }
0x18e5   : > { %4258 = vst [vmem:[#allocation2 + $0x68] sm:$0xf0] %v4256_v2 }
0x18ec   : > { %v4274_v45 = vld [vmem:[#allocation2 + $0x68] sm:$0xf0] }
0x18ed   : > { %v4260_v59 = vld [vmem:[#allocation2 + $0x68] sm:$0xf0]  ;;  %v4276_v6 = vmul.f32 %v4274_v45, %v6309_v34  ;;  %v4948_v45 = vld [vmem:[%s6226_s27] ss:$0 sm:$0xff] }
0x18ee   : > { %v4272_v48 = vld [vmem:[#allocation2 + $0x68] sm:$0xf0]  ;;  %v4262_v8 = vmul.f32 %v4260_v59, %v6299_v26 }
0x18ef   : > { %4273 = vst [vmem:[#allocation3] sm:$0xf0] %v4272_v48  ;;  %4280 = vrot.lane.b32.xlu0 %v4276_v6, %s5994_s10  ;;  %s7289_s10 = sld [smem:[#allocation5_spill]] }
0x18f0   : > { %4267 = vrot.lane.b32.xlu1 %v4262_v8, %s5996_s15 }
0x18f3   : > { %4265 = vrot.lane.b32.xlu0 %v4261_v10, %s5996_s15  ;;  %s7290_s15 = sld [smem:[#allocation6_spill]] }
0x18f4   : > { %4787 = vperm.xlu1 %5917, %v4470_v38  }
0x18f5   : > { %v4466_v19 = vld [vmem:[%s7289_s10 + $0x38] sm:$0xff]  ;;  %v4465_v35 = vld [vmem:[%s7289_s10 + $0x30] sm:$0xff]  ;;  %v4464_v36 = vld [vmem:[%s7289_s10 + $0x28] sm:$0xff] }
0x18f6   : > { %5799 = vmatpush3.msra.mxu0 %v4466_v19  ;;  %v4463_v50 = vld [vmem:[%s7289_s10 + $0x20] sm:$0xff]  ;;  %v4462_v39 = vld [vmem:[%s7289_s10 + $0x18] sm:$0xff]  ;;  %v4461_v63 = vld [vmem:[%s7289_s10 + $0x10] sm:$0xff] }
0x18f7   : > { %4386 = vperm.xlu0 %5916, %v4383_v30   ;;  %5800 = vmatprep.subr.mxu0 %v7081_v25  ;;  %v4460_v43 = vld [vmem:[%s7289_s10 + $0x8] sm:$0xff]  ;;  %v4459_v46 = vld [vmem:[%s7289_s10] sm:$0xff] }
0x18f8   : > { %5801 = vmatpush3.msra.mxu0 %v4465_v35 }
0x18f9   : > { %5802 = vmatprep.subr.mxu0 %v7081_v25  ;;  %v4467_v51 = vld [vmem:[%s7290_s15] sm:$0xff] }
0x18fa   : > { %5803 = vmatpush3.msra.mxu0 %v4464_v36 }
0x18fb   : > { %5804 = vmatprep.subr.mxu0 %v7081_v25 }
0x18fc   : > { %5805 = vmatpush3.msra.mxu0 %v4463_v50 }
0x18fd   : > { %5806 = vmatprep.subr.mxu0 %v7081_v25 }
0x18fe   : > { %5807 = vmatpush3.msra.mxu0 %v4462_v39 }
0x18ff   : > { %5808 = vmatprep.subr.mxu0 %v7081_v25 }
0x1900   : > { %5809 = vmatpush3.msra.mxu0 %v4461_v63 }
0x1901   : > { %5810 = vmatprep.subr.mxu0 %v7081_v25 }
0x1902   : > { %5811 = vmatpush3.msra.mxu0 %v4460_v43 }
0x1903   : > { %5812 = vmatprep.subr.mxu0 %v7081_v25 }
0x1904   : > { %5813 = vmatpush3.msra.mxu0 %v4459_v46 }
0x1905   : > { %5817 = vmatprep.subr.mxu0 %v7081_v25 }
0x1961   : > { %v4281_v34 = vpop.permute.xlu0 %4280 }
0x1962   : > { %v4284_v32 = vsel %vm1622_vm7, %v4281_v34, %v4283_v31  ;;  %v4268_v42 = vpop.permute.xlu1 %4267 }
0x1963   : > { %4286 = vst [vmem:[#allocation3 + $0x4] sm:$0xf0] %v4284_v32 }
0x1965   : > { %v4266_v11 = vpop.permute.xlu0 %4265 }
0x1966   : > { %v4269_v53 = vsel %vm1603_vm8, %v4266_v11, %v4268_v42 }
0x1967   : > { %4271 = vst [vmem:[#allocation3 - $0x4] sm:$0xf0] %v4269_v53 }
0x196a   : > { %v4288_v26 = vld [vmem:[#allocation3 + $0x8] sm:$0xf] }
0x196b   : > { %5757 = vmatpush3.msk.msra.mxu1 %vm1363_vm1, %v4288_v26 }
0x196c   : > { %5758 = vmatprep.subr.mxu1 %v7081_v25 }
0x196e   : > { %v4287_v13 = vld [vmem:[#allocation3] sm:$0xff] }
0x196f   : > { %5759 = vmatpush3.msra.mxu1 %v4287_v13  ;;  %v4788_v8 = vpop.permute.xlu1 %4787 }
0x1970   : > { %5761 = vmatmul.mubr.msk.f32.vlgmr.msra.gmra.mxu1 %vm4290_vm0, %v4289_v12  ;;  %5763 = vmatprep.subr.mxu1 %v7081_v25 }
0x1971   : > { %5764 = vmatpush3.msra.mxu1 %v4382_v14  ;;  %5795 = vmatprep.mubr.msk.f32.mxu1 %vm5991_vm2, %v7081_v25 }
0x1972   : > { %5765 = vmatprep.subr.mxu1 %v7081_v25  ;;  %v4387_v47 = vpop.permute.xlu0 %4386 }
0x1973   : > { %5766 = vmatpush3.msra.mxu1 %v4381_v15 }
0x1974   : > { %5767 = vmatprep.subr.mxu1 %v7081_v25 }
0x1975   : > { %5768 = vmatpush3.msra.mxu1 %v4380_v16 }
0x1976   : > { %5769 = vmatprep.subr.mxu1 %v7081_v25 }
0x1977   : > { %5770 = vmatpush3.msra.mxu1 %v4379_v17 }
0x1978   : > { %5771 = vmatprep.subr.mxu1 %v7081_v25 }
0x1979   : > { %5772 = vmatpush3.msra.mxu1 %v4378_v20 }
0x197a   : > { %5773 = vmatprep.subr.mxu1 %v7081_v25 }
0x197b   : > { %5774 = vmatpush3.msra.mxu1 %v4377_v21 }
0x197c   : > { %5775 = vmatprep.subr.mxu1 %v7081_v25 }
0x197d   : > { %5776 = vmatpush3.msra.mxu1 %v4376_v61 }
0x197e   : > { %5777 = vmatprep.subr.mxu1 %v7081_v25 }
0x197f   : > { %5778 = vmatpush3.msra.mxu1 %v4375_v22 }
0x1980   : > { %5779 = vmatprep.subr.mxu1 %v7081_v25 }
0x1981   : > { %5780 = vmatpush3.msra.mxu1 %v4374_v33 }
0x1982   : > { %5781 = vmatprep.subr.mxu1 %v7081_v25 }
0x1983   : > { %5782 = vmatpush3.msra.mxu1 %v4373_v23 }
0x1984   : > { %5783 = vmatprep.subr.mxu1 %v7081_v25 }
0x1985   : > { %5784 = vmatpush3.msra.mxu1 %v4372_v24 }
0x1986   : > { %5785 = vmatprep.subr.mxu1 %v7081_v25 }
0x1987   : > { %5786 = vmatpush3.msra.mxu1 %v4371_v27 }
0x1988   : > { %5787 = vmatprep.subr.mxu1 %v7081_v25 }
0x1989   : > { %5788 = vmatpush3.msra.mxu1 %v4370_v28 }
0x198a   : > { %5789 = vmatprep.subr.mxu1 %v7081_v25 }
0x198b   : > { %5790 = vmatpush3.msra.mxu1 %v4369_v29 }
0x198c   : > { %5791 = vmatprep.subr.mxu1 %v7081_v25 }
0x198d   : > { %5792 = vmatpush3.msra.mxu1 %v4368_v7 }
0x198e   : > { %5793 = vmatprep.subr.mxu1 %v7081_v25 }
0x198f   : > { %5794 = vmatpush3.msra.mxu1 %v4367_v18 }
0x1990   : > { %5841 = vmatprep.subr.mxu1 %v7081_v25 }
0x1a30   : > { %v4363_v40 = vpop.f32.mrf.mxu1 }
0x1a31   : > { %5796 = vmatmul.mubr.f32.vlgmr.msra.gmra.mxu1 %v4363_v40 }
0x1a32   : > { %v5762_v41 = vpop.f32.mrf.mxu1  ;;  %5843 = vmatprep.mubr.msk.f32.mxu1 %vm5991_vm2, %v7081_v25  ;;  %5842 = vmatpush3.msra.mxu1 %v4467_v51 }
0x1af1   : > { %v4455_v62 = vpop.f32.mrf.mxu1 }
0x1af2   : > { %v4456_v4 = vadd.f32 %v4455_v62, %v4387_v47 }
0x1af3   : > { %v5797_v49 = vpop.f32.mrf.mxu1 }
0x1af4   : > { %5815 = vmatmul.mubr.msk.f32.vlgmr.msra.gmra.mxu0 %vm2593_vm5, %v4456_v4 }
0x1af5   : > { %5819 = vmatprep.mubr.msk.f32.mxu0 %vm5991_vm2, %v7081_v25  ;;  %5818 = vmatpush3.msra.mxu0 %v4467_v51 }
0x1af6   : > { %5822 = vmatprep.subr.mxu0 %v7081_v25 }
0x1bb4   : > { %v4540_v5 = vpop.f32.mrf.mxu0 }
0x1bb5   : > { %v4544_v55 = vmul.f32 0.125, %v4540_v5 }
0x1bb6   : > { %v5816_v56 = vpop.f32.mrf.mxu0 }
0x1bb7   : > { %5820 = vmatmul.mubr.msk.f32.vlgmr.msra.gmra.mxu0 %vm1801_vm11, %v4544_v55 }
0x1bb8   : > { %5823 = vmatpush3.msra.mxu0 %v4466_v19  ;;  %5838 = vmatprep.mubr.msk.f32.mxu0 %vm5991_vm2, %v7081_v25 }
0x1bb9   : > { %5824 = vmatprep.subr.mxu0 %v7081_v25 }
0x1bba   : > { %5825 = vmatpush3.msra.mxu0 %v4465_v35 }
0x1bbb   : > { %5826 = vmatprep.subr.mxu0 %v7081_v25 }
0x1bbc   : > { %5827 = vmatpush3.msra.mxu0 %v4464_v36 }
0x1bbd   : > { %5828 = vmatprep.subr.mxu0 %v7081_v25 }
0x1bbe   : > { %5829 = vmatpush3.msra.mxu0 %v4463_v50 }
0x1bbf   : > { %5830 = vmatprep.subr.mxu0 %v7081_v25 }
0x1bc0   : > { %5831 = vmatpush3.msra.mxu0 %v4462_v39 }
0x1bc1   : > { %5832 = vmatprep.subr.mxu0 %v7081_v25 }
0x1bc2   : > { %5833 = vmatpush3.msra.mxu0 %v4461_v63 }
0x1bc3   : > { %5834 = vmatprep.subr.mxu0 %v7081_v25 }
0x1bc4   : > { %5835 = vmatpush3.msra.mxu0 %v4460_v43 }
0x1bc5   : > { %5836 = vmatprep.subr.mxu0 %v7081_v25 }
0x1bc6   : > { %5837 = vmatpush3.msra.mxu0 %v4459_v46 }
0x1c77   : > { %v4614_v57 = vpop.f32.mrf.mxu0 }
0x1c78   : > { %v4618_v58 = vsub.f32 %v4456_v4, %v4614_v57 }
0x1c79   : > { %v5821_v60 = vpop.f32.mrf.mxu0 }
0x1c7a   : > { %v4619_v0 = vmul.f32 %v4618_v58, %v4618_v58 }
0x1c7c   : > { %5839 = vmatmul.mubr.msk.f32.vlgmr.msra.gmra.mxu0 %vm2593_vm5, %v4619_v0 }
0x1d3c   : > { %v4689_v3 = vpop.f32.mrf.mxu0 }
0x1d3d   : > { %v4693_v37 = vmul.f32 0.125, %v4689_v3 }
0x1d3e   : > { %v5840_v44 = vpop.f32.mrf.mxu0 }
0x1d3f   : > { %v4694_v1 = vadd.f32 1e-05, %v4693_v37 }
0x1d41   : > { %5933 = vrsqrt.f32 %v4694_v1 }
0x1d4e   : > { %v5934_v52 = vpop.eup %5933 }
0x1d4f   : > { %5844 = vmatmul.mubr.msk.f32.vlgmr.msra.gmra.mxu1 %vm1801_vm11, %v5934_v52 }
0x1e0f   : > { %v4765_v25 = vpop.f32.mrf.mxu1 }
0x1e10   : > { %v4769_v2 = vmul.f32 %v4765_v25, %v4618_v58 }
0x1e11   : > { %v5845_v59 = vpop.f32.mrf.mxu1 }
0x1e12   : > { %v4776_v48 = vmul.f32 %v4947_v54, %v4769_v2 }
0x1e14   : > { %v4783_v6 = vadd.f32 %v4948_v45, %v4776_v48 }
0x1e16   : > { %vm4784_vm1 = vcmp.ge.f32.partialorder %v4783_v6, 0.0  ;;  %v4790_v9 = vmul.f32 %v4788_v8, %v4783_v6 }
0x1e18   : > { %v4791_v38 = vsel %vm4784_vm1, %v4783_v6, %v4790_v9 }
0x1e19   : > { %4792 = vst.msk [vmem:[%s1334_s22] sm:$0xff] %vm2593_vm5, %v4791_v38 }
0x1e1a PF: > { %s99_s28 = sadd.s32 1, %s5944_s28  }
0x1e1b   : > { %p96_p4 = scmp.ge.s32.totalorder %s99_s28, 4  }
0x1e1d   :  { %98 = sbr.rel (!%p96_p4) target bundleno = 78 (0x4e), region = 273 }

</bundles_post_ra>
